<compile_context>
chip_gen: v7x
topology: tpu7x:2x2x1
jax: 0.10.0
libtpu: 0.0.40
codegen_flags: <defaults>
</compile_context>

<pallas_src>
import functools

import jax
import jax.numpy as jnp
from jax.experimental import pallas as pl
from jax.experimental.pallas import tpu as pltpu


# ----------------------------------------------------------------------------------
# Fused backwarp + squared-error + weighted-reduction kernel
# ----------------------------------------------------------------------------------
def _warp_ssd_kernel(px_ref, src_ref, out_ref, acc_ref, *, C, H, W):
    t = pl.program_id(1)
    n_t = pl.num_programs(1)

    @pl.when(t == 0)
    def _():
        acc_ref[...] = jnp.zeros_like(acc_ref)

    px = px_ref[0]                       # (T, 3+C) f32: [xs, ys, wgt, tgt_0..tgt_{C-1}]
    xs = px[:, 0:1]                      # sample x coordinate (T, 1)
    ys = px[:, 1:2]                      # sample y coordinate (T, 1)
    wgt = px[:, 2:3]                     # (1 - occ) weight     (T, 1)
    T = px.shape[0]

    rows = jax.lax.broadcasted_iota(jnp.int32, (T, H), 1).astype(jnp.float32)
    cols = jax.lax.broadcasted_iota(jnp.int32, (T, W), 1).astype(jnp.float32)
    # Tent (hat) weights == bilinear interpolation with zeros padding outside the frame.
    ay = jnp.maximum(1.0 - jnp.abs(rows - ys), 0.0)            # (T, H)
    ax = jnp.maximum(1.0 - jnp.abs(cols - xs), 0.0)            # (T, W)

    # Vertical interpolation for ALL channels in one MXU matmul (bf16 in, f32 acc).
    temp = jnp.dot(ay.astype(jnp.bfloat16), src_ref[0],
                   preferred_element_type=jnp.float32)          # (T, C*W)

    err = jnp.zeros((T, 1), jnp.float32)
    for c in range(C):                                          # static unroll; C is small
        # Horizontal interpolation: masked multiply + lane reduce per channel.
        warped_c = jnp.sum(temp[:, c * W:(c + 1) * W] * ax, axis=1, keepdims=True)
        d = warped_c - px[:, 3 + c:4 + c]
        err = err + d * d

    acc_ref[...] += err * wgt                                   # vector accumulate

    @pl.when(t == n_t - 1)
    def _():
        out_ref[0, 0, 0] = jnp.sum(acc_ref[...])                # reduce once per sample


# ----------------------------------------------------------------------------------
# Wrapper
# ----------------------------------------------------------------------------------
def _round_up(x, m):
    return ((x + m - 1) // m) * m


def _pick_tile_pixels(hw, cap=512):
    """Fixed MXU-friendly tile (multiple of 128/256); whole 8-padded frame if smaller."""
    return _round_up(hw, 8) if hw <= cap else cap


def _vmem_limit_bytes(T, H, W, C):
    lane = 128
    src_blk = H * max(C * W, lane) * 2                  # bf16 fused frame, per buffer
    px_blk = T * lane * 4                               # packed per-pixel block, per buffer
    work = T * (max(H, lane) + max(W, lane) + max(C * W, lane) + lane) * 4
    est = 2 * (src_blk + px_blk) + work + (2 << 20)
    return int(min(64 << 20, max(16 << 20, 2 * est)))


def _warped_ssd(src, flow, tgt, wgt, *, flow_coef, tile_pixels=None, src_buffers=None):
    """Per-sample sum over (C,H,W) of wgt * (backwarp(src, flow*coef) - tgt)^2 -> [S]."""
    S, C, H, W = src.shape
    HW = H * W
    T = _pick_tile_pixels(HW) if tile_pixels is None else int(tile_pixels)
    if T % 8 != 0:
        raise ValueError(f"tile_pixels={T} must be a multiple of 8")
    HW_pad = _round_up(HW, T)
    n_t = HW_pad // T

    # ---- plain-JAX glue: ONE packed per-pixel stream [xs, ys, wgt, tgt_0..tgt_{C-1}] ----
    xb = jnp.tile(jnp.arange(W, dtype=jnp.float32), H)          # p % W
    yb = jnp.repeat(jnp.arange(H, dtype=jnp.float32), W)        # p // W
    xs = xb[None, :] + flow[:, 0].reshape(S, HW) * flow_coef
    ys = yb[None, :] + flow[:, 1].reshape(S, HW) * flow_coef
    tgt_flat = jnp.transpose(tgt, (0, 2, 3, 1)).reshape(S, HW, C)
    px = jnp.concatenate(
        [xs[..., None], ys[..., None], wgt.reshape(S, HW, 1), tgt_flat], axis=-1)
    if HW_pad != HW:                                            # zero-weight pixel padding
        px = jnp.pad(px, ((0, 0), (0, HW_pad - HW), (0, 0)))
    px = px.astype(jnp.float32)

    # Fused source layout (S, H, C*W) in bf16 so one matmul covers every channel.
    src_fused = jnp.transpose(src, (0, 2, 1, 3)).reshape(S, H, C * W).astype(jnp.bfloat16)

    K = 3 + C
    src_spec_kwargs = {}
    if src_buffers is not None:            # e.g. 1 on v7x (64 MiB VMEM) to save residency
        src_spec_kwargs["pipeline_mode"] = pl.Buffered(src_buffers)

    grid_spec = pltpu.PrefetchScalarGridSpec(
        num_scalar_prefetch=0,
        grid=(S, n_t),
        in_specs=[
            pl.BlockSpec((1, T, K), lambda s, t: (s, t, 0)),                # packed pixels
            pl.BlockSpec((1, H, C * W), lambda s, t: (s, 0, 0),             # fused frame
                         **src_spec_kwargs),
        ],
        out_specs=pl.BlockSpec((1, 1, 1), lambda s, t: (s, 0, 0),
                               memory_space=pltpu.MemorySpace.SMEM),
        scratch_shapes=[pltpu.VMEM((T, 1), jnp.float32)],
    )

    ssd = pl.pallas_call(
        functools.partial(_warp_ssd_kernel, C=C, H=H, W=W),
        out_shape=jax.ShapeDtypeStruct((S, 1, 1), jnp.float32),
        grid_spec=grid_spec,
        compiler_params=pltpu.CompilerParams(
            dimension_semantics=("parallel", "arbitrary"),
            vmem_limit_bytes=_vmem_limit_bytes(T, H, W, C)),
    )(px, src_fused)
    return ssd.reshape(S)


# ----------------------------------------------------------------------------------
# PhotoMetricLoss.forward
# ----------------------------------------------------------------------------------
def photometric_loss(recon_f, recon_b, flow_f, flow_b, occ_f=None, occ_b=None,
                     flow_coef=20.0, tile_pixels=None, src_buffers=None):
    """recon_*: [B,C,H,W]; flow_*: [B,2,H,W]; occ_*: [B,1,H,W] or None."""
    recon_f = jax.lax.stop_gradient(recon_f).astype(jnp.float32)   # .detach()
    recon_b = jax.lax.stop_gradient(recon_b).astype(jnp.float32)
    flow_f = flow_f.astype(jnp.float32)
    flow_b = flow_b.astype(jnp.float32)
    B, C, H, W = recon_f.shape

    def occ_weight(occ):
        if occ is None:
            return jnp.ones((B, 1, H, W), jnp.float32)
        return 1.0 - occ.astype(jnp.float32)

    # Batch both loss directions into one 2B-sample kernel pass (single launch).
    src = jnp.concatenate([recon_b, recon_f], axis=0)   # frames that get warped
    flw = jnp.concatenate([flow_f, flow_b], axis=0)
    tgt = jnp.concatenate([recon_f, recon_b], axis=0)   # frames compared against
    wgt = jnp.concatenate([occ_weight(occ_f), occ_weight(occ_b)], axis=0)

    ssd = _warped_ssd(src, flw, tgt, wgt, flow_coef=flow_coef,
                      tile_pixels=tile_pixels, src_buffers=src_buffers)
    ssd_f, ssd_b = ssd[:B], ssd[B:]

    def direction_loss(ssd_dir, occ):
        if occ is None:
            return jnp.sum(ssd_dir) / (B * C * H * W)                      # plain mean
        occ_sum = jnp.sum(occ.astype(jnp.float32), axis=(1, 2, 3))         # [B]
        return jnp.mean(ssd_dir / (C * (H * W - occ_sum)))

    return direction_loss(ssd_f, occ_f) + direction_loss(ssd_b, occ_b)


# ----------------------------------------------------------------------------------
# Pure-JAX reference (self-validation only)
# ----------------------------------------------------------------------------------
def _reference_backwarp(src, flow, flow_coef):
    S, C, H, W = src.shape
    xs = jnp.arange(W, dtype=jnp.float32)[None, None, :] + flow[:, 0] * flow_coef
    ys = jnp.arange(H, dtype=jnp.float32)[None, :, None] + flow[:, 1] * flow_coef
    x0 = jnp.floor(xs)
    y0 = jnp.floor(ys)
    wx1 = xs - x0
    wy1 = ys - y0

    def tap(yi, xi, w):
        valid = ((yi >= 0) & (yi < H) & (xi >= 0) & (xi < W)).astype(jnp.float32)
        yc = jnp.clip(yi, 0, H - 1).astype(jnp.int32)
        xc = jnp.clip(xi, 0, W - 1).astype(jnp.int32)
        g = jax.vmap(lambda im, yy, xx: im[:, yy, xx])(src, yc, xc)
        return g * (w * valid)[:, None, :, :]

    return (tap(y0, x0, (1 - wy1) * (1 - wx1)) + tap(y0, x0 + 1, (1 - wy1) * wx1)
            + tap(y0 + 1, x0, wy1 * (1 - wx1)) + tap(y0 + 1, x0 + 1, wy1 * wx1))


def _reference_photometric_loss(recon_f, recon_b, flow_f, flow_b,
                                occ_f=None, occ_b=None, flow_coef=20.0):
    B, C, H, W = recon_f.shape
    w_f = _reference_backwarp(recon_b, flow_f, flow_coef)
    w_b = _reference_backwarp(recon_f, flow_b, flow_coef)

    def one(warped, target, occ):
        if occ is None:
            return jnp.mean((warped - target) ** 2)
        num = jnp.sum((warped - target) ** 2 * (1.0 - occ), axis=(1, 2, 3))
        den = C * (H * W - jnp.sum(occ, axis=(1, 2, 3)))
        return jnp.mean(num / den)

    return one(w_f, recon_f, occ_f) + one(w_b, recon_b, occ_b)


if __name__ == "__main__":
    key = jax.random.PRNGKey(0)
    k1, k2, k3, k4, k5, k6 = jax.random.split(key, 6)

    B, C, H, W = 2, 4, 16, 16
    recon_f = jax.random.normal(k1, (B, C, H, W), jnp.float32)
    recon_b = jax.random.normal(k2, (B, C, H, W), jnp.float32)
    flow_f = 0.2 * jax.random.normal(k3, (B, 2, H, W), jnp.float32)   # *20 -> a few px
    flow_b = 0.2 * jax.random.normal(k4, (B, 2, H, W), jnp.float32)
    occ_f = (jax.random.uniform(k5, (B, 1, H, W)) < 0.25).astype(jnp.float32)
    occ_b = (jax.random.uniform(k6, (B, 1, H, W)) < 0.25).astype(jnp.float32)

    # Default tile -> single-tile path; tile_pixels=96 exercises the multi-tile
    # accumulation + zero-weight padding path (H*W=256 -> padded to 288, 3 tiles).
    loss = photometric_loss(recon_f, recon_b, flow_f, flow_b)
    loss_occ = photometric_loss(recon_f, recon_b, flow_f, flow_b, occ_f, occ_b,
                                tile_pixels=96)
    jax.block_until_ready((loss, loss_occ))

    ref = _reference_photometric_loss(recon_f, recon_b, flow_f, flow_b)
    ref_occ = _reference_photometric_loss(recon_f, recon_b, flow_f, flow_b, occ_f, occ_b)

    assert loss.shape == () and bool(jnp.isfinite(loss)) and bool(jnp.isfinite(loss_occ))
    assert bool(jnp.allclose(loss, ref, rtol=5e-2, atol=1e-3)), (loss, ref)
    assert bool(jnp.allclose(loss_occ, ref_occ, rtol=5e-2, atol=1e-3)), (loss_occ, ref_occ)
    print("KERNEL_OK")
</pallas_src>

<mosaic_0001>
module attributes {stable_mosaic.version = 11 : i64} {
  func.func @_warp_ssd_kernel(%arg0: i32, %arg1: i32, %arg2: memref<1x256x7xf32, #tpu.memory_space<vmem>>, %arg3: memref<1x16x64xbf16, #tpu.memory_space<vmem>>, %arg4: memref<1x1x1xf32, #tpu.memory_space<smem>>, %arg5: memref<256x1xf32, #tpu.memory_space<vmem>>) attributes {dimension_semantics = [#tpu.dimension_semantics<parallel>, #tpu.dimension_semantics<arbitrary>], iteration_bounds = array<i64: 4, 1>, scalar_prefetch = 0 : i64, scratch_operands = 1 : i64, tpu.core_type = #tpu.core_type<tc>, window_params = [{transform_indices = @transform_0, window_bounds = array<i64: 1, 256, 7>}, {transform_indices = @transform_1, window_bounds = array<i64: 1, 16, 64>}, {transform_indices = @transform_2, window_bounds = array<i64: 1, 1, 1>}]} {
    %c0_i32 = arith.constant 0 : i32
    %0 = arith.cmpi eq, %arg1, %c0_i32 : i32
    %1 = arith.extui %0 : i1 to i32
    %c0_i32_0 = arith.constant 0 : i32
    %2 = arith.cmpi ne, %1, %c0_i32_0 : i32
    scf.if %2 {
      %cst_21 = arith.constant 0.000000e+00 : f32
      %70 = vector.broadcast %cst_21 : f32 to vector<256x1xf32>
      %c0_22 = arith.constant 0 : index
      %c0_23 = arith.constant 0 : index
      %71 = vector.load %arg5[%c0_22, %c0_23] : memref<256x1xf32, #tpu.memory_space<vmem>>, vector<256x1xf32>
      tpu.vector_store %arg5[%c0_22, %c0_23], %70 {strides = array<i32>} : memref<256x1xf32, #tpu.memory_space<vmem>>, vector<256x1xf32>,
    } else {
    }
    %c0 = arith.constant 0 : index
    %c0_1 = arith.constant 0 : index
    %c0_2 = arith.constant 0 : index
    %3 = vector.load %arg2[%c0, %c0_1, %c0_2] : memref<1x256x7xf32, #tpu.memory_space<vmem>>, vector<1x256x7xf32>
    %4 = vector.shape_cast %3 : vector<1x256x7xf32> to vector<256x7xf32>
    %5 = vector.extract_strided_slice %4 {offsets = [0, 0], sizes = [256, 1], strides = [1, 1]} : vector<256x7xf32> to vector<256x1xf32>
    %6 = vector.extract_strided_slice %4 {offsets = [0, 1], sizes = [256, 1], strides = [1, 1]} : vector<256x7xf32> to vector<256x1xf32>
    %7 = vector.extract_strided_slice %4 {offsets = [0, 2], sizes = [256, 1], strides = [1, 1]} : vector<256x7xf32> to vector<256x1xf32>
    %8 = tpu.iota {dimensions = array<i32: 1>} : vector<256x16xi32>
    %9 = arith.sitofp %8 : vector<256x16xi32> to vector<256x16xf32>
    %10 = tpu.iota {dimensions = array<i32: 1>} : vector<256x16xi32>
    %11 = arith.sitofp %10 : vector<256x16xi32> to vector<256x16xf32>
    %12 = vector.broadcast %6 : vector<256x1xf32> to vector<256x16xf32>
    %13 = arith.subf %9, %12 : vector<256x16xf32>
    %14 = math.absf %13 : vector<256x16xf32>
    %cst = arith.constant 1.000000e+00 : f32
    %15 = vector.broadcast %cst : f32 to vector<256x16xf32>
    %16 = arith.subf %15, %14 : vector<256x16xf32>
    %cst_3 = arith.constant 0.000000e+00 : f32
    %17 = vector.broadcast %cst_3 : f32 to vector<256x16xf32>
    %18 = arith.maximumf %16, %17 : vector<256x16xf32>
    %19 = vector.broadcast %5 : vector<256x1xf32> to vector<256x16xf32>
    %20 = arith.subf %11, %19 : vector<256x16xf32>
    %21 = math.absf %20 : vector<256x16xf32>
    %cst_4 = arith.constant 1.000000e+00 : f32
    %22 = vector.broadcast %cst_4 : f32 to vector<256x16xf32>
    %23 = arith.subf %22, %21 : vector<256x16xf32>
    %cst_5 = arith.constant 0.000000e+00 : f32
    %24 = vector.broadcast %cst_5 : f32 to vector<256x16xf32>
    %25 = arith.maximumf %23, %24 : vector<256x16xf32>
    %26 = arith.truncf %18 : vector<256x16xf32> to vector<256x16xbf16>
    %c0_6 = arith.constant 0 : index
    %c0_7 = arith.constant 0 : index
    %c0_8 = arith.constant 0 : index
    %27 = vector.load %arg3[%c0_6, %c0_7, %c0_8] : memref<1x16x64xbf16, #tpu.memory_space<vmem>>, vector<1x16x64xbf16>
    %28 = vector.shape_cast %27 : vector<1x16x64xbf16> to vector<16x64xbf16>
    %cst_9 = arith.constant dense<0.000000e+00> : vector<256x64xf32>
    %29 = tpu.matmul %26, %28, %cst_9 {dimension_numbers = #tpu.dot_dimension_numbers<[1], [0], [0], [1], [0, 0, 1, 1], [], []>} : vector<256x16xbf16>, vector<16x64xbf16>, vector<256x64xf32> -> vector<256x64xf32>
    %cst_10 = arith.constant 0.000000e+00 : f32
    %30 = vector.broadcast %cst_10 : f32 to vector<256x1xf32>
    %31 = vector.extract_strided_slice %29 {offsets = [0, 0], sizes = [256, 16], strides = [1, 1]} : vector<256x64xf32> to vector<256x16xf32>
    %32 = arith.mulf %31, %25 : vector<256x16xf32>
    %cst_11 = arith.constant dense<0.000000e+00> : vector<256xf32>
    %33 = vector.multi_reduction <add>, %32, %cst_11 [1] : vector<256x16xf32> to vector<256xf32>
    %34 = vector.shape_cast %33 : vector<256xf32> to vector<256x1xf32>
    %35 = vector.extract_strided_slice %4 {offsets = [0, 3], sizes = [256, 1], strides = [1, 1]} : vector<256x7xf32> to vector<256x1xf32>
    %36 = arith.subf %34, %35 : vector<256x1xf32>
    %37 = arith.mulf %36, %36 : vector<256x1xf32>
    %38 = arith.addf %30, %37 : vector<256x1xf32>
    %39 = vector.extract_strided_slice %29 {offsets = [0, 16], sizes = [256, 16], strides = [1, 1]} : vector<256x64xf32> to vector<256x16xf32>
    %40 = arith.mulf %39, %25 : vector<256x16xf32>
    %cst_12 = arith.constant dense<0.000000e+00> : vector<256xf32>
    %41 = vector.multi_reduction <add>, %40, %cst_12 [1] : vector<256x16xf32> to vector<256xf32>
    %42 = vector.shape_cast %41 : vector<256xf32> to vector<256x1xf32>
    %43 = vector.extract_strided_slice %4 {offsets = [0, 4], sizes = [256, 1], strides = [1, 1]} : vector<256x7xf32> to vector<256x1xf32>
    %44 = arith.subf %42, %43 : vector<256x1xf32>
    %45 = arith.mulf %44, %44 : vector<256x1xf32>
    %46 = arith.addf %38, %45 : vector<256x1xf32>
    %47 = vector.extract_strided_slice %29 {offsets = [0, 32], sizes = [256, 16], strides = [1, 1]} : vector<256x64xf32> to vector<256x16xf32>
    %48 = arith.mulf %47, %25 : vector<256x16xf32>
    %cst_13 = arith.constant dense<0.000000e+00> : vector<256xf32>
    %49 = vector.multi_reduction <add>, %48, %cst_13 [1] : vector<256x16xf32> to vector<256xf32>
    %50 = vector.shape_cast %49 : vector<256xf32> to vector<256x1xf32>
    %51 = vector.extract_strided_slice %4 {offsets = [0, 5], sizes = [256, 1], strides = [1, 1]} : vector<256x7xf32> to vector<256x1xf32>
    %52 = arith.subf %50, %51 : vector<256x1xf32>
    %53 = arith.mulf %52, %52 : vector<256x1xf32>
    %54 = arith.addf %46, %53 : vector<256x1xf32>
    %55 = vector.extract_strided_slice %29 {offsets = [0, 48], sizes = [256, 16], strides = [1, 1]} : vector<256x64xf32> to vector<256x16xf32>
    %56 = arith.mulf %55, %25 : vector<256x16xf32>
    %cst_14 = arith.constant dense<0.000000e+00> : vector<256xf32>
    %57 = vector.multi_reduction <add>, %56, %cst_14 [1] : vector<256x16xf32> to vector<256xf32>
    %58 = vector.shape_cast %57 : vector<256xf32> to vector<256x1xf32>
    %59 = vector.extract_strided_slice %4 {offsets = [0, 6], sizes = [256, 1], strides = [1, 1]} : vector<256x7xf32> to vector<256x1xf32>
    %60 = arith.subf %58, %59 : vector<256x1xf32>
    %61 = arith.mulf %60, %60 : vector<256x1xf32>
    %62 = arith.addf %54, %61 : vector<256x1xf32>
    %c0_15 = arith.constant 0 : index
    %c0_16 = arith.constant 0 : index
    %63 = vector.load %arg5[%c0_15, %c0_16] : memref<256x1xf32, #tpu.memory_space<vmem>>, vector<256x1xf32>
    %64 = arith.mulf %62, %7 : vector<256x1xf32>
    %65 = arith.addf %63, %64 : vector<256x1xf32>
    %c0_17 = arith.constant 0 : index
    %c0_18 = arith.constant 0 : index
    %66 = vector.load %arg5[%c0_17, %c0_18] : memref<256x1xf32, #tpu.memory_space<vmem>>, vector<256x1xf32>
    tpu.vector_store %arg5[%c0_17, %c0_18], %65 {strides = array<i32>} : memref<256x1xf32, #tpu.memory_space<vmem>>, vector<256x1xf32>,
    %c0_i32_19 = arith.constant 0 : i32
    %67 = arith.cmpi eq, %arg1, %c0_i32_19 : i32
    %68 = arith.extui %67 : i1 to i32
    %c0_i32_20 = arith.constant 0 : i32
    %69 = arith.cmpi ne, %68, %c0_i32_20 : i32
    scf.if %69 {
      %c0_21 = arith.constant 0 : index
      %c0_22 = arith.constant 0 : index
      %70 = vector.load %arg5[%c0_21, %c0_22] : memref<256x1xf32, #tpu.memory_space<vmem>>, vector<256x1xf32>
      %71 = vector.shape_cast %70 : vector<256x1xf32> to vector<1x256x1xf32>
      %cst_23 = arith.constant dense<0.000000e+00> : vector<1xf32>
      %72 = vector.multi_reduction <add>, %71, %cst_23 [1, 2] : vector<1x256x1xf32> to vector<1xf32>
      %73 = vector.shape_cast %72 : vector<1xf32> to vector<1x1x1xf32>
      %74 = vector.extract %73[0, 0, 0] : f32 from vector<1x1x1xf32>
      %c0_24 = arith.constant 0 : index
      %c0_25 = arith.constant 0 : index
      %c0_26 = arith.constant 0 : index
      %75 = memref.load %arg4[%c0_24, %c0_25, %c0_26] : memref<1x1x1xf32, #tpu.memory_space<smem>>
      memref.store %74, %arg4[%c0_24, %c0_25, %c0_26] : memref<1x1x1xf32, #tpu.memory_space<smem>>
    } else {
    }
    return
  }
  func.func @transform_0(%arg0: i32, %arg1: i32) -> (i32, i32, i32) {
    %c0_i32 = arith.constant 0 : i32
    %c0_i32_0 = arith.constant 0 : i32
    return %arg0, %arg1, %c0_i32 : i32, i32, i32
  }
  func.func @transform_1(%arg0: i32, %arg1: i32) -> (i32, i32, i32) {
    %c0_i32 = arith.constant 0 : i32
    %c0_i32_0 = arith.constant 0 : i32
    %c0_i32_1 = arith.constant 0 : i32
    return %arg0, %c0_i32, %c0_i32_0 : i32, i32, i32
  }
  func.func @transform_2(%arg0: i32, %arg1: i32) -> (i32, i32, i32) {
    %c0_i32 = arith.constant 0 : i32
    %c0_i32_0 = arith.constant 0 : i32
    %c0_i32_1 = arith.constant 0 : i32
    return %arg0, %c0_i32, %c0_i32_0 : i32, i32, i32
  }
}

</mosaic_0001>

<bundles_post_ra>
// kernel: tpu_custom_call.1
= control target key start
LH: loop header
LB: loop body
LE: loop exit
PB: predicated region body
PF: predicated region fallthrough
CT: control target
= control target key end

     0   :  { %7 = vsyncpa [#allocation4], 0  ;;  %s6058_s0 = inlined_call_operand.vmem [shape: f32[4,256,7], index: 0, kind: input, shape index: {}]   ;;  %s6059_s1 = inlined_call_operand.vmem [shape: bf16[4,16,64], index: 1, kind: input, shape index: {}]   ;;  %s6060_s2 = inlined_call_operand.vmem [shape: f32[4,1,1], index: 2, kind: output, shape index: {}]  }
   0x1   :  { %9 = vsyncpa [#allocation4 + $0x1], 0  ;;  %s3898_s9 = smov 0   ;;  %s3900_s10 = smov 0  }
   0x2   :  { %s3902_s11 = smov 0   ;;  %s3904_s12 = smov 0  }
   0x3   :  { %s3906_s13 = smov 0   ;;  %s3908_s14 = smov 0  }
   0x4 LB: > { %s3585_s15 = sadd.s32 4294967295, %s3868_s14   ;;  %s3586_s16 = sadd.s32 4294967294, %s3868_s14   ;;  %s3868_s14 = sphi %s3908_s14, %s15_s14   ;;  %s3864_s13 = sphi %s3906_s13, %s6457_s13   ;;  %s3860_s12 = sphi %s3904_s12, %s6456_s12   ;;  %s3856_s11 = sphi %s3902_s11, %s6455_s11   ;;  %s3852_s10 = sphi %s3900_s10, %s6454_s10   ;;  %s3848_s9 = sphi %s3898_s9, %s6453_s9  }
   0x5   : > { %s27_s17 = sadd.s32 1, %s3864_s13  ;;  %s88_s18 = sadd.s32 1, %s3856_s11 }
   0x6   : > { %p29_p0 = scmp.ge.s32.totalorder %s27_s17, 4  ;;  %p98_p1 = scmp.ne.s32.totalorder %s3856_s11, %s3852_s10 }
   0x7   : > { %p99_p2 = scmp.eq.s32.totalorder %s3585_s15, 3  ;;  %p104_p3 = scmp.ne.s32.totalorder %s3852_s10, %s3848_s9 }
   0x8   : > { %s6459_s17 = smov (%p29_p0, %s27_s17), 0  ;;  %p105_p5 = scmp.eq.s32.totalorder %s3586_s16, 3 }
   0x9   : > { %p3938_p4 = por %p99_p2, %p98_p1  ;;  %s85_s20 = ssub.s32 %s3864_s13, %s6459_s17 }
   0xa   : > { %p3589_p6 = scmp.ge.s32.totalorder %s3868_s14, 1  ;;  %p86_p7 = scmp.eq.s32.totalorder %s85_s20, 0 }
   0xb   : > { %p3945_p8 = por %p105_p5, %p104_p3  ;;  %p144_p9 = scmp.lt.s32.totalorder %s3868_s14, 5 }
   0xc   : > { %s3951_s22 = scalar_select %p86_p7, %s3856_s11, %s88_s18  }
   0xd   : > { %p145_p10 = pnand %p3589_p6, %p144_p9 }
   0xf   : > { %148 = sbr.rel (%p145_p10) target bundleno = 2183 (0x887), region = 28 }
  0x16   : > { %p176_p11 = scmp.lt.s32.totalorder %s3860_s12, 3  ;;  %v3870_v0 = vmov 1   ;;  %v3871_v34 = vmov 0   ;;  %v260_v35 = vlaneseq  ;;  %vm831_vm0 = vcmask 130048   ;;  %s3872_s4 = smov 16  }
  0x17   : > { %3736 = vset.pattern.permute.xlu1 %v3870_v0  ;;  %3735 = vset.pattern.permute.xlu0 %v3870_v0  ;;  %s3873_s5 = smov 32   ;;  %s3874_s6 = smov 112   ;;  %vm195_vm1 = vcmask 7168  }
  0x18   : > { %s177_s23 = scalar_select %p176_p11, %s3860_s12, 3  ;;  %v261_v36 = vand.u32 127, %v260_v35 }
  0x19   : > { %s3875_s7 = smov 96   ;;  %s3876_s8 = smov 127  }
  0x1a   : > { %s3615_s24 = sshll.u32 %s177_s23, 8  ;;  %s3616_s28 = sshll.u32 %s177_s23, 3  ;;  %v4031_v37 = vcvt.s32.f32 %v261_v36 }
  0x1b   : > { %s3958_s27 = scalar_lea.vmem %s6058_s0, %s3615_s24  ;;  %s189_s3 = scalar_lea.vmem %s6059_s1, %s3616_s28 }
  0x1c   : > { %v3961_v1 = vld [vmem:[%s3958_s27 + $0x10] sm:$0xff]  ;;  %v3964_v2 = vld [vmem:[%s3958_s27] sm:$0xff]  ;;  %v3969_v3 = vld [vmem:[%s3958_s27 + $0x18] sm:$0xff]  ;;  %s3877_s15 = smov 48   ;;  %s3878_s16 = smov 80  }
  0x1d   : > { %275 = vperm.xlu1 %3736, %v3961_v1   ;;  %265 = vperm.xlu0 %3735, %v3964_v2   ;;  %v3972_v4 = vld [vmem:[%s3958_s27 + $0x8] sm:$0xff]  ;;  %v3980_v6 = vld [vmem:[%s3958_s27 + $0x20] sm:$0xff]  ;;  %v3988_v7 = vld [vmem:[%s3958_s27 + $0x38] sm:$0xff]  ;;  %s3879_s18 = smov 126   ;;  %s3880_s20 = smov 125  }
  0x1e   : > { %v3977_v5 = vld [vmem:[%s3958_s27 + $0x28] sm:$0xff]  ;;  %v3991_v8 = vld [vmem:[%s3958_s27 + $0x30] sm:$0xff]  ;;  %v3739_v9 = vld [vmem:[%s189_s3] sm:$0xff]   ;;  %s3881_s23 = smov 1   ;;  %s172_s24 = sand.u32 1, %s3852_s10  }
  0x1f   : > { %v3996_v10 = vld [vmem:[%s3958_s27 + $0x48] sm:$0xff]  ;;  %v236_v11 = vld [vmem:[%s3958_s27 + $0x40] sm:$0xff]  ;;  %3634 = vmatprep.subr.bf16.mxu0 %v3739_v9  ;;  %3668 = vmatprep.subr.bf16.mxu1 %v3739_v9  ;;  %v239_v12 = vld [vmem:[%s3958_s27 + $0x58] sm:$0xff]  ;;  %s3590_s28 = sshll.u32 %s172_s24, 7 }
  0x20   : > { %3635 = vmatpush3.bf16.msra.mxu0 %v3739_v9  ;;  %3669 = vmatpush3.bf16.msra.mxu1 %v3739_v9  ;;  %v238_v13 = vld [vmem:[%s3958_s27 + $0x50] sm:$0xff]  ;;  %v241_v14 = vld [vmem:[%s3958_s27 + $0x68] sm:$0xff]  ;;  %v240_v15 = vld [vmem:[%s3958_s27 + $0x60] sm:$0xff]  ;;  %s174_s3 = scalar_lea.smem [#allocation3], %s3590_s28 }
  0x21   : > { %280 = vperm.xlu1 %3736, %v3969_v3   ;;  %270 = vperm.xlu0 %3735, %v3972_v4   ;;  %v243_v16 = vld [vmem:[%s3958_s27 + $0x78] sm:$0xff]  ;;  %v242_v17 = vld [vmem:[%s3958_s27 + $0x70] sm:$0xff]  ;;  %v245_v18 = vld [vmem:[%s3958_s27 + $0x88] sm:$0xff] }
  0x22   : > { %v244_v19 = vld [vmem:[%s3958_s27 + $0x80] sm:$0xff]  ;;  %v247_v20 = vld [vmem:[%s3958_s27 + $0x98] sm:$0xff]  ;;  %v246_v21 = vld [vmem:[%s3958_s27 + $0x90] sm:$0xff] }
  0x23   : > { %v249_v22 = vld [vmem:[%s3958_s27 + $0xa8] sm:$0xff]  ;;  %v248_v23 = vld [vmem:[%s3958_s27 + $0xa0] sm:$0xff]  ;;  %v251_v24 = vld [vmem:[%s3958_s27 + $0xb8] sm:$0xff] }
  0x24   : > { %v250_v25 = vld [vmem:[%s3958_s27 + $0xb0] sm:$0xff]  ;;  %v253_v26 = vld [vmem:[%s3958_s27 + $0xc8] sm:$0xff]  ;;  %v252_v27 = vld [vmem:[%s3958_s27 + $0xc0] sm:$0xff] }
  0x25   : > { %290 = vperm.xlu1 %3736, %v3977_v5   ;;  %285 = vperm.xlu0 %3735, %v3980_v6   ;;  %v255_v28 = vld [vmem:[%s3958_s27 + $0xd8] sm:$0xff]  ;;  %v254_v29 = vld [vmem:[%s3958_s27 + $0xd0] sm:$0xff]  ;;  %v257_v30 = vld [vmem:[%s3958_s27 + $0xe8] sm:$0xff] }
  0x26   : > { %v256_v31 = vld [vmem:[%s3958_s27 + $0xe0] sm:$0xff]  ;;  %v259_v32 = vld [vmem:[%s3958_s27 + $0xf8] sm:$0xff]  ;;  %v258_v33 = vld [vmem:[%s3958_s27 + $0xf0] sm:$0xff] }
  0x29   : > { %300 = vperm.xlu1 %3736, %v3988_v7   ;;  %295 = vperm.xlu0 %3735, %v3991_v8  }
  0x2d   : > { %310 = vperm.xlu1 %3736, %v3996_v10   ;;  %305 = vperm.xlu0 %3735, %v236_v11  }
  0x31   : > { %320 = vperm.xlu1 %3736, %v239_v12   ;;  %315 = vperm.xlu0 %3735, %v238_v13  }
  0x35   : > { %330 = vperm.xlu1 %3736, %v241_v14   ;;  %325 = vperm.xlu0 %3735, %v240_v15  }
  0x39   : > { %340 = vperm.xlu1 %3736, %v243_v16   ;;  %335 = vperm.xlu0 %3735, %v242_v17  }
  0x3d   : > { %350 = vperm.xlu1 %3736, %v245_v18   ;;  %345 = vperm.xlu0 %3735, %v244_v19  }
  0x41   : > { %360 = vperm.xlu1 %3736, %v247_v20   ;;  %355 = vperm.xlu0 %3735, %v246_v21  }
  0x45   : > { %370 = vperm.xlu1 %3736, %v249_v22   ;;  %365 = vperm.xlu0 %3735, %v248_v23  }
  0x49   : > { %380 = vperm.xlu1 %3736, %v251_v24   ;;  %375 = vperm.xlu0 %3735, %v250_v25  }
  0x4d   : > { %390 = vperm.xlu1 %3736, %v253_v26   ;;  %385 = vperm.xlu0 %3735, %v252_v27  }
  0x51   : > { %400 = vperm.xlu1 %3736, %v255_v28   ;;  %395 = vperm.xlu0 %3735, %v254_v29  }
  0x55   : > { %410 = vperm.xlu1 %3736, %v257_v30   ;;  %405 = vperm.xlu0 %3735, %v256_v31  }
  0x59   : > { %420 = vperm.xlu1 %3736, %v259_v32   ;;  %415 = vperm.xlu0 %3735, %v258_v33  }
  0x5d   : > { %3738 = vset.pattern.permute.xlu1 %v3871_v34  ;;  %3737 = vset.pattern.permute.xlu0 %v3871_v34 }
  0x5e   : > { %556 = vperm.xlu1 %3738, %v3972_v4   ;;  %552 = vperm.xlu0 %3737, %v3964_v2  }
  0x62   : > { %560 = vperm.xlu1 %3738, %v3961_v1   ;;  %564 = vperm.xlu0 %3737, %v3969_v3  }
  0x66   : > { %568 = vperm.xlu1 %3738, %v3980_v6   ;;  %572 = vperm.xlu0 %3737, %v3977_v5  }
  0x6a   : > { %576 = vperm.xlu1 %3738, %v3991_v8   ;;  %580 = vperm.xlu0 %3737, %v3988_v7  }
  0x6e   : > { %584 = vperm.xlu1 %3738, %v236_v11   ;;  %588 = vperm.xlu0 %3737, %v3996_v10  }
  0x72   : > { %592 = vperm.xlu1 %3738, %v238_v13   ;;  %596 = vperm.xlu0 %3737, %v239_v12  }
  0x76   : > { %600 = vperm.xlu1 %3738, %v240_v15   ;;  %604 = vperm.xlu0 %3737, %v241_v14  }
  0x7a   : > { %608 = vperm.xlu1 %3738, %v242_v17   ;;  %612 = vperm.xlu0 %3737, %v243_v16  }
  0x7e   : > { %616 = vperm.xlu1 %3738, %v244_v19   ;;  %620 = vperm.xlu0 %3737, %v245_v18  }
  0x82   : > { %624 = vperm.xlu1 %3738, %v246_v21   ;;  %628 = vperm.xlu0 %3737, %v247_v20  }
  0x86   : > { %632 = vperm.xlu1 %3738, %v248_v23   ;;  %636 = vperm.xlu0 %3737, %v249_v22  }
  0x8a   : > { %640 = vperm.xlu1 %3738, %v250_v25   ;;  %644 = vperm.xlu0 %3737, %v251_v24  }
  0x8e   : > { %648 = vperm.xlu1 %3738, %v252_v27   ;;  %652 = vperm.xlu0 %3737, %v253_v26  }
  0x92   : > { %656 = vperm.xlu1 %3738, %v254_v29   ;;  %660 = vperm.xlu0 %3737, %v255_v28  }
  0x96   : > { %664 = vperm.xlu1 %3738, %v256_v31   ;;  %668 = vperm.xlu0 %3737, %v257_v30  }
  0x9a   : > { %672 = vperm.xlu1 %3738, %v258_v33   ;;  %676 = vperm.xlu0 %3737, %v259_v32  }
  0x9c   : > { %v276_v38 = vpop.permute.xlu1 %275  ;;  %v266_v39 = vpop.permute.xlu0 %265 }
  0x9d   : > { %v425_v40 = vsub.f32 %v4031_v37, %v276_v38  ;;  %v423_v41 = vsub.f32 %v4031_v37, %v266_v39 }
  0x9f   : > { %v457_v42 = vand.u32 2147483647, %v425_v40  ;;  %v455_v43 = vand.u32 2147483647, %v423_v41 }
  0xa0   : > { %v281_v44 = vpop.permute.xlu1 %280  ;;  %v271_v45 = vpop.permute.xlu0 %270 }
  0xa1   : > { %v426_v46 = vsub.f32 %v4031_v37, %v281_v44  ;;  %v424_v47 = vsub.f32 %v4031_v37, %v271_v45  ;;  %v489_v48 = vsub.f32 1.0, %v457_v42  ;;  %v487_v51 = vsub.f32 1.0, %v455_v43 }
  0xa3   : > { %v458_v49 = vand.u32 2147483647, %v426_v46  ;;  %v456_v50 = vand.u32 2147483647, %v424_v47  ;;  %v521_v58 = vmax.f32 %v489_v48, 0.0  ;;  %v519_v63 = vmax.f32 %v487_v51, 0.0 }
  0xa4   : > { %v291_v52 = vpop.permute.xlu1 %290  ;;  %v286_v53 = vpop.permute.xlu0 %285 }
  0xa5   : > { %v490_v54 = vsub.f32 1.0, %v458_v49  ;;  %v488_v55 = vsub.f32 1.0, %v456_v50  ;;  %v428_v56 = vsub.f32 %v4031_v37, %v291_v52  ;;  %v427_v57 = vsub.f32 %v4031_v37, %v286_v53 }
  0xa7   : > { %v522_v59 = vmax.f32 %v490_v54, 0.0  ;;  %v520_v60 = vmax.f32 %v488_v55, 0.0  ;;  %v460_v61 = vand.u32 2147483647, %v428_v56  ;;  %v459_v62 = vand.u32 2147483647, %v427_v57 }
  0xa8   : > { %v301_v0 = vpop.permute.xlu1 %300  ;;  %v296_v1 = vpop.permute.xlu0 %295 }
  0xa9   : > { %v808_v2 = vpack.c.bf16 %v522_v59, %v521_v58  ;;  %v492_v3 = vsub.f32 1.0, %v460_v61  ;;  %v491_v4 = vsub.f32 1.0, %v459_v62  ;;  %v430_v5 = vsub.f32 %v4031_v37, %v301_v0 }
  0xaa   : > { %v429_v6 = vsub.f32 %v4031_v37, %v296_v1  ;;  %v807_v7 = vpack.c.bf16 %v520_v60, %v519_v63 }
  0xab   : > { %v524_v8 = vmax.f32 %v492_v3, 0.0  ;;  %v523_v9 = vmax.f32 %v491_v4, 0.0  ;;  %v462_v10 = vand.u32 2147483647, %v430_v5 }
  0xac   : > { %v461_v11 = vand.u32 2147483647, %v429_v6  ;;  %3636 = vmatprep.mubr.msk.bf16.mxu0 %vm831_vm0, %v807_v7  ;;  %v311_v12 = vpop.permute.xlu1 %310  ;;  %v306_v13 = vpop.permute.xlu0 %305 }
  0xad   : > { %v809_v14 = vpack.c.bf16 %v524_v8, %v523_v9  ;;  %v494_v15 = vsub.f32 1.0, %v462_v10  ;;  %v432_v16 = vsub.f32 %v4031_v37, %v311_v12  ;;  %3637 = vmatmul.mubr.msk.bf16.vlgmr.msra.gmra.mrb[0].mxu0 %vm831_vm0, %v808_v2  ;;  %v431_v17 = vsub.f32 %v4031_v37, %v306_v13 }
  0xae   : > { %v493_v18 = vsub.f32 1.0, %v461_v11 }
  0xaf   : > { %v526_v19 = vmax.f32 %v494_v15, 0.0  ;;  %v464_v20 = vand.u32 2147483647, %v432_v16  ;;  %v463_v21 = vand.u32 2147483647, %v431_v17  ;;  %3640 = vmatprep.mubr.msk.bf16.mxu0 %vm831_vm0, %v809_v14 }
  0xb0   : > { %v525_v22 = vmax.f32 %v493_v18, 0.0  ;;  %v321_v23 = vpop.permute.xlu1 %320  ;;  %v316_v24 = vpop.permute.xlu0 %315 }
  0xb1   : > { %v496_v25 = vsub.f32 1.0, %v464_v20  ;;  %v495_v26 = vsub.f32 1.0, %v463_v21  ;;  %v434_v27 = vsub.f32 %v4031_v37, %v321_v23  ;;  %v433_v28 = vsub.f32 %v4031_v37, %v316_v24 }
  0xb2   : > { %v810_v29 = vpack.c.bf16 %v526_v19, %v525_v22 }
  0xb3   : > { %v528_v30 = vmax.f32 %v496_v25, 0.0  ;;  %v527_v31 = vmax.f32 %v495_v26, 0.0  ;;  %v466_v32 = vand.u32 2147483647, %v434_v27  ;;  %v465_v33 = vand.u32 2147483647, %v433_v28 }
  0xb4   : > { %v331_v34 = vpop.permute.xlu1 %330  ;;  %v326_v35 = vpop.permute.xlu0 %325 }
  0xb5   : > { %v811_v36 = vpack.c.bf16 %v528_v30, %v527_v31  ;;  %v498_v38 = vsub.f32 1.0, %v466_v32  ;;  %v497_v39 = vsub.f32 1.0, %v465_v33  ;;  %v436_v40 = vsub.f32 %v4031_v37, %v331_v34  ;;  %3641 = vmatmul.mubr.msk.bf16.gmra.mrb[4].mxu0 %vm831_vm0, %v810_v29 }
  0xb6   : > { %v435_v41 = vsub.f32 %v4031_v37, %v326_v35 }
  0xb7   : > { %v530_v42 = vmax.f32 %v498_v38, 0.0  ;;  %v529_v43 = vmax.f32 %v497_v39, 0.0  ;;  %v468_v44 = vand.u32 2147483647, %v436_v40  ;;  %3644 = vmatprep.mubr.msk.bf16.mxu0 %vm831_vm0, %v811_v36 }
  0xb8   : > { %v467_v45 = vand.u32 2147483647, %v435_v41  ;;  %v341_v46 = vpop.permute.xlu1 %340  ;;  %v336_v47 = vpop.permute.xlu0 %335 }
  0xb9   : > { %v812_v48 = vpack.c.bf16 %v530_v42, %v529_v43  ;;  %v500_v49 = vsub.f32 1.0, %v468_v44  ;;  %v438_v50 = vsub.f32 %v4031_v37, %v341_v46  ;;  %v437_v51 = vsub.f32 %v4031_v37, %v336_v47 }
  0xba   : > { %v499_v52 = vsub.f32 1.0, %v467_v45 }
  0xbb   : > { %v532_v53 = vmax.f32 %v500_v49, 0.0  ;;  %v470_v54 = vand.u32 2147483647, %v438_v50  ;;  %v469_v55 = vand.u32 2147483647, %v437_v51 }
  0xbc   : > { %v531_v56 = vmax.f32 %v499_v52, 0.0  ;;  %v351_v57 = vpop.permute.xlu1 %350  ;;  %v346_v58 = vpop.permute.xlu0 %345 }
  0xbd   : > { %v502_v59 = vsub.f32 1.0, %v470_v54  ;;  %v501_v60 = vsub.f32 1.0, %v469_v55  ;;  %v440_v61 = vsub.f32 %v4031_v37, %v351_v57  ;;  %3645 = vmatmul.mubr.msk.bf16.gmra.mrb[8].mxu0 %vm831_vm0, %v812_v48  ;;  %v439_v62 = vsub.f32 %v4031_v37, %v346_v58 }
  0xbe   : > { %v813_v63 = vpack.c.bf16 %v532_v53, %v531_v56 }
  0xbf   : > { %v534_v0 = vmax.f32 %v502_v59, 0.0  ;;  %v533_v1 = vmax.f32 %v501_v60, 0.0  ;;  %v472_v2 = vand.u32 2147483647, %v440_v61  ;;  %v471_v3 = vand.u32 2147483647, %v439_v62 }
  0xc0   : > { %3648 = vmatprep.mubr.msk.bf16.mxu0 %vm831_vm0, %v813_v63  ;;  %v361_v4 = vpop.permute.xlu1 %360  ;;  %v356_v5 = vpop.permute.xlu0 %355 }
  0xc1   : > { %v814_v6 = vpack.c.bf16 %v534_v0, %v533_v1  ;;  %v504_v7 = vsub.f32 1.0, %v472_v2  ;;  %v503_v8 = vsub.f32 1.0, %v471_v3  ;;  %v442_v9 = vsub.f32 %v4031_v37, %v361_v4 }
  0xc2   : > { %v441_v10 = vsub.f32 %v4031_v37, %v356_v5 }
  0xc3   : > { %v536_v11 = vmax.f32 %v504_v7, 0.0  ;;  %v535_v12 = vmax.f32 %v503_v8, 0.0  ;;  %v474_v13 = vand.u32 2147483647, %v442_v9 }
  0xc4   : > { %v473_v14 = vand.u32 2147483647, %v441_v10  ;;  %v371_v15 = vpop.permute.xlu1 %370  ;;  %v366_v16 = vpop.permute.xlu0 %365 }
  0xc5   : > { %v506_v17 = vsub.f32 1.0, %v474_v13  ;;  %v444_v18 = vsub.f32 %v4031_v37, %v371_v15  ;;  %3649 = vmatmul.mubr.msk.bf16.gmra.mrb[12].mxu0 %vm831_vm0, %v814_v6  ;;  %v443_v19 = vsub.f32 %v4031_v37, %v366_v16  ;;  %v815_v20 = vpack.c.bf16 %v536_v11, %v535_v12 }
  0xc6   : > { %v505_v21 = vsub.f32 1.0, %v473_v14 }
  0xc7   : > { %v538_v22 = vmax.f32 %v506_v17, 0.0  ;;  %v476_v23 = vand.u32 2147483647, %v444_v18  ;;  %v475_v24 = vand.u32 2147483647, %v443_v19  ;;  %3652 = vmatprep.mubr.msk.bf16.mxu1 %vm831_vm0, %v815_v20 }
  0xc8   : > { %v537_v25 = vmax.f32 %v505_v21, 0.0  ;;  %v381_v26 = vpop.permute.xlu1 %380  ;;  %v376_v27 = vpop.permute.xlu0 %375 }
  0xc9   : > { %v508_v28 = vsub.f32 1.0, %v476_v23  ;;  %v507_v29 = vsub.f32 1.0, %v475_v24  ;;  %v446_v30 = vsub.f32 %v4031_v37, %v381_v26  ;;  %v445_v31 = vsub.f32 %v4031_v37, %v376_v27 }
  0xca   : > { %v816_v32 = vpack.c.bf16 %v538_v22, %v537_v25 }
  0xcb   : > { %v540_v33 = vmax.f32 %v508_v28, 0.0  ;;  %v539_v34 = vmax.f32 %v507_v29, 0.0  ;;  %v478_v35 = vand.u32 2147483647, %v446_v30  ;;  %v477_v36 = vand.u32 2147483647, %v445_v31 }
  0xcc   : > { %3653 = vmatmul.mubr.msk.bf16.vlgmr.msra.gmra.mrb[0].mxu1 %vm831_vm0, %v816_v32  ;;  %v391_v38 = vpop.permute.xlu1 %390  ;;  %v386_v39 = vpop.permute.xlu0 %385 }
  0xcd   : > { %v817_v40 = vpack.c.bf16 %v540_v33, %v539_v34  ;;  %v510_v41 = vsub.f32 1.0, %v478_v35  ;;  %v509_v42 = vsub.f32 1.0, %v477_v36  ;;  %v448_v43 = vsub.f32 %v4031_v37, %v391_v38 }
  0xce   : > { %v447_v44 = vsub.f32 %v4031_v37, %v386_v39 }
  0xcf   : > { %v542_v45 = vmax.f32 %v510_v41, 0.0  ;;  %v541_v46 = vmax.f32 %v509_v42, 0.0  ;;  %v480_v47 = vand.u32 2147483647, %v448_v43  ;;  %3656 = vmatprep.mubr.msk.bf16.mxu1 %vm831_vm0, %v817_v40 }
  0xd0   : > { %v479_v48 = vand.u32 2147483647, %v447_v44  ;;  %v401_v49 = vpop.permute.xlu1 %400  ;;  %v396_v50 = vpop.permute.xlu0 %395 }
  0xd1   : > { %v818_v51 = vpack.c.bf16 %v542_v45, %v541_v46  ;;  %v512_v52 = vsub.f32 1.0, %v480_v47  ;;  %v450_v53 = vsub.f32 %v4031_v37, %v401_v49  ;;  %v449_v54 = vsub.f32 %v4031_v37, %v396_v50 }
  0xd2   : > { %v511_v55 = vsub.f32 1.0, %v479_v48 }
  0xd3   : > { %v544_v56 = vmax.f32 %v512_v52, 0.0  ;;  %v482_v57 = vand.u32 2147483647, %v450_v53  ;;  %v481_v58 = vand.u32 2147483647, %v449_v54 }
  0xd4   : > { %v543_v59 = vmax.f32 %v511_v55, 0.0  ;;  %3657 = vmatmul.mubr.msk.bf16.gmra.mrb[4].mxu1 %vm831_vm0, %v818_v51  ;;  %v411_v60 = vpop.permute.xlu1 %410  ;;  %v406_v61 = vpop.permute.xlu0 %405 }
  0xd5   : > { %v514_v62 = vsub.f32 1.0, %v482_v57  ;;  %v513_v63 = vsub.f32 1.0, %v481_v58  ;;  %v452_v0 = vsub.f32 %v4031_v37, %v411_v60  ;;  %v451_v1 = vsub.f32 %v4031_v37, %v406_v61 }
  0xd6   : > { %v819_v2 = vpack.c.bf16 %v544_v56, %v543_v59 }
  0xd7   : > { %v546_v3 = vmax.f32 %v514_v62, 0.0  ;;  %v545_v4 = vmax.f32 %v513_v63, 0.0  ;;  %v484_v5 = vand.u32 2147483647, %v452_v0  ;;  %v483_v6 = vand.u32 2147483647, %v451_v1 }
  0xd8   : > { %3660 = vmatprep.mubr.msk.bf16.mxu1 %vm831_vm0, %v819_v2  ;;  %v421_v7 = vpop.permute.xlu1 %420  ;;  %v416_v8 = vpop.permute.xlu0 %415 }
  0xd9   : > { %v820_v9 = vpack.c.bf16 %v546_v3, %v545_v4  ;;  %v516_v10 = vsub.f32 1.0, %v484_v5  ;;  %v515_v11 = vsub.f32 1.0, %v483_v6  ;;  %v454_v12 = vsub.f32 %v4031_v37, %v421_v7 }
  0xda   : > { %v453_v13 = vsub.f32 %v4031_v37, %v416_v8 }
  0xdb   : > { %v548_v14 = vmax.f32 %v516_v10, 0.0  ;;  %v547_v15 = vmax.f32 %v515_v11, 0.0  ;;  %v486_v16 = vand.u32 2147483647, %v454_v12 }
  0xdc   : > { %v485_v17 = vand.u32 2147483647, %v453_v13  ;;  %3661 = vmatmul.mubr.msk.bf16.gmra.mrb[8].mxu1 %vm831_vm0, %v820_v9 }
  0xdd   : > { %v821_v18 = vpack.c.bf16 %v548_v14, %v547_v15  ;;  %v518_v19 = vsub.f32 1.0, %v486_v16  ;;  %v557_v20 = vpop.permute.xlu1 %556  ;;  %v553_v21 = vpop.permute.xlu0 %552 }
  0xde   : > { %v517_v22 = vsub.f32 1.0, %v485_v17  ;;  %v680_v23 = vsub.f32 %v4031_v37, %v557_v20  ;;  %v679_v24 = vsub.f32 %v4031_v37, %v553_v21 }
  0xdf   : > { %v550_v25 = vmax.f32 %v518_v19, 0.0  ;;  %3664 = vmatprep.mubr.msk.bf16.mxu1 %vm831_vm0, %v821_v18 }
  0xe0   : > { %v549_v26 = vmax.f32 %v517_v22, 0.0  ;;  %v712_v27 = vand.u32 2147483647, %v680_v23  ;;  %v711_v28 = vand.u32 2147483647, %v679_v24 }
  0xe1   : > { %v561_v29 = vpop.permute.xlu1 %560  ;;  %v565_v30 = vpop.permute.xlu0 %564 }
  0xe2   : > { %v822_v31 = vpack.c.bf16 %v550_v25, %v549_v26  ;;  %v744_v32 = vsub.f32 1.0, %v712_v27  ;;  %v743_v33 = vsub.f32 1.0, %v711_v28  ;;  %v681_v34 = vsub.f32 %v4031_v37, %v561_v29 }
  0xe3   : > { %v682_v35 = vsub.f32 %v4031_v37, %v565_v30 }
  0xe4   : > { %v4084_v36 = vmax.f32 %v744_v32, 0.0  ;;  %v4086_v38 = vmax.f32 %v743_v33, 0.0  ;;  %v713_v39 = vand.u32 2147483647, %v681_v34  ;;  %3665 = vmatmul.mubr.msk.bf16.gmra.mrb[12].mxu1 %vm831_vm0, %v822_v31 }
  0xe5   : > { %v714_v40 = vand.u32 2147483647, %v682_v35  ;;  %v569_v41 = vpop.permute.xlu1 %568  ;;  %v573_v42 = vpop.permute.xlu0 %572 }
  0xe6   : > { %6162 = vst [vmem:[#allocation6_spill] sm:$0xff] %v4084_v36  ;;  %6163 = vst [vmem:[#allocation7_spill] sm:$0xff] %v4086_v38  ;;  %v745_v43 = vsub.f32 1.0, %v713_v39  ;;  %v683_v44 = vsub.f32 %v4031_v37, %v569_v41  ;;  %v684_v45 = vsub.f32 %v4031_v37, %v573_v42  ;;  %1299 = vrot.lane.b32.xlu1 %v4084_v36, %s3872_s4  ;;  %1297 = vrot.lane.b32.xlu0 %v4086_v38, %s3872_s4 }
  0xe7   : > { %v746_v46 = vsub.f32 1.0, %v714_v40 }
  0xe8   : > { %v4095_v47 = vmax.f32 %v745_v43, 0.0  ;;  %v715_v48 = vand.u32 2147483647, %v683_v44  ;;  %v716_v49 = vand.u32 2147483647, %v684_v45 }
  0xe9   : > { %v4097_v50 = vmax.f32 %v746_v46, 0.0  ;;  %v577_v51 = vpop.permute.xlu1 %576  ;;  %v581_v52 = vpop.permute.xlu0 %580 }
  0xea   : > { %6164 = vst [vmem:[#allocation8_spill] sm:$0xff] %v4095_v47  ;;  %v747_v53 = vsub.f32 1.0, %v715_v48  ;;  %v748_v54 = vsub.f32 1.0, %v716_v49  ;;  %v685_v55 = vsub.f32 %v4031_v37, %v577_v51  ;;  %v686_v56 = vsub.f32 %v4031_v37, %v581_v52  ;;  %1301 = vrot.lane.b32.xlu1 %v4095_v47, %s3872_s4 }
  0xeb   : > { %6165 = vst [vmem:[#allocation9_spill] sm:$0xff] %v4097_v50  ;;  %1303 = vrot.lane.b32.xlu0 %v4097_v50, %s3872_s4 }
  0xec   : > { %v4105_v57 = vmax.f32 %v747_v53, 0.0  ;;  %v4107_v58 = vmax.f32 %v748_v54, 0.0  ;;  %v717_v59 = vand.u32 2147483647, %v685_v55  ;;  %v718_v60 = vand.u32 2147483647, %v686_v56 }
  0xed   : > { %v585_v61 = vpop.permute.xlu1 %584  ;;  %v589_v62 = vpop.permute.xlu0 %588 }
  0xee   : > { %6166 = vst [vmem:[#allocation10_spill] sm:$0xff] %v4105_v57  ;;  %6167 = vst [vmem:[#allocation11_spill] sm:$0xff] %v4107_v58  ;;  %v749_v63 = vsub.f32 1.0, %v717_v59  ;;  %v750_v0 = vsub.f32 1.0, %v718_v60  ;;  %v687_v1 = vsub.f32 %v4031_v37, %v585_v61  ;;  %v688_v2 = vsub.f32 %v4031_v37, %v589_v62  ;;  %1305 = vrot.lane.b32.xlu1 %v4105_v57, %s3872_s4 }
  0xef   : > { %1307 = vrot.lane.b32.xlu0 %v4107_v58, %s3872_s4 }
  0xf0   : > { %v4115_v3 = vmax.f32 %v749_v63, 0.0  ;;  %v4117_v4 = vmax.f32 %v750_v0, 0.0  ;;  %v719_v5 = vand.u32 2147483647, %v687_v1  ;;  %v720_v6 = vand.u32 2147483647, %v688_v2 }
  0xf1   : > { %v593_v7 = vpop.permute.xlu1 %592  ;;  %v597_v8 = vpop.permute.xlu0 %596 }
  0xf2   : > { %6168 = vst [vmem:[#allocation12_spill] sm:$0xff] %v4115_v3  ;;  %6169 = vst [vmem:[#allocation13_spill] sm:$0xff] %v4117_v4  ;;  %v751_v9 = vsub.f32 1.0, %v719_v5  ;;  %v752_v10 = vsub.f32 1.0, %v720_v6  ;;  %v689_v11 = vsub.f32 %v4031_v37, %v593_v7  ;;  %v690_v12 = vsub.f32 %v4031_v37, %v597_v8  ;;  %1309 = vrot.lane.b32.xlu1 %v4115_v3, %s3872_s4 }
  0xf3   : > { %1311 = vrot.lane.b32.xlu0 %v4117_v4, %s3872_s4 }
  0xf4   : > { %v4125_v13 = vmax.f32 %v751_v9, 0.0  ;;  %v4127_v14 = vmax.f32 %v752_v10, 0.0  ;;  %v721_v15 = vand.u32 2147483647, %v689_v11  ;;  %v722_v16 = vand.u32 2147483647, %v690_v12 }
  0xf5   : > { %v601_v17 = vpop.permute.xlu1 %600  ;;  %v605_v18 = vpop.permute.xlu0 %604 }
  0xf6   : > { %6170 = vst [vmem:[#allocation14_spill] sm:$0xff] %v4125_v13  ;;  %6171 = vst [vmem:[#allocation15_spill] sm:$0xff] %v4127_v14  ;;  %v753_v19 = vsub.f32 1.0, %v721_v15  ;;  %v754_v20 = vsub.f32 1.0, %v722_v16  ;;  %v691_v21 = vsub.f32 %v4031_v37, %v601_v17  ;;  %v692_v22 = vsub.f32 %v4031_v37, %v605_v18  ;;  %1313 = vrot.lane.b32.xlu1 %v4125_v13, %s3872_s4 }
  0xf7   : > { %1315 = vrot.lane.b32.xlu0 %v4127_v14, %s3872_s4 }
  0xf8   : > { %v4135_v23 = vmax.f32 %v753_v19, 0.0  ;;  %v4137_v24 = vmax.f32 %v754_v20, 0.0  ;;  %v723_v25 = vand.u32 2147483647, %v691_v21  ;;  %v724_v26 = vand.u32 2147483647, %v692_v22 }
  0xf9   : > { %v609_v27 = vpop.permute.xlu1 %608  ;;  %v613_v28 = vpop.permute.xlu0 %612 }
  0xfa   : > { %6172 = vst [vmem:[#allocation16_spill] sm:$0xff] %v4135_v23  ;;  %6173 = vst [vmem:[#allocation17_spill] sm:$0xff] %v4137_v24  ;;  %v755_v29 = vsub.f32 1.0, %v723_v25  ;;  %v756_v30 = vsub.f32 1.0, %v724_v26  ;;  %v693_v31 = vsub.f32 %v4031_v37, %v609_v27  ;;  %v694_v32 = vsub.f32 %v4031_v37, %v613_v28  ;;  %1317 = vrot.lane.b32.xlu1 %v4135_v23, %s3872_s4 }
  0xfb   : > { %1319 = vrot.lane.b32.xlu0 %v4137_v24, %s3872_s4 }
  0xfc   : > { %v4145_v33 = vmax.f32 %v755_v29, 0.0  ;;  %v4147_v34 = vmax.f32 %v756_v30, 0.0  ;;  %v725_v35 = vand.u32 2147483647, %v693_v31  ;;  %v726_v39 = vand.u32 2147483647, %v694_v32 }
  0xfd   : > { %v617_v40 = vpop.permute.xlu1 %616  ;;  %v621_v41 = vpop.permute.xlu0 %620 }
  0xfe   : > { %6174 = vst [vmem:[#allocation18_spill] sm:$0xff] %v4145_v33  ;;  %6175 = vst [vmem:[#allocation19_spill] sm:$0xff] %v4147_v34  ;;  %v757_v42 = vsub.f32 1.0, %v725_v35  ;;  %v758_v43 = vsub.f32 1.0, %v726_v39  ;;  %v695_v44 = vsub.f32 %v4031_v37, %v617_v40  ;;  %v696_v45 = vsub.f32 %v4031_v37, %v621_v41  ;;  %1321 = vrot.lane.b32.xlu1 %v4145_v33, %s3872_s4 }
  0xff   : > { %1323 = vrot.lane.b32.xlu0 %v4147_v34, %s3872_s4 }
 0x100   : > { %v4155_v46 = vmax.f32 %v757_v42, 0.0  ;;  %v4157_v48 = vmax.f32 %v758_v43, 0.0  ;;  %v727_v49 = vand.u32 2147483647, %v695_v44  ;;  %v728_v51 = vand.u32 2147483647, %v696_v45 }
 0x101   : > { %v625_v52 = vpop.permute.xlu1 %624  ;;  %v629_v53 = vpop.permute.xlu0 %628 }
 0x102   : > { %6176 = vst [vmem:[#allocation20_spill] sm:$0xff] %v4155_v46  ;;  %6177 = vst [vmem:[#allocation21_spill] sm:$0xff] %v4157_v48  ;;  %v759_v54 = vsub.f32 1.0, %v727_v49  ;;  %v760_v55 = vsub.f32 1.0, %v728_v51  ;;  %v697_v56 = vsub.f32 %v4031_v37, %v625_v52  ;;  %v698_v59 = vsub.f32 %v4031_v37, %v629_v53  ;;  %1325 = vrot.lane.b32.xlu1 %v4155_v46, %s3872_s4 }
 0x103   : > { %1327 = vrot.lane.b32.xlu0 %v4157_v48, %s3872_s4 }
 0x104   : > { %v4165_v60 = vmax.f32 %v759_v54, 0.0  ;;  %v4167_v61 = vmax.f32 %v760_v55, 0.0  ;;  %v729_v62 = vand.u32 2147483647, %v697_v56  ;;  %v730_v63 = vand.u32 2147483647, %v698_v59 }
 0x105   : > { %v633_v0 = vpop.permute.xlu1 %632  ;;  %v637_v1 = vpop.permute.xlu0 %636 }
 0x106   : > { %6178 = vst [vmem:[#allocation22_spill] sm:$0xff] %v4165_v60  ;;  %6179 = vst [vmem:[#allocation23_spill] sm:$0xff] %v4167_v61  ;;  %v761_v2 = vsub.f32 1.0, %v729_v62  ;;  %v762_v5 = vsub.f32 1.0, %v730_v63  ;;  %v699_v6 = vsub.f32 %v4031_v37, %v633_v0  ;;  %v700_v7 = vsub.f32 %v4031_v37, %v637_v1  ;;  %1329 = vrot.lane.b32.xlu1 %v4165_v60, %s3872_s4 }
 0x107   : > { %1331 = vrot.lane.b32.xlu0 %v4167_v61, %s3872_s4 }
 0x108   : > { %v4175_v8 = vmax.f32 %v761_v2, 0.0  ;;  %v4177_v9 = vmax.f32 %v762_v5, 0.0  ;;  %v731_v10 = vand.u32 2147483647, %v699_v6  ;;  %v732_v11 = vand.u32 2147483647, %v700_v7 }
 0x109   : > { %v641_v12 = vpop.permute.xlu1 %640  ;;  %v645_v15 = vpop.permute.xlu0 %644 }
 0x10a   : > { %6180 = vst [vmem:[#allocation24_spill] sm:$0xff] %v4175_v8  ;;  %6181 = vst [vmem:[#allocation25_spill] sm:$0xff] %v4177_v9  ;;  %v763_v16 = vsub.f32 1.0, %v731_v10  ;;  %v764_v17 = vsub.f32 1.0, %v732_v11  ;;  %v701_v18 = vsub.f32 %v4031_v37, %v641_v12  ;;  %v702_v19 = vsub.f32 %v4031_v37, %v645_v15  ;;  %1333 = vrot.lane.b32.xlu1 %v4175_v8, %s3872_s4 }
 0x10b   : > { %1335 = vrot.lane.b32.xlu0 %v4177_v9, %s3872_s4 }
 0x10c   : > { %v4185_v20 = vmax.f32 %v763_v16, 0.0  ;;  %v4187_v21 = vmax.f32 %v764_v17, 0.0  ;;  %v733_v22 = vand.u32 2147483647, %v701_v18  ;;  %v734_v25 = vand.u32 2147483647, %v702_v19 }
 0x10d   : > { %v649_v26 = vpop.permute.xlu1 %648  ;;  %v653_v27 = vpop.permute.xlu0 %652 }
 0x10e   : > { %6182 = vst [vmem:[#allocation26_spill] sm:$0xff] %v4185_v20  ;;  %6183 = vst [vmem:[#allocation27_spill] sm:$0xff] %v4187_v21  ;;  %v765_v28 = vsub.f32 1.0, %v733_v22  ;;  %v766_v29 = vsub.f32 1.0, %v734_v25  ;;  %v703_v30 = vsub.f32 %v4031_v37, %v649_v26  ;;  %v704_v31 = vsub.f32 %v4031_v37, %v653_v27  ;;  %1337 = vrot.lane.b32.xlu1 %v4185_v20, %s3872_s4 }
 0x10f   : > { %1339 = vrot.lane.b32.xlu0 %v4187_v21, %s3872_s4 }
 0x110   : > { %v4195_v32 = vmax.f32 %v765_v28, 0.0  ;;  %v4197_v35 = vmax.f32 %v766_v29, 0.0  ;;  %v735_v39 = vand.u32 2147483647, %v703_v30  ;;  %v736_v40 = vand.u32 2147483647, %v704_v31 }
 0x111   : > { %v657_v41 = vpop.permute.xlu1 %656  ;;  %v661_v42 = vpop.permute.xlu0 %660 }
 0x112   : > { %v767_v43 = vsub.f32 1.0, %v735_v39  ;;  %v768_v44 = vsub.f32 1.0, %v736_v40  ;;  %v705_v45 = vsub.f32 %v4031_v37, %v657_v41  ;;  %v706_v49 = vsub.f32 %v4031_v37, %v661_v42  ;;  %1341 = vrot.lane.b32.xlu1 %v4195_v32, %s3872_s4 }
 0x113   : > { %1343 = vrot.lane.b32.xlu0 %v4197_v35, %s3872_s4 }
 0x114   : > { %v4205_v51 = vmax.f32 %v767_v43, 0.0  ;;  %v4207_v52 = vmax.f32 %v768_v44, 0.0  ;;  %v737_v53 = vand.u32 2147483647, %v705_v45  ;;  %v738_v54 = vand.u32 2147483647, %v706_v49 }
 0x115   : > { %v665_v55 = vpop.permute.xlu1 %664  ;;  %v669_v56 = vpop.permute.xlu0 %668 }
 0x116   : > { %v769_v59 = vsub.f32 1.0, %v737_v53  ;;  %v770_v62 = vsub.f32 1.0, %v738_v54  ;;  %v707_v63 = vsub.f32 %v4031_v37, %v665_v55  ;;  %v708_v0 = vsub.f32 %v4031_v37, %v669_v56  ;;  %1345 = vrot.lane.b32.xlu1 %v4205_v51, %s3872_s4 }
 0x117   : > { %1347 = vrot.lane.b32.xlu0 %v4207_v52, %s3872_s4 }
 0x118   : > { %v4215_v1 = vmax.f32 %v769_v59, 0.0  ;;  %v4217_v2 = vmax.f32 %v770_v62, 0.0  ;;  %v739_v5 = vand.u32 2147483647, %v707_v63  ;;  %v740_v6 = vand.u32 2147483647, %v708_v0 }
 0x119   : > { %v673_v7 = vpop.permute.xlu1 %672  ;;  %v677_v10 = vpop.permute.xlu0 %676 }
 0x11a   : > { %v771_v11 = vsub.f32 1.0, %v739_v5  ;;  %v772_v12 = vsub.f32 1.0, %v740_v6  ;;  %v709_v15 = vsub.f32 %v4031_v37, %v673_v7  ;;  %v710_v16 = vsub.f32 %v4031_v37, %v677_v10  ;;  %1349 = vrot.lane.b32.xlu1 %v4215_v1, %s3872_s4 }
 0x11b   : > { %1351 = vrot.lane.b32.xlu0 %v4217_v2, %s3872_s4 }
 0x11c   : > { %v4225_v17 = vmax.f32 %v771_v11, 0.0  ;;  %v4227_v18 = vmax.f32 %v772_v12, 0.0  ;;  %v741_v19 = vand.u32 2147483647, %v709_v15  ;;  %v742_v22 = vand.u32 2147483647, %v710_v16 }
 0x11e   : > { %6184 = vst [vmem:[#allocation28_spill] sm:$0xff] %v4225_v17  ;;  %6185 = vst [vmem:[#allocation29_spill] sm:$0xff] %v4227_v18  ;;  %v773_v25 = vsub.f32 1.0, %v741_v19  ;;  %v774_v26 = vsub.f32 1.0, %v742_v22  ;;  %1353 = vrot.lane.b32.xlu1 %v4225_v17, %s3872_s4 }
 0x11f   : > { %1355 = vrot.lane.b32.xlu0 %v4227_v18, %s3872_s4 }
 0x120   : > { %v4233_v37 = vmax.f32 %v773_v25, 0.0  ;;  %v4235_v27 = vmax.f32 %v774_v26, 0.0 }
 0x122   : > { %6186 = vst [vmem:[#allocation30_spill] sm:$0xff] %v4233_v37  ;;  %6187 = vst [vmem:[#allocation31_spill] sm:$0xff] %v4235_v27  ;;  %1357 = vrot.lane.b32.xlu1 %v4233_v37, %s3872_s4 }
 0x123   : > { %1359 = vrot.lane.b32.xlu0 %v4235_v27, %s3872_s4  ;;  %s3488_s4 = scalar_lea.sflag [#allocation4], %s172_s24 }
 0x126   : > { %1873 = vrot.lane.b32.xlu1 %v4086_v38, %s3873_s5 }
 0x127   : > { %1875 = vrot.lane.b32.xlu0 %v4084_v36, %s3873_s5 }
 0x12a   : > { %1877 = vrot.lane.b32.xlu1 %v4095_v47, %s3873_s5 }
 0x12b   : > { %1879 = vrot.lane.b32.xlu0 %v4097_v50, %s3873_s5 }
 0x12e   : > { %1881 = vrot.lane.b32.xlu1 %v4105_v57, %s3873_s5 }
 0x12f   : > { %1883 = vrot.lane.b32.xlu0 %v4107_v58, %s3873_s5 }
 0x132   : > { %1885 = vrot.lane.b32.xlu1 %v4115_v3, %s3873_s5 }
 0x133   : > { %1887 = vrot.lane.b32.xlu0 %v4117_v4, %s3873_s5 }
 0x136   : > { %1889 = vrot.lane.b32.xlu1 %v4125_v13, %s3873_s5 }
 0x137   : > { %1891 = vrot.lane.b32.xlu0 %v4127_v14, %s3873_s5 }
 0x13a   : > { %1893 = vrot.lane.b32.xlu1 %v4135_v23, %s3873_s5 }
 0x158   : > { %v4263_v28 = vpop.permute.xlu1 %1299  ;;  %v1298_v54 = vpop.permute.xlu0 %1297 }
 0x15c   : > { %v1302_v29 = vpop.permute.xlu1 %1301 }
 0x15d   : > { %v1304_v0 = vpop.permute.xlu0 %1303 }
 0x160   : > { %v4265_v30 = vpop.permute.xlu1 %1305 }
 0x161   : > { %v4306_v12 = vpop.permute.xlu0 %1307 }
 0x164   : > { %v4267_v31 = vpop.permute.xlu1 %1309 }
 0x165   : > { %v4312_v22 = vpop.permute.xlu0 %1311 }
 0x168   : > { %v4271_v40 = vpop.permute.xlu1 %1313 }
 0x16c   : > { %v4284_v53 = vpop.permute.xlu1 %1317 }
 0x170   : > { %v4294_v63 = vpop.permute.xlu1 %1321 }
 0x171   : > { %6189 = vst [vmem:[#allocation33_spill] sm:$0xff] %v4294_v63 }
 0x174   : > { %v4302_v10 = vpop.permute.xlu1 %1325 }
 0x178   : > { %v1330_v16 = vpop.permute.xlu1 %1329 }
 0x180   : > { %v4269_v39 = vpop.f32.mrb[0].mxu0 }
 0x181   : > { %6188 = vst [vmem:[#allocation32_spill] sm:$0xff] %v4269_v39  ;;  %v1395_v41 = vmul.f32 %v4269_v39, %v1302_v29  ;;  %v4274_v42 = vpop.f32.mrb[1].mxu0  ;;  %v1043_v43 = vmul.f32 %v4269_v39, %v4095_v47  ;;  %v1334_v29 = vpop.permute.xlu1 %1333 }
 0x182   : > { %v4278_v44 = vpop.f32.mrb[2].mxu0 }
 0x183   : > { %v4280_v45 = vpop.f32.mrb[3].mxu0  ;;  %1461 = vrot.lane.b32.xlu1 %v1395_v41, %s3874_s6  ;;  %v1079_v49 = vsel %vm831_vm0, %v1043_v43, 0.0  ;;  %v4320_v43 = vpop.permute.xlu0 %1315 }
 0x184   : > { %1080 = vadd.xlane.f32.xlu0 %v1079_v49 }
 0x188   : > { %v4286_v55 = vpop.f32.mrb[4].mxu0 }
 0x189   : > { %v4288_v56 = vpop.f32.mrb[5].mxu0 }
 0x18a   : > { %v4290_v59 = vpop.f32.mrb[6].mxu0 }
 0x18b   : > { %v4292_v62 = vpop.f32.mrb[7].mxu0 }
 0x190   : > { %v4296_v5 = vpop.f32.mrb[8].mxu0 }
 0x191   : > { %v4298_v6 = vpop.f32.mrb[9].mxu0 }
 0x192   : > { %v4300_v7 = vpop.f32.mrb[10].mxu0 }
 0x193   : > { %v4304_v11 = vpop.f32.mrb[11].mxu0 }
 0x198   : > { %v4308_v15 = vpop.f32.mrb[12].mxu0 }
 0x199   : > { %6190 = vst [vmem:[#allocation34_spill] sm:$0xff] %v4308_v15  ;;  %v4310_v19 = vpop.f32.mrb[13].mxu0 }
 0x19a   : > { %6191 = vst [vmem:[#allocation35_spill] sm:$0xff] %v4310_v19  ;;  %v4314_v25 = vpop.f32.mrb[14].mxu0 }
 0x19b   : > { %6192 = vst [vmem:[#allocation36_spill] sm:$0xff] %v4314_v25  ;;  %v4316_v26 = vpop.f32.mrb[15].mxu0 }
 0x19c   : > { %6193 = vst [vmem:[#allocation37_spill] sm:$0xff] %v4316_v26  ;;  %v1393_v26 = vmul.f32 %v1298_v54, %v4274_v42 }
 0x19f   : > { %v4318_v41 = vpop.f32.mrb[0].mxu1 }
 0x1a0   : > { %6194 = vst [vmem:[#allocation38_spill] sm:$0xff] %v4318_v41  ;;  %v1411_v49 = vmul.f32 %v4318_v41, %v1334_v29  ;;  %v4323_v47 = vpop.f32.mrb[1].mxu1  ;;  %v1059_v39 = vmul.f32 %v4318_v41, %v4175_v8  ;;  %v4336_v29 = vpop.permute.xlu0 %1319 }
 0x1a1   : > { %6195 = vst [vmem:[#allocation39_spill] sm:$0xff] %v4323_v47  ;;  %v4327_v18 = vpop.f32.mrb[2].mxu1  ;;  %v1057_v48 = vmul.f32 %v4323_v47, %v4165_v60  ;;  %v1409_v25 = vmul.f32 %v1330_v16, %v4323_v47 }
 0x1a2   : > { %6196 = vst [vmem:[#allocation40_spill] sm:$0xff] %v4327_v18  ;;  %v4329_v34 = vpop.f32.mrb[3].mxu1  ;;  %1493 = vrot.lane.b32.xlu1 %v1411_v49, %s3874_s6  ;;  %v1127_v27 = vsel %vm831_vm0, %v1059_v39, 0.0 }
 0x1a3   : > { %1128 = vadd.xlane.f32.xlu0 %v1127_v27  ;;  %v1121_v41 = vsel %vm831_vm0, %v1057_v48, 0.0 }
 0x1a4   : > { %v4350_v27 = vpop.permute.xlu0 %1323 }
 0x1a5   : > { %6201 = vst [vmem:[#allocation45_spill] sm:$0xff] %v4350_v27  ;;  %v1396_v27 = vmul.f32 %v4278_v44, %v1304_v0 }
 0x1a6   : > { %1457 = vrot.lane.b32.xlu1 %v1393_v26, %s3874_s6 }
 0x1a7   : > { %v4340_v8 = vpop.f32.mrb[4].mxu1  ;;  %1122 = vadd.xlane.f32.xlu0 %v1121_v41 }
 0x1a8   : > { %6197 = vst [vmem:[#allocation41_spill] sm:$0xff] %v4340_v8  ;;  %v4343_v49 = vpop.f32.mrb[5].mxu1  ;;  %v4358_v60 = vpop.permute.xlu0 %1327 }
 0x1a9   : > { %6198 = vst [vmem:[#allocation42_spill] sm:$0xff] %v4343_v49  ;;  %v4345_v39 = vpop.f32.mrb[6].mxu1  ;;  %6205 = vst [vmem:[#allocation49_spill] sm:$0xff] %v4358_v60  ;;  %v1394_v60 = vmul.f32 %v4263_v28, %v4280_v45 }
 0x1aa   : > { %6199 = vst [vmem:[#allocation43_spill] sm:$0xff] %v4345_v39  ;;  %v4347_v17 = vpop.f32.mrb[7].mxu1  ;;  %1489 = vrot.lane.b32.xlu1 %v1409_v25, %s3874_s6 }
 0x1ab   : > { %6200 = vst [vmem:[#allocation44_spill] sm:$0xff] %v4347_v17 }
 0x1ac   : > { %v1332_v47 = vpop.permute.xlu0 %1331 }
 0x1af   : > { %v4352_v54 = vpop.f32.mrb[8].mxu1 }
 0x1b0   : > { %6202 = vst [vmem:[#allocation46_spill] sm:$0xff] %v4352_v54  ;;  %v4354_v26 = vpop.f32.mrb[9].mxu1  ;;  %v1336_v33 = vpop.permute.xlu0 %1335 }
 0x1b1   : > { %6203 = vst [vmem:[#allocation47_spill] sm:$0xff] %v4354_v26  ;;  %v4356_v48 = vpop.f32.mrb[10].mxu1  ;;  %v1412_v37 = vmul.f32 %v4327_v18, %v1336_v33 }
 0x1b2   : > { %6204 = vst [vmem:[#allocation48_spill] sm:$0xff] %v4356_v48  ;;  %v4360_v41 = vpop.f32.mrb[11].mxu1 }
 0x1b3   : > { %6206 = vst [vmem:[#allocation50_spill] sm:$0xff] %v4360_v41 }
 0x1b7   : > { %v4362_v16 = vpop.f32.mrb[12].mxu1 }
 0x1b8   : > { %6207 = vst [vmem:[#allocation51_spill] sm:$0xff] %v4362_v16  ;;  %v4364_v63 = vpop.f32.mrb[13].mxu1 }
 0x1b9   : > { %6208 = vst [vmem:[#allocation52_spill] sm:$0xff] %v4364_v63  ;;  %v4366_v19 = vpop.f32.mrb[14].mxu1  ;;  %v1410_v63 = vmul.f32 %v1332_v47, %v4329_v34  ;;  %v1058_v47 = vmul.f32 %v4329_v34, %v4167_v61 }
 0x1ba   : > { %6209 = vst [vmem:[#allocation53_spill] sm:$0xff] %v4366_v19  ;;  %v4368_v25 = vpop.f32.mrb[15].mxu1 }
 0x1bb   : > { %6210 = vst [vmem:[#allocation54_spill] sm:$0xff] %v4368_v25  ;;  %v1041_v25 = vmul.f32 %v4274_v42, %v4086_v38  ;;  %v1124_v28 = vsel %vm831_vm0, %v1058_v47, 0.0 }
 0x1bd   : > { %1463 = vrot.lane.b32.xlu0 %v1396_v27, %s3874_s6  ;;  %v1073_v0 = vsel %vm831_vm0, %v1041_v25, 0.0  ;;  %v1044_v27 = vmul.f32 %v4278_v44, %v4097_v50  ;;  %v1338_v25 = vpop.permute.xlu1 %1337 }
 0x1bf   : > { %v1082_v33 = vsel %vm831_vm0, %v1044_v27, 0.0  ;;  %v1047_v27 = vmul.f32 %v4286_v55, %v4115_v3 }
 0x1c1   : > { %1495 = vrot.lane.b32.xlu0 %v1412_v37, %s3874_s6  ;;  %v1060_v37 = vmul.f32 %v4327_v18, %v4177_v9  ;;  %v1342_v47 = vpop.permute.xlu1 %1341 }
 0x1c5   : > { %1459 = vrot.lane.b32.xlu0 %v1394_v60, %s3874_s6  ;;  %v1130_v60 = vsel %vm831_vm0, %v1060_v37, 0.0  ;;  %v1091_v37 = vsel %vm831_vm0, %v1047_v27, 0.0 }
 0x1c9   : > { %1491 = vrot.lane.b32.xlu0 %v1410_v63, %s3874_s6  ;;  %v1042_v63 = vmul.f32 %v4280_v45, %v4084_v36  ;;  %v6216_v36 = vld [vmem:[#allocation28_spill] sm:$0xff] }
 0x1ce   : > { %1074 = vadd.xlane.f32.xlu1 %v1073_v0  ;;  %v1076_v0 = vsel %vm831_vm0, %v1042_v63, 0.0 }
 0x1d2   : > { %1083 = vadd.xlane.f32.xlu1 %v1082_v33  ;;  %v1399_v33 = vmul.f32 %v4286_v55, %v4267_v31  ;;  %v1397_v31 = vmul.f32 %v4265_v30, %v4288_v56 }
 0x1d6   : > { %1131 = vadd.xlane.f32.xlu1 %v1130_v60  ;;  %v1063_v60 = vmul.f32 %v4340_v8, %v4195_v32 }
 0x1d8   : > { %v1139_v63 = vsel %vm831_vm0, %v1063_v60, 0.0 }
 0x1da   : > { %1125 = vadd.xlane.f32.xlu1 %v1124_v28  ;;  %v1415_v28 = vmul.f32 %v4340_v8, %v1342_v47  ;;  %v1340_v47 = vpop.permute.xlu0 %1339 }
 0x1de   : > { %v1344_v30 = vpop.permute.xlu0 %1343 }
 0x1e8   : > { %1077 = vadd.xlane.f32.xlu0 %v1076_v0  ;;  %v1045_v0 = vmul.f32 %v4288_v56, %v4105_v57 }
 0x1ea   : > { %v1085_v27 = vsel %vm831_vm0, %v1045_v0, 0.0  ;;  %v1398_v0 = vmul.f32 %v4306_v12, %v4292_v62  ;;  %v1046_v12 = vmul.f32 %v4292_v62, %v4107_v58 }
 0x1eb   : > { %1469 = vrot.lane.b32.xlu1 %v1399_v33, %s3874_s6  ;;  %v1061_v33 = vmul.f32 %v4343_v49, %v4185_v20 }
 0x1ec   : > { %1092 = vadd.xlane.f32.xlu0 %v1091_v37  ;;  %v1413_v37 = vmul.f32 %v1338_v25, %v4343_v49  ;;  %v1048_v25 = vmul.f32 %v4290_v59, %v4117_v4  ;;  %v6229_v49 = vld [vmem:[#allocation54_spill] sm:$0xff] }
 0x1ed   : > { %v1133_v60 = vsel %vm831_vm0, %v1061_v33, 0.0 }
 0x1ef   : > { %1501 = vrot.lane.b32.xlu1 %v1415_v28, %s3874_s6  ;;  %v1400_v28 = vmul.f32 %v4290_v59, %v4312_v22  ;;  %v1094_v22 = vsel %vm831_vm0, %v1048_v25, 0.0  ;;  %v1067_v25 = vmul.f32 %v4352_v54, %v4215_v1 }
 0x1f0   : > { %1140 = vadd.xlane.f32.xlu0 %v1139_v63  ;;  %v1416_v63 = vmul.f32 %v4345_v39, %v1344_v30  ;;  %v1051_v30 = vmul.f32 %v4296_v5, %v4135_v23  ;;  %v6212_v23 = vld [vmem:[#allocation18_spill] sm:$0xff] }
 0x1f3   : > { %1465 = vrot.lane.b32.xlu1 %v1397_v31, %s3874_s6  ;;  %v1414_v31 = vmul.f32 %v1340_v47, %v4347_v17 }
 0x1f4   : > { %1086 = vadd.xlane.f32.xlu0 %v1085_v27  ;;  %v1064_v27 = vmul.f32 %v4345_v39, %v4197_v35 }
 0x1f6   : > { %v1142_v33 = vsel %vm831_vm0, %v1064_v27, 0.0  ;;  %v1151_v27 = vsel %vm831_vm0, %v1067_v25, 0.0 }
 0x1f7   : > { %1497 = vrot.lane.b32.xlu1 %v1413_v37, %s3874_s6  ;;  %v1088_v37 = vsel %vm831_vm0, %v1046_v12, 0.0 }
 0x1f8   : > { %1134 = vadd.xlane.f32.xlu0 %v1133_v60  ;;  %v1062_v60 = vmul.f32 %v4347_v17, %v4187_v21 }
 0x1fa   : > { %v1136_v47 = vsel %vm831_vm0, %v1062_v60, 0.0 }
 0x20e   : > { %1471 = vrot.lane.b32.xlu0 %v1400_v28, %s3874_s6  ;;  %v1346_v28 = vpop.permute.xlu1 %1345 }
 0x20f   : > { %v1417_v60 = vmul.f32 %v1346_v28, %v4354_v26  ;;  %v1402_v28 = vmul.f32 %v4320_v43, %v4304_v11 }
 0x212   : > { %1503 = vrot.lane.b32.xlu0 %v1416_v63, %s3874_s6  ;;  %v1403_v63 = vmul.f32 %v4296_v5, %v4284_v53  ;;  %v1401_v53 = vmul.f32 %v4271_v40, %v4298_v6 }
 0x216   : > { %1467 = vrot.lane.b32.xlu0 %v1398_v0, %s3874_s6  ;;  %v1103_v0 = vsel %vm831_vm0, %v1051_v30, 0.0  ;;  %v1348_v30 = vpop.permute.xlu0 %1347 }
 0x21a   : > { %1499 = vrot.lane.b32.xlu0 %v1414_v31, %s3874_s6  ;;  %v1350_v31 = vpop.permute.xlu1 %1349 }
 0x21b   : > { %1095 = vadd.xlane.f32.xlu1 %v1094_v22  ;;  %v1419_v22 = vmul.f32 %v4352_v54, %v1350_v31 }
 0x21e   : > { %v1354_v40 = vpop.permute.xlu1 %1353 }
 0x21f   : > { %1143 = vadd.xlane.f32.xlu1 %v1142_v33  ;;  %v1049_v33 = vmul.f32 %v4298_v6, %v4125_v13  ;;  %v6213_v13 = vld [vmem:[#allocation35_spill] sm:$0xff] }
 0x220   : > { %v1053_v3 = vmul.f32 %v6213_v13, %v6212_v23 }
 0x221   : > { %v1097_v12 = vsel %vm831_vm0, %v1049_v33, 0.0 }
 0x222   : > { %v1358_v31 = vpop.permute.xlu1 %1357 }
 0x223   : > { %1089 = vadd.xlane.f32.xlu1 %v1088_v37  ;;  %v1065_v37 = vmul.f32 %v4354_v26, %v4205_v51  ;;  %v1423_v58 = vmul.f32 %v4362_v16, %v1358_v31  ;;  %v1109_v31 = vsel %vm831_vm0, %v1053_v3, 0.0 }
 0x226   : > { %v4473_v33 = vpop.permute.xlu1 %1873 }
 0x227   : > { %1137 = vadd.xlane.f32.xlu1 %v1136_v47  ;;  %v1145_v47 = vsel %vm831_vm0, %v1065_v37, 0.0 }
 0x238   : > { %1477 = vrot.lane.b32.xlu1 %v1403_v63, %s3874_s6  ;;  %v1404_v63 = vmul.f32 %v4300_v7, %v4336_v29  ;;  %v1418_v29 = vmul.f32 %v1348_v30, %v4360_v41 }
 0x239   : > { %1104 = vadd.xlane.f32.xlu0 %v1103_v0  ;;  %v1352_v0 = vpop.permute.xlu0 %1351 }
 0x23a   : > { %v1420_v25 = vmul.f32 %v4356_v48, %v1352_v0 }
 0x23c   : > { %1509 = vrot.lane.b32.xlu1 %v1419_v22, %s3874_s6  ;;  %v1052_v22 = vmul.f32 %v4300_v7, %v4137_v24 }
 0x23d   : > { %1152 = vadd.xlane.f32.xlu0 %v1151_v27  ;;  %v4470_v27 = vpop.permute.xlu0 %1355 }
 0x240   : > { %1473 = vrot.lane.b32.xlu1 %v1401_v53, %s3874_s6  ;;  %v1106_v53 = vsel %vm831_vm0, %v1052_v22, 0.0 }
 0x241   : > { %1098 = vadd.xlane.f32.xlu0 %v1097_v12  ;;  %v1068_v12 = vmul.f32 %v4356_v48, %v4217_v2  ;;  %v1360_v43 = vpop.permute.xlu0 %1359 }
 0x243   : > { %v1154_v37 = vsel %vm831_vm0, %v1068_v12, 0.0 }
 0x244   : > { %1505 = vrot.lane.b32.xlu1 %v1417_v60, %s3874_s6  ;;  %v1050_v60 = vmul.f32 %v4304_v11, %v4127_v14 }
 0x245   : > { %1146 = vadd.xlane.f32.xlu0 %v1145_v47  ;;  %v4482_v47 = vpop.permute.xlu1 %1877  ;;  %v4487_v0 = vpop.permute.xlu0 %1875 }
 0x246   : > { %v1100_v30 = vsel %vm831_vm0, %v1050_v60, 0.0 }
 0x249   : > { %v4492_v22 = vpop.permute.xlu0 %1879 }
 0x25b   : > { %1479 = vrot.lane.b32.xlu0 %v1404_v63, %s3874_s6  ;;  %v1066_v63 = vmul.f32 %v4360_v41, %v4207_v52  ;;  %v6226_v41 = vld [vmem:[#allocation45_spill] sm:$0xff] }
 0x25f   : > { %1511 = vrot.lane.b32.xlu0 %v1420_v25, %s3874_s6  ;;  %v4489_v25 = vpop.permute.xlu1 %1881 }
 0x263   : > { %1475 = vrot.lane.b32.xlu0 %v1402_v28, %s3874_s6  ;;  %v1148_v28 = vsel %vm831_vm0, %v1066_v63, 0.0 }
 0x267   : > { %1507 = vrot.lane.b32.xlu0 %v1418_v29, %s3874_s6  ;;  %v4494_v29 = vpop.permute.xlu1 %1885 }
 0x268   : > { %1107 = vadd.xlane.f32.xlu1 %v1106_v53  ;;  %v4496_v53 = vpop.permute.xlu0 %1883 }
 0x26b   : > { %v4498_v12 = vpop.permute.xlu1 %1889 }
 0x26c   : > { %1155 = vadd.xlane.f32.xlu1 %v1154_v37  ;;  %v1055_v37 = vmul.f32 %v4308_v15, %v4155_v46  ;;  %v4502_v60 = vpop.permute.xlu0 %1887 }
 0x26e   : > { %v1115_v63 = vsel %vm831_vm0, %v1055_v37, 0.0  ;;  %v6214_v37 = vld [vmem:[#allocation33_spill] sm:$0xff] }
 0x26f   : > { %v4506_v14 = vpop.permute.xlu1 %1893 }
 0x270   : > { %1101 = vadd.xlane.f32.xlu1 %v1100_v30  ;;  %v1407_v30 = vmul.f32 %v4308_v15, %v4302_v10  ;;  %v4513_v50 = vpop.permute.xlu0 %1891 }
 0x273   : > { %v4515_v38 = vpop.permute.xlu1 %1461 }
 0x274   : > { %1149 = vadd.xlane.f32.xlu1 %v1148_v28  ;;  %v6211_v28 = vld [vmem:[#allocation30_spill] sm:$0xff]  ;;  %v4523_v57 = vpop.xlane.xlu0 %1080 }
 0x275   : > { %v1071_v4 = vmul.f32 %v4362_v16, %v6211_v28  ;;  %6215 = vst [vmem:[#allocation30_spill] sm:$0xff] %v4523_v57  ;;  %v6217_v16 = vld [vmem:[#allocation52_spill] sm:$0xff] }
 0x277   : > { %v1163_v10 = vsel %vm831_vm0, %v1071_v4, 0.0  ;;  %v1421_v4 = vmul.f32 %v1354_v40, %v6217_v16 }
 0x278   : > { %v4532_v54 = vpop.xlane.xlu0 %1128 }
 0x279   : > { %6218 = vst [vmem:[#allocation33_spill] sm:$0xff] %v4532_v54  ;;  %v6222_v54 = vld [vmem:[#allocation49_spill] sm:$0xff] }
 0x27c   : > { %v4538_v57 = vpop.xlane.xlu0 %1122 }
 0x27d   : > { %6219 = vst [vmem:[#allocation28_spill] sm:$0xff] %v4538_v57  ;;  %v6225_v57 = vld [vmem:[#allocation37_spill] sm:$0xff] }
 0x280   : > { %v4542_v3 = vpop.permute.xlu0 %1463 }
 0x285   : > { %1485 = vrot.lane.b32.xlu1 %v1407_v30, %s3874_s6  ;;  %v1405_v30 = vmul.f32 %v6214_v37, %v6213_v13 }
 0x286   : > { %1116 = vadd.xlane.f32.xlu0 %v1115_v63  ;;  %v4525_v63 = vpop.permute.xlu1 %1493 }
 0x289   : > { %1517 = vrot.lane.b32.xlu1 %v1423_v58, %s3874_s6  ;;  %v1069_v58 = vmul.f32 %v6217_v16, %v6216_v36  ;;  %v6223_v16 = vld [vmem:[#allocation36_spill] sm:$0xff] }
 0x28a   : > { %1164 = vadd.xlane.f32.xlu0 %v1163_v10  ;;  %v4536_v37 = vpop.permute.xlu1 %1457 }
 0x28b   : > { %v1157_v10 = vsel %vm831_vm0, %v1069_v58, 0.0 }
 0x28d   : > { %1481 = vrot.lane.b32.xlu1 %v1405_v30, %s3874_s6 }
 0x28e   : > { %1110 = vadd.xlane.f32.xlu0 %v1109_v31  ;;  %v4540_v30 = vpop.permute.xlu1 %1489  ;;  %v4546_v31 = vpop.permute.xlu0 %1495 }
 0x291   : > { %1513 = vrot.lane.b32.xlu1 %v1421_v4, %s3874_s6  ;;  %v1408_v4 = vmul.f32 %v6223_v16, %v6222_v54  ;;  %v6228_v54 = vld [vmem:[#allocation21_spill] sm:$0xff] }
 0x292   : > { %1158 = vadd.xlane.f32.xlu0 %v1157_v10  ;;  %v4544_v26 = vpop.xlane.xlu1 %1074  ;;  %v4552_v48 = vpop.permute.xlu0 %1459  ;;  %v1424_v10 = vmul.f32 %v4366_v19, %v1360_v43 }
 0x293   : > { %6220 = vst [vmem:[#allocation55_spill] sm:$0xff] %v4544_v26  ;;  %v1406_v26 = vmul.f32 %v6226_v41, %v6225_v57 }
 0x296   : > { %v4548_v40 = vpop.xlane.xlu1 %1083  ;;  %v4561_v39 = vpop.permute.xlu0 %1491 }
 0x297   : > { %6221 = vst [vmem:[#allocation56_spill] sm:$0xff] %v4548_v40  ;;  %v1056_v40 = vmul.f32 %v6223_v16, %v6228_v54 }
 0x299   : > { %v1118_v43 = vsel %vm831_vm0, %v1056_v40, 0.0 }
 0x29a   : > { %v4555_v58 = vpop.xlane.xlu1 %1131 }
 0x29b   : > { %6224 = vst [vmem:[#allocation49_spill] sm:$0xff] %v4555_v58  ;;  %v4570_v58 = vpop.xlane.xlu0 %1077 }
 0x29c   : > { %6230 = vst [vmem:[#allocation37_spill] sm:$0xff] %v4570_v58 }
 0x29e   : > { %v4563_v8 = vpop.xlane.xlu1 %1125 }
 0x29f   : > { %6227 = vst [vmem:[#allocation36_spill] sm:$0xff] %v4563_v8  ;;  %v6232_v8 = vld [vmem:[#allocation19_spill] sm:$0xff]  ;;  %v4578_v13 = vpop.xlane.xlu0 %1092 }
 0x2a0   : > { %6233 = vst [vmem:[#allocation45_spill] sm:$0xff] %v4578_v13 }
 0x2a2   : > { %v1470_v15 = vpop.permute.xlu1 %1469 }
 0x2a6   : > { %v1502_v58 = vpop.permute.xlu1 %1501 }
 0x2a8   : > { %1487 = vrot.lane.b32.xlu0 %v1408_v4, %s3874_s6  ;;  %v1422_v4 = vmul.f32 %v4470_v27, %v6229_v49 }
 0x2ac   : > { %1519 = vrot.lane.b32.xlu0 %v1424_v10, %s3874_s6  ;;  %v6231_v10 = vld [vmem:[#allocation31_spill] sm:$0xff] }
 0x2ad   : > { %v1072_v41 = vmul.f32 %v4366_v19, %v6231_v10  ;;  %v4588_v19 = vpop.xlane.xlu0 %1140 }
 0x2ae   : > { %6235 = vst [vmem:[#allocation31_spill] sm:$0xff] %v4588_v19 }
 0x2af   : > { %v1166_v27 = vsel %vm831_vm0, %v1072_v41, 0.0 }
 0x2b0   : > { %1483 = vrot.lane.b32.xlu0 %v1406_v26, %s3874_s6  ;;  %v1054_v26 = vmul.f32 %v6225_v57, %v6232_v8 }
 0x2b1   : > { %v4593_v41 = vpop.xlane.xlu0 %1086 }
 0x2b4   : > { %1515 = vrot.lane.b32.xlu0 %v1422_v4, %s3874_s6  ;;  %v6234_v4 = vld [vmem:[#allocation29_spill] sm:$0xff] }
 0x2b5   : > { %1119 = vadd.xlane.f32.xlu1 %v1118_v43  ;;  %v1070_v40 = vmul.f32 %v6229_v49, %v6234_v4  ;;  %v1112_v43 = vsel %vm831_vm0, %v1054_v26, 0.0  ;;  %6236 = vst [vmem:[#allocation29_spill] sm:$0xff] %v4593_v41  ;;  %v4599_v26 = vpop.xlane.xlu0 %1134 }
 0x2b6   : > { %6237 = vst [vmem:[#allocation57_spill] sm:$0xff] %v4599_v26 }
 0x2b7   : > { %v1160_v13 = vsel %vm831_vm0, %v1070_v40, 0.0 }
 0x2b8   : > { %1895 = vrot.lane.b32.xlu0 %v4137_v24, %s3873_s5  ;;  %v1466_v24 = vpop.permute.xlu1 %1465 }
 0x2b9   : > { %1167 = vadd.xlane.f32.xlu1 %v1166_v27  ;;  %v1472_v19 = vpop.permute.xlu0 %1471 }
 0x2bc   : > { %1899 = vrot.lane.b32.xlu0 %v6232_v8, %s3873_s5  ;;  %v1498_v27 = vpop.permute.xlu1 %1497 }
 0x2bd   : > { %1113 = vadd.xlane.f32.xlu1 %v1112_v43 }
 0x2c0   : > { %1903 = vrot.lane.b32.xlu0 %v6228_v54, %s3873_s5  ;;  %v4601_v43 = vpop.xlane.xlu1 %1095 }
 0x2c1   : > { %1161 = vadd.xlane.f32.xlu1 %v1160_v13  ;;  %6238 = vst [vmem:[#allocation58_spill] sm:$0xff] %v4601_v43  ;;  %v1504_v13 = vpop.permute.xlu0 %1503 }
 0x2c4   : > { %1907 = vrot.lane.b32.xlu0 %v4167_v61, %s3873_s5  ;;  %v4605_v40 = vpop.xlane.xlu1 %1143 }
 0x2c5   : > { %6239 = vst [vmem:[#allocation59_spill] sm:$0xff] %v4605_v40  ;;  %v4615_v26 = vpop.permute.xlu0 %1467 }
 0x2c8   : > { %1911 = vrot.lane.b32.xlu0 %v4177_v9, %s3873_s5  ;;  %v4611_v41 = vpop.xlane.xlu1 %1089  ;;  %v6241_v9 = vld [vmem:[#allocation22_spill] sm:$0xff] }
 0x2c9   : > { %6240 = vst [vmem:[#allocation60_spill] sm:$0xff] %v4611_v41  ;;  %v4621_v40 = vpop.permute.xlu0 %1499  ;;  %v1559_v41 = vsel %vm831_vm0, %v4515_v38, 0.0 }
 0x2cc   : > { %1915 = vrot.lane.b32.xlu0 %v4187_v21, %s3873_s5  ;;  %v4617_v43 = vpop.xlane.xlu1 %1137  ;;  %v6243_v21 = vld [vmem:[#allocation24_spill] sm:$0xff] }
 0x2cd   : > { %6242 = vst [vmem:[#allocation61_spill] sm:$0xff] %v4617_v43  ;;  %v4625_v54 = vpop.xlane.xlu0 %1104  ;;  %v1607_v43 = vsel %vm831_vm0, %v4525_v63, 0.0 }
 0x2ce   : > { %6244 = vst [vmem:[#allocation62_spill] sm:$0xff] %v4625_v54  ;;  %v1556_v54 = vsel %vm831_vm0, %v4552_v48, 0.0  ;;  %v1553_v48 = vsel %vm831_vm0, %v4536_v37, 0.0 }
 0x2d0   : > { %v1478_v61 = vpop.permute.xlu1 %1477 }
 0x2d2   : > { %1897 = vrot.lane.b32.xlu1 %v6212_v23, %s3873_s5 }
 0x2d4   : > { %v1510_v8 = vpop.permute.xlu1 %1509 }
 0x2d5   : > { %v1631_v37 = vsel %vm831_vm0, %v1510_v8, 0.0  ;;  %v1622_v8 = vsel %vm831_vm0, %v1504_v13, 0.0 }
 0x2d6   : > { %1901 = vrot.lane.b32.xlu1 %v4155_v46, %s3873_s5 }
 0x2d8   : > { %v1474_v46 = vpop.permute.xlu1 %1473 }
 0x2da   : > { %1905 = vrot.lane.b32.xlu1 %v6241_v9, %s3873_s5  ;;  %v4629_v9 = vpop.xlane.xlu0 %1152 }
 0x2db   : > { %6245 = vst [vmem:[#allocation63_spill] sm:$0xff] %v4629_v9  ;;  %v1571_v9 = vsel %vm831_vm0, %v1470_v15, 0.0 }
 0x2dc   : > { %v1506_v23 = vpop.permute.xlu1 %1505 }
 0x2de   : > { %1909 = vrot.lane.b32.xlu1 %v6243_v21, %s3873_s5  ;;  %v4633_v21 = vpop.xlane.xlu0 %1098 }
 0x2df   : > { %6246 = vst [vmem:[#allocation64_spill] sm:$0xff] %v4633_v21 }
 0x2e2   : > { %1913 = vrot.lane.b32.xlu1 %v4185_v20, %s3873_s5  ;;  %v1601_v20 = vsel %vm831_vm0, %v4540_v30, 0.0  ;;  %v4639_v38 = vpop.xlane.xlu0 %1146 }
 0x2e3   : > { %6247 = vst [vmem:[#allocation65_spill] sm:$0xff] %v4639_v38 }
 0x2e6   : > { %v1480_v63 = vpop.permute.xlu0 %1479 }
 0x2ea   : > { %v1512_v30 = vpop.permute.xlu0 %1511 }
 0x2eb   : > { %1560 = vadd.xlane.f32.xlu0 %v1559_v41 }
 0x2ee   : > { %v1476_v15 = vpop.permute.xlu0 %1475 }
 0x2ef   : > { %1608 = vadd.xlane.f32.xlu0 %v1607_v43  ;;  %v1619_v43 = vsel %vm831_vm0, %v1502_v58, 0.0  ;;  %v1583_v58 = vsel %vm831_vm0, %v1478_v61, 0.0 }
 0x2f3   : > { %1602 = vadd.xlane.f32.xlu0 %v1601_v20  ;;  %v1565_v20 = vsel %vm831_vm0, %v1466_v24, 0.0  ;;  %v1610_v24 = vsel %vm831_vm0, %v4546_v31, 0.0  ;;  %v1625_v31 = vsel %vm831_vm0, %v1506_v23, 0.0  ;;  %v1616_v23 = vsel %vm831_vm0, %v4621_v40, 0.0 }
 0x2f5   : > { %v4641_v41 = vpop.xlane.xlu1 %1107 }
 0x2f6   : > { %6248 = vst [vmem:[#allocation66_spill] sm:$0xff] %v4641_v41 }
 0x2f7   : > { %1557 = vadd.xlane.f32.xlu0 %v1556_v54  ;;  %v1613_v54 = vsel %vm831_vm0, %v1498_v27, 0.0 }
 0x2f9   : > { %v4645_v21 = vpop.xlane.xlu1 %1155 }
 0x2fa   : > { %6249 = vst [vmem:[#allocation67_spill] sm:$0xff] %v4645_v21 }
 0x2fb   : > { %1572 = vadd.xlane.f32.xlu0 %v1571_v9  ;;  %v1562_v9 = vsel %vm831_vm0, %v4542_v3, 0.0  ;;  %v1577_v3 = vsel %vm831_vm0, %v1474_v46, 0.0  ;;  %v1568_v46 = vsel %vm831_vm0, %v4615_v26, 0.0 }
 0x2fd   : > { %v4648_v49 = vpop.xlane.xlu1 %1101 }
 0x2fe   : > { %6250 = vst [vmem:[#allocation68_spill] sm:$0xff] %v4648_v49  ;;  %v3753_v49 = vld [vmem:[%s3958_s27 + $0xf8] sm:$0xff] }
 0x2ff   : > { %1620 = vadd.xlane.f32.xlu0 %v1619_v43 }
 0x301   : > { %v4656_v43 = vpop.xlane.xlu1 %1149 }
 0x302   : > { %6251 = vst [vmem:[#allocation69_spill] sm:$0xff] %v4656_v43 }
 0x303   : > { %1566 = vadd.xlane.f32.xlu0 %v1565_v20  ;;  %v1508_v20 = vpop.permute.xlu0 %1507 }
 0x304   : > { %v1628_v40 = vsel %vm831_vm0, %v1508_v20, 0.0  ;;  %v1970_v20 = vmul.f32 %v4487_v0, %v4280_v45 }
 0x305   : > { %v1486_v27 = vpop.permute.xlu1 %1485 }
 0x306   : > { %1554 = vadd.xlane.f32.xlu1 %v1553_v48  ;;  %v1604_v48 = vsel %vm831_vm0, %v4561_v39, 0.0  ;;  %v1595_v39 = vsel %vm831_vm0, %v1486_v27, 0.0  ;;  %v1586_v27 = vsel %vm831_vm0, %v1480_v63, 0.0 }
 0x307   : > { %1614 = vadd.xlane.f32.xlu0 %v1613_v54  ;;  %v1574_v54 = vsel %vm831_vm0, %v1472_v19, 0.0 }
 0x30a   : > { %1563 = vadd.xlane.f32.xlu1 %v1562_v9  ;;  %v1518_v9 = vpop.permute.xlu1 %1517 }
 0x30b   : > { %1584 = vadd.xlane.f32.xlu0 %v1583_v58  ;;  %v1643_v19 = vsel %vm831_vm0, %v1518_v9, 0.0  ;;  %v1580_v9 = vsel %vm831_vm0, %v1476_v15, 0.0 }
 0x30e   : > { %1611 = vadd.xlane.f32.xlu1 %v1610_v24  ;;  %v1482_v24 = vpop.permute.xlu1 %1481 }
 0x30f   : > { %1632 = vadd.xlane.f32.xlu0 %v1631_v37  ;;  %v1589_v13 = vsel %vm831_vm0, %v1482_v24, 0.0 }
 0x312   : > { %1605 = vadd.xlane.f32.xlu1 %v1604_v48  ;;  %v1514_v48 = vpop.permute.xlu1 %1513 }
 0x313   : > { %1578 = vadd.xlane.f32.xlu0 %v1577_v3  ;;  %v4664_v61 = vpop.xlane.xlu0 %1116  ;;  %v1637_v26 = vsel %vm831_vm0, %v1514_v48, 0.0  ;;  %v1976_v48 = vmul.f32 %v4290_v59, %v4502_v60  ;;  %v1969_v60 = vmul.f32 %v4473_v33, %v4274_v42  ;;  %v1973_v33 = vmul.f32 %v4489_v25, %v4288_v56 }
 0x314   : > { %6252 = vst [vmem:[#allocation70_spill] sm:$0xff] %v4664_v61  ;;  %v1977_v25 = vmul.f32 %v4498_v12, %v4298_v6 }
 0x316   : > { %1575 = vadd.xlane.f32.xlu1 %v1574_v54  ;;  %v1634_v54 = vsel %vm831_vm0, %v1512_v30, 0.0 }
 0x317   : > { %1626 = vadd.xlane.f32.xlu0 %v1625_v31  ;;  %v4669_v58 = vpop.xlane.xlu0 %1164 }
 0x318   : > { %6253 = vst [vmem:[#allocation71_spill] sm:$0xff] %v4669_v58  ;;  %v3743_v58 = vld [vmem:[%s3958_s27 + $0x88] sm:$0xff] }
 0x31a   : > { %1623 = vadd.xlane.f32.xlu1 %v1622_v8 }
 0x31b   : > { %1596 = vadd.xlane.f32.xlu0 %v1595_v39  ;;  %v4675_v37 = vpop.xlane.xlu0 %1110 }
 0x31c   : > { %6254 = vst [vmem:[#allocation72_spill] sm:$0xff] %v4675_v37  ;;  %v3750_v37 = vld [vmem:[%s3958_s27 + $0x48] sm:$0xff] }
 0x31e   : > { %1569 = vadd.xlane.f32.xlu1 %v1568_v46 }
 0x31f   : > { %1644 = vadd.xlane.f32.xlu0 %v1643_v19  ;;  %v4681_v3 = vpop.xlane.xlu0 %1158  ;;  %v1972_v19 = vmul.f32 %v4278_v44, %v4492_v22 }
 0x320   : > { %6255 = vst [vmem:[#allocation73_spill] sm:$0xff] %v4681_v3 }
 0x322   : > { %1617 = vadd.xlane.f32.xlu1 %v1616_v23 }
 0x323   : > { %1590 = vadd.xlane.f32.xlu0 %v1589_v13  ;;  %v1488_v31 = vpop.permute.xlu0 %1487  ;;  %v1974_v13 = vmul.f32 %v4496_v53, %v4292_v62 }
 0x324   : > { %v1598_v39 = vsel %vm831_vm0, %v1488_v31, 0.0 }
 0x326   : > { %1587 = vadd.xlane.f32.xlu1 %v1586_v27  ;;  %v1978_v27 = vmul.f32 %v4513_v50, %v4304_v11 }
 0x327   : > { %1638 = vadd.xlane.f32.xlu0 %v1637_v26  ;;  %v1520_v8 = vpop.permute.xlu0 %1519 }
 0x328   : > { %v1646_v24 = vsel %vm831_vm0, %v1520_v8, 0.0 }
 0x32a   : > { %1635 = vadd.xlane.f32.xlu1 %v1634_v54 }
 0x32b   : > { %v1484_v63 = vpop.permute.xlu0 %1483 }
 0x32c   : > { %v1592_v30 = vsel %vm831_vm0, %v1484_v63, 0.0 }
 0x32e   : > { %1581 = vadd.xlane.f32.xlu1 %v1580_v9 }
 0x32f   : > { %v1516_v46 = vpop.permute.xlu0 %1515 }
 0x330   : > { %v1640_v15 = vsel %vm831_vm0, %v1516_v46, 0.0 }
 0x332   : > { %1629 = vadd.xlane.f32.xlu1 %v1628_v40  ;;  %v6259_v40 = vld [vmem:[#allocation32_spill] sm:$0xff] }
 0x333   : > { %v1896_v23 = vpop.permute.xlu0 %1895  ;;  %v1971_v8 = vmul.f32 %v6259_v40, %v4482_v47  ;;  %v1975_v47 = vmul.f32 %v4286_v55, %v4494_v29  ;;  %v1979_v29 = vmul.f32 %v4296_v5, %v4506_v14 }
 0x334   : > { %v1980_v54 = vmul.f32 %v4300_v7, %v1896_v23 }
 0x336   : > { %1599 = vadd.xlane.f32.xlu1 %v1598_v39 }
 0x337   : > { %v1900_v22 = vpop.permute.xlu0 %1899 }
 0x338   : > { %v1982_v50 = vmul.f32 %v1900_v22, %v6225_v57  ;;  %v6261_v22 = vld [vmem:[#allocation35_spill] sm:$0xff] }
 0x33a   : > { %1647 = vadd.xlane.f32.xlu1 %v1646_v24 }
 0x33b   : > { %v1904_v26 = vpop.permute.xlu0 %1903 }
 0x33c   : > { %v1984_v39 = vmul.f32 %v6223_v16, %v1904_v26 }
 0x33d   : > { %1919 = vrot.lane.b32.xlu0 %v4197_v35, %s3873_s5 }
 0x33e   : > { %1593 = vadd.xlane.f32.xlu1 %v1592_v30 }
 0x33f   : > { %v1908_v9 = vpop.permute.xlu0 %1907 }
 0x340   : > { %v1986_v30 = vmul.f32 %v1908_v9, %v4329_v34  ;;  %v6263_v9 = vld [vmem:[#allocation39_spill] sm:$0xff] }
 0x341   : > { %1923 = vrot.lane.b32.xlu0 %v4207_v52, %s3873_s5 }
 0x342   : > { %1641 = vadd.xlane.f32.xlu1 %v1640_v15  ;;  %v4714_v0 = vpop.xlane.xlu1 %1119 }
 0x343   : > { %6256 = vst [vmem:[#allocation74_spill] sm:$0xff] %v4714_v0  ;;  %v1912_v24 = vpop.permute.xlu0 %1911 }
 0x344   : > { %v1988_v15 = vmul.f32 %v4327_v18, %v1912_v24 }
 0x345   : > { %1927 = vrot.lane.b32.xlu0 %v4217_v2, %s3873_s5 }
 0x346   : > { %v4725_v53 = vpop.xlane.xlu1 %1167 }
 0x347   : > { %6257 = vst [vmem:[#allocation75_spill] sm:$0xff] %v4725_v53 }
 0x349   : > { %1931 = vrot.lane.b32.xlu0 %v6234_v4, %s3873_s5 }
 0x34a   : > { %v4734_v31 = vpop.xlane.xlu1 %1113 }
 0x34b   : > { %6258 = vst [vmem:[#allocation76_spill] sm:$0xff] %v4734_v31  ;;  %v3751_v31 = vld [vmem:[%s3958_s27 + $0xc8] sm:$0xff] }
 0x34d   : > { %1935 = vrot.lane.b32.xlu0 %v6231_v10, %s3873_s5 }
 0x34e   : > { %v4743_v63 = vpop.xlane.xlu1 %1161 }
 0x34f   : > { %6260 = vst [vmem:[#allocation32_spill] sm:$0xff] %v4743_v63 }
 0x351   : > { %2035 = vrot.lane.b32.xlu0 %v1970_v20, %s3875_s7  ;;  %v1916_v20 = vpop.permute.xlu0 %1915 }
 0x352   : > { %v1898_v46 = vpop.permute.xlu1 %1897 }
 0x353   : > { %1917 = vrot.lane.b32.xlu1 %v4195_v32, %s3873_s5  ;;  %v1981_v12 = vmul.f32 %v1898_v46, %v6261_v22  ;;  %v6265_v46 = vld [vmem:[#allocation42_spill] sm:$0xff] }
 0x355   : > { %2039 = vrot.lane.b32.xlu0 %v1972_v19, %s3875_s7  ;;  %v1990_v19 = vmul.f32 %v1916_v20, %v4347_v17  ;;  %v3754_v17 = vld [vmem:[%s3958_s27 + $0x68] sm:$0xff] }
 0x356   : > { %v1902_v23 = vpop.permute.xlu1 %1901 }
 0x357   : > { %1921 = vrot.lane.b32.xlu1 %v4205_v51, %s3873_s5 }
 0x359   : > { %2043 = vrot.lane.b32.xlu0 %v1974_v13, %s3875_s7 }
 0x35b   : > { %1925 = vrot.lane.b32.xlu1 %v4215_v1, %s3873_s5 }
 0x35d   : > { %2047 = vrot.lane.b32.xlu0 %v1976_v48, %s3875_s7 }
 0x35f   : > { %1929 = vrot.lane.b32.xlu1 %v6216_v36, %s3873_s5 }
 0x361   : > { %2051 = vrot.lane.b32.xlu0 %v1978_v27, %s3875_s7  ;;  %v1906_v27 = vpop.permute.xlu1 %1905 }
 0x363   : > { %1933 = vrot.lane.b32.xlu1 %v6211_v28, %s3873_s5 }
 0x365   : > { %2055 = vrot.lane.b32.xlu0 %v1980_v54, %s3875_s7  ;;  %v6262_v54 = vld [vmem:[#allocation34_spill] sm:$0xff] }
 0x367   : > { %2033 = vrot.lane.b32.xlu1 %v1969_v60, %s3875_s7  ;;  %v1983_v60 = vmul.f32 %v6262_v54, %v1902_v23 }
 0x369   : > { %2059 = vrot.lane.b32.xlu0 %v1982_v50, %s3875_s7  ;;  %v1910_v50 = vpop.permute.xlu1 %1909 }
 0x36b   : > { %2037 = vrot.lane.b32.xlu1 %v1971_v8, %s3875_s7  ;;  %v1985_v8 = vmul.f32 %v1906_v27, %v6263_v9 }
 0x36d   : > { %2063 = vrot.lane.b32.xlu0 %v1984_v39, %s3875_s7 }
 0x36f   : > { %2041 = vrot.lane.b32.xlu1 %v1973_v33, %s3875_s7  ;;  %v6264_v33 = vld [vmem:[#allocation38_spill] sm:$0xff] }
 0x370   : > { %v1987_v24 = vmul.f32 %v6264_v33, %v1910_v50 }
 0x371   : > { %2067 = vrot.lane.b32.xlu0 %v1986_v30, %s3875_s7  ;;  %v1914_v30 = vpop.permute.xlu1 %1913 }
 0x373   : > { %2045 = vrot.lane.b32.xlu1 %v1975_v47, %s3875_s7 }
 0x375   : > { %2071 = vrot.lane.b32.xlu0 %v1988_v15, %s3875_s7  ;;  %v1989_v15 = vmul.f32 %v1914_v30, %v6265_v46 }
 0x377   : > { %2049 = vrot.lane.b32.xlu1 %v1977_v25, %s3875_s7 }
 0x378   : > { %v4760_v13 = vpop.xlane.xlu0 %1560 }
 0x379   : > { %2075 = vrot.lane.b32.xlu0 %v1990_v19, %s3875_s7  ;;  %v3740_v19 = vld [vmem:[%s3958_s27] sm:$0xff] }
 0x37b   : > { %2053 = vrot.lane.b32.xlu1 %v1979_v29, %s3875_s7 }
 0x37c   : > { %v4766_v48 = vpop.xlane.xlu0 %1608 }
 0x37f   : > { %2057 = vrot.lane.b32.xlu1 %v1981_v12, %s3875_s7 }
 0x380   : > { %v4770_v26 = vpop.xlane.xlu0 %1602 }
 0x383   : > { %2061 = vrot.lane.b32.xlu1 %v1983_v60, %s3875_s7  ;;  %v3741_v60 = vld [vmem:[%s3958_s27 + $0x18] sm:$0xff] }
 0x384   : > { %v4774_v14 = vpop.xlane.xlu0 %1557 }
 0x387   : > { %2065 = vrot.lane.b32.xlu1 %v1985_v8, %s3875_s7 }
 0x388   : > { %v4778_v39 = vpop.xlane.xlu0 %1572 }
 0x38b   : > { %2069 = vrot.lane.b32.xlu1 %v1987_v24, %s3875_s7 }
 0x38c   : > { %v4782_v47 = vpop.xlane.xlu0 %1620 }
 0x38f   : > { %2073 = vrot.lane.b32.xlu1 %v1989_v15, %s3875_s7  ;;  %v3742_v15 = vld [vmem:[%s3958_s27 + $0x98] sm:$0xff] }
 0x390   : > { %v4786_v20 = vpop.xlane.xlu0 %1566 }
 0x393   : > { %v1555_v25 = vpop.xlane.xlu1 %1554 }
 0x394   : > { %v1649_v23 = vsub.f32 %v1555_v25, %v3740_v19  ;;  %v4789_v29 = vpop.xlane.xlu0 %1614 }
 0x396   : > { %v1681_v12 = vmul.f32 %v1649_v23, %v1649_v23 }
 0x397   : > { %v1564_v27 = vpop.xlane.xlu1 %1563 }
 0x398   : > { %v1652_v50 = vsub.f32 %v1564_v27, %v3741_v60  ;;  %1745 = vrot.lane.b32.xlu0 %v1681_v12, %s3876_s8  ;;  %v4793_v8 = vpop.xlane.xlu0 %1584 }
 0x39a   : > { %v1684_v24 = vmul.f32 %v1652_v50, %v1652_v50  ;;  %v3744_v50 = vld [vmem:[%s3958_s27 + $0x38] sm:$0xff] }
 0x39b   : > { %v1612_v30 = vpop.xlane.xlu1 %1611 }
 0x39c   : > { %v1668_v53 = vsub.f32 %v1612_v30, %v3742_v15  ;;  %1751 = vrot.lane.b32.xlu0 %v1684_v24, %s3876_s8  ;;  %v4797_v25 = vpop.xlane.xlu0 %1632 }
 0x39e   : > { %v1700_v19 = vmul.f32 %v1668_v53, %v1668_v53  ;;  %v3745_v53 = vld [vmem:[%s3958_s27 + $0xb8] sm:$0xff] }
 0x39f   : > { %v1606_v23 = vpop.xlane.xlu1 %1605 }
 0x3a0   : > { %v1666_v63 = vsub.f32 %v1606_v23, %v3743_v58  ;;  %1783 = vrot.lane.b32.xlu0 %v1700_v19, %s3876_s8  ;;  %v4801_v12 = vpop.xlane.xlu0 %1578 }
 0x3a2   : > { %v1698_v27 = vmul.f32 %v1666_v63, %v1666_v63  ;;  %v3746_v63 = vld [vmem:[%s3958_s27 + $0x28] sm:$0xff] }
 0x3a3   : > { %v1576_v60 = vpop.xlane.xlu1 %1575 }
 0x3a4   : > { %v1656_v3 = vsub.f32 %v1576_v60, %v3744_v50  ;;  %1779 = vrot.lane.b32.xlu0 %v1698_v27, %s3876_s8  ;;  %v4805_v24 = vpop.xlane.xlu0 %1626 }
 0x3a6   : > { %v1688_v30 = vmul.f32 %v1656_v3, %v1656_v3  ;;  %v3747_v3 = vld [vmem:[%s3958_s27 + $0xa8] sm:$0xff] }
 0x3a7   : > { %v1624_v15 = vpop.xlane.xlu1 %1623 }
 0x3a8   : > { %v1672_v21 = vsub.f32 %v1624_v15, %v3745_v53  ;;  %1759 = vrot.lane.b32.xlu0 %v1688_v30, %s3876_s8  ;;  %v4809_v58 = vpop.xlane.xlu0 %1596 }
 0x3aa   : > { %v1704_v19 = vmul.f32 %v1672_v21, %v1672_v21  ;;  %v3748_v21 = vld [vmem:[%s3958_s27 + $0x58] sm:$0xff] }
 0x3ab   : > { %v1570_v23 = vpop.xlane.xlu1 %1569 }
 0x3ac   : > { %v1654_v43 = vsub.f32 %v1570_v23, %v3746_v63  ;;  %1791 = vrot.lane.b32.xlu0 %v1704_v19, %s3876_s8  ;;  %v4813_v27 = vpop.xlane.xlu0 %1644 }
 0x3ae   : > { %v1686_v60 = vmul.f32 %v1654_v43, %v1654_v43  ;;  %v3749_v43 = vld [vmem:[%s3958_s27 + $0xd8] sm:$0xff] }
 0x3af   : > { %v1618_v50 = vpop.xlane.xlu1 %1617 }
 0x3b0   : > { %v1670_v38 = vsub.f32 %v1618_v50, %v3747_v3  ;;  %1755 = vrot.lane.b32.xlu0 %v1686_v60, %s3876_s8  ;;  %v4817_v30 = vpop.xlane.xlu0 %1590 }
 0x3b2   : > { %v1702_v15 = vmul.f32 %v1670_v38, %v1670_v38 }
 0x3b3   : > { %v1588_v53 = vpop.xlane.xlu1 %1587 }
 0x3b4   : > { %v1660_v61 = vsub.f32 %v1588_v53, %v3748_v21  ;;  %1787 = vrot.lane.b32.xlu0 %v1702_v15, %s3876_s8  ;;  %v4821_v19 = vpop.xlane.xlu0 %1638 }
 0x3b6   : > { %v1692_v23 = vmul.f32 %v1660_v61, %v1660_v61 }
 0x3b7   : > { %v1636_v63 = vpop.xlane.xlu1 %1635 }
 0x3b8   : > { %v1676_v0 = vsub.f32 %v1636_v63, %v3749_v43  ;;  %1767 = vrot.lane.b32.xlu0 %v1692_v23, %s3876_s8  ;;  %v1920_v50 = vpop.permute.xlu0 %1919  ;;  %v3752_v43 = vld [vmem:[%s3958_s27 + $0x78] sm:$0xff] }
 0x3ba   : > { %v1708_v60 = vmul.f32 %v1676_v0, %v1676_v0 }
 0x3bb   : > { %v1582_v3 = vpop.xlane.xlu1 %1581 }
 0x3bc   : > { %v1658_v38 = vsub.f32 %v1582_v3, %v3750_v37  ;;  %1799 = vrot.lane.b32.xlu0 %v1708_v60, %s3876_s8  ;;  %v1924_v21 = vpop.permute.xlu0 %1923 }
 0x3be   : > { %v1690_v53 = vmul.f32 %v1658_v38, %v1658_v38 }
 0x3bf   : > { %v1630_v15 = vpop.xlane.xlu1 %1629 }
 0x3c0   : > { %v1674_v41 = vsub.f32 %v1630_v15, %v3751_v31  ;;  %1763 = vrot.lane.b32.xlu0 %v1690_v53, %s3876_s8  ;;  %v1928_v0 = vpop.permute.xlu0 %1927 }
 0x3c2   : > { %v1706_v61 = vmul.f32 %v1674_v41, %v1674_v41 }
 0x3c3   : > { %v1600_v63 = vpop.xlane.xlu1 %1599 }
 0x3c4   : > { %v1664_v23 = vsub.f32 %v1600_v63, %v3752_v43  ;;  %1795 = vrot.lane.b32.xlu0 %v1706_v61, %s3876_s8  ;;  %v1932_v15 = vpop.permute.xlu0 %1931  ;;  %v3755_v43 = vld [vmem:[%s3958_s27 + $0xe8] sm:$0xff] }
 0x3c6   : > { %v1696_v37 = vmul.f32 %v1664_v23, %v1664_v23 }
 0x3c7   : > { %v1648_v3 = vpop.xlane.xlu1 %1647 }
 0x3c8   : > { %v1680_v60 = vsub.f32 %v1648_v3, %v3753_v49  ;;  %1775 = vrot.lane.b32.xlu0 %v1696_v37, %s3876_s8  ;;  %v1936_v23 = vpop.permute.xlu0 %1935  ;;  %v4838_v3 = vld [vmem:[%s3958_s27 + $0x10] sm:$0xff] }
 0x3c9   : > { %6266 = vst [vmem:[#allocation35_spill] sm:$0xff] %v4838_v3  ;;  %v1651_v37 = vsub.f32 %v4760_v13, %v4838_v3  ;;  %v6269_v13 = vld [vmem:[#allocation50_spill] sm:$0xff] }
 0x3ca   : > { %v1712_v38 = vmul.f32 %v1680_v60, %v1680_v60  ;;  %v6267_v60 = vld [vmem:[#allocation41_spill] sm:$0xff]  ;;  %v1994_v3 = vmul.f32 %v1924_v21, %v6269_v13  ;;  %v4865_v21 = vld [vmem:[%s3958_s27 + $0x8] sm:$0xff] }
 0x3cb   : > { %v1594_v31 = vpop.xlane.xlu1 %1593  ;;  %6271 = vst [vmem:[#allocation34_spill] sm:$0xff] %v4865_v21 }
 0x3cc   : > { %v1662_v53 = vsub.f32 %v1594_v31, %v3754_v17  ;;  %1807 = vrot.lane.b32.xlu0 %v1712_v38, %s3876_s8  ;;  %v6268_v38 = vld [vmem:[#allocation43_spill] sm:$0xff] }
 0x3cd   : > { %v1992_v31 = vmul.f32 %v6268_v38, %v1920_v50  ;;  %v3758_v50 = vld [vmem:[%s3958_s27 + $0x80] sm:$0xff] }
 0x3ce   : > { %v1694_v41 = vmul.f32 %v1662_v53, %v1662_v53  ;;  %v1683_v53 = vmul.f32 %v1651_v37, %v1651_v37  ;;  %v6270_v37 = vld [vmem:[#allocation48_spill] sm:$0xff] }
 0x3cf   : > { %v1642_v63 = vpop.xlane.xlu1 %1641 }
 0x3d0   : > { %v1678_v61 = vsub.f32 %v1642_v63, %v3755_v43  ;;  %1771 = vrot.lane.b32.xlu0 %v1694_v41, %s3876_s8  ;;  %v3757_v63 = vld [vmem:[%s3958_s27 + $0x90] sm:$0xff]  ;;  %v4848_v43 = vpop.permute.xlu0 %2035 }
 0x3d1   : > { %v1667_v41 = vsub.f32 %v4766_v48, %v3757_v63 }
 0x3d2   : > { %v1710_v18 = vmul.f32 %v1678_v61, %v1678_v61 }
 0x3d3   : > { %v1918_v49 = vpop.permute.xlu1 %1917 }
 0x3d4   : > { %v1991_v17 = vmul.f32 %v6267_v60, %v1918_v49  ;;  %1803 = vrot.lane.b32.xlu0 %v1710_v18, %s3876_s8  ;;  %v1699_v18 = vmul.f32 %v1667_v41, %v1667_v41  ;;  %v1665_v49 = vsub.f32 %v4770_v26, %v3758_v50  ;;  %v4859_v48 = vpop.permute.xlu0 %2039  ;;  %v6272_v26 = vld [vmem:[#allocation54_spill] sm:$0xff] }
 0x3d5   : > { %v1998_v41 = vmul.f32 %v1932_v15, %v6272_v26 }
 0x3d6   : > { %2077 = vrot.lane.b32.xlu1 %v1991_v17, %s3875_s7  ;;  %v1996_v17 = vmul.f32 %v6270_v37, %v1928_v0  ;;  %v1697_v63 = vmul.f32 %v1665_v49, %v1665_v49 }
 0x3d7   : > { %v4851_v61 = vpop.permute.xlu1 %1921 }
 0x3d8   : > { %2079 = vrot.lane.b32.xlu0 %v1992_v31, %s3875_s7  ;;  %v4877_v50 = vpop.permute.xlu0 %2043 }
 0x3da   : > { %1749 = vrot.lane.b32.xlu1 %v1683_v53, %s3876_s8  ;;  %v1650_v53 = vsub.f32 %v4774_v14, %v4865_v21  ;;  %v6274_v14 = vld [vmem:[#allocation53_spill] sm:$0xff] }
 0x3db   : > { %v4862_v31 = vpop.permute.xlu1 %1925 }
 0x3dc   : > { %2083 = vrot.lane.b32.xlu0 %v1994_v3, %s3875_s7  ;;  %v1682_v0 = vmul.f32 %v1650_v53, %v1650_v53  ;;  %v4873_v3 = vld [vmem:[%s3958_s27 + $0x30] sm:$0xff]  ;;  %v4887_v21 = vpop.permute.xlu0 %2047 }
 0x3dd   : > { %6273 = vst [vmem:[#allocation39_spill] sm:$0xff] %v4873_v3 }
 0x3de   : > { %1781 = vrot.lane.b32.xlu1 %v1699_v18, %s3876_s8  ;;  %v1655_v18 = vsub.f32 %v4778_v39, %v4873_v3  ;;  %v4893_v3 = vld [vmem:[%s3958_s27 + $0x20] sm:$0xff] }
 0x3df   : > { %v4880_v49 = vpop.permute.xlu1 %1929  ;;  %6275 = vst [vmem:[#allocation38_spill] sm:$0xff] %v4893_v3 }
 0x3e0   : > { %2087 = vrot.lane.b32.xlu0 %v1996_v17, %s3875_s7  ;;  %v2000_v17 = vmul.f32 %v6274_v14, %v1936_v23  ;;  %v1687_v15 = vmul.f32 %v1655_v18, %v1655_v18  ;;  %v1653_v23 = vsub.f32 %v4786_v20, %v4893_v3 }
 0x3e2   : > { %1777 = vrot.lane.b32.xlu1 %v1697_v63, %s3876_s8  ;;  %v3761_v63 = vld [vmem:[%s3958_s27 + $0xb0] sm:$0xff] }
 0x3e3   : > { %v1671_v53 = vsub.f32 %v4782_v47, %v3761_v63  ;;  %v4890_v39 = vpop.permute.xlu1 %1933  ;;  %v3763_v47 = vld [vmem:[%s3958_s27 + $0xa0] sm:$0xff] }
 0x3e4   : > { %2091 = vrot.lane.b32.xlu0 %v1998_v41, %s3875_s7  ;;  %v1669_v18 = vsub.f32 %v4789_v29, %v3763_v47  ;;  %v3765_v29 = vld [vmem:[%s3958_s27 + $0xd0] sm:$0xff] }
 0x3e5   : > { %v1703_v41 = vmul.f32 %v1671_v53, %v1671_v53  ;;  %v4906_v53 = vld [vmem:[%s3958_s27 + $0x50] sm:$0xff]  ;;  %v1675_v47 = vsub.f32 %v4797_v25, %v3765_v29 }
 0x3e6   : > { %1747 = vrot.lane.b32.xlu1 %v1682_v0, %s3876_s8  ;;  %v1685_v0 = vmul.f32 %v1653_v23, %v1653_v23  ;;  %6276 = vst [vmem:[#allocation42_spill] sm:$0xff] %v4906_v53  ;;  %v1659_v20 = vsub.f32 %v4793_v8, %v4906_v53  ;;  %v4930_v29 = vld [vmem:[%s3958_s27 + $0x70] sm:$0xff] }
 0x3e7   : > { %v4902_v63 = vpop.permute.xlu1 %2033  ;;  %6277 = vst [vmem:[#allocation41_spill] sm:$0xff] %v4930_v29 }
 0x3e8   : > { %2095 = vrot.lane.b32.xlu0 %v2000_v17, %s3875_s7  ;;  %v4900_v17 = vpop.permute.xlu0 %2051  ;;  %v1691_v23 = vmul.f32 %v1659_v20, %v1659_v20  ;;  %v3767_v20 = vld [vmem:[%s3958_s27 + $0xc0] sm:$0xff] }
 0x3e9   : > { %v1673_v53 = vsub.f32 %v4805_v24, %v3767_v20  ;;  %v3769_v24 = vld [vmem:[%s3958_s27 + $0xf0] sm:$0xff] }
 0x3ea   : > { %1757 = vrot.lane.b32.xlu1 %v1687_v15, %s3876_s8  ;;  %v1701_v15 = vmul.f32 %v1669_v18, %v1669_v18  ;;  %v4917_v18 = vld [vmem:[%s3958_s27 + $0x40] sm:$0xff] }
 0x3eb   : > { %v1657_v14 = vsub.f32 %v4801_v12, %v4917_v18  ;;  %v1663_v12 = vsub.f32 %v4809_v58, %v4930_v29  ;;  %v4944_v29 = vld [vmem:[%s3958_s27 + $0x60] sm:$0xff] }
 0x3ec   : > { %v4910_v3 = vpop.permute.xlu0 %2055  ;;  %6278 = vst [vmem:[#allocation43_spill] sm:$0xff] %v4944_v29 }
 0x3ee   : > { %1789 = vrot.lane.b32.xlu1 %v1703_v41, %s3876_s8  ;;  %v2038_v41 = vpop.permute.xlu1 %2037 }
 0x3f0   : > { %v4921_v26 = vpop.permute.xlu0 %2059 }
 0x3f2   : > { %1753 = vrot.lane.b32.xlu1 %v1685_v0, %s3876_s8  ;;  %v1707_v0 = vmul.f32 %v1675_v47, %v1675_v47  ;;  %v2042_v8 = vpop.permute.xlu1 %2041  ;;  %v1695_v47 = vmul.f32 %v1663_v12, %v1663_v12 }
 0x3f4   : > { %v4926_v37 = vpop.permute.xlu0 %2063 }
 0x3f6   : > { %1785 = vrot.lane.b32.xlu1 %v1701_v15, %s3876_s8  ;;  %v1689_v15 = vmul.f32 %v1657_v14, %v1657_v14  ;;  %v2046_v25 = vpop.permute.xlu1 %2045  ;;  %v2132_v14 = vsel %vm831_vm0, %v4848_v43, 0.0  ;;  %v1661_v43 = vsub.f32 %v4817_v30, %v4944_v29 }
 0x3fa   : > { %1765 = vrot.lane.b32.xlu1 %v1691_v23, %s3876_s8  ;;  %v1705_v23 = vmul.f32 %v1673_v53, %v1673_v53  ;;  %v2050_v20 = vpop.permute.xlu1 %2049  ;;  %v2135_v53 = vsel %vm831_vm0, %v2038_v41, 0.0  ;;  %v2147_v41 = vsel %vm831_vm0, %v2046_v25, 0.0 }
 0x3fe   : > { %1797 = vrot.lane.b32.xlu1 %v1707_v0, %s3876_s8  ;;  %v1679_v0 = vsub.f32 %v4813_v27, %v3769_v24  ;;  %v2141_v27 = vsel %vm831_vm0, %v2042_v8, 0.0  ;;  %v2054_v12 = vpop.permute.xlu1 %2053  ;;  %v3771_v24 = vld [vmem:[%s3958_s27 + $0xe0] sm:$0xff]  ;;  %v6279_v8 = vld [vmem:[#allocation47_spill] sm:$0xff] }
 0x400   : > { %v1711_v58 = vmul.f32 %v1679_v0, %v1679_v0 }
 0x402   : > { %1761 = vrot.lane.b32.xlu1 %v1689_v15, %s3876_s8  ;;  %v4939_v15 = vpop.permute.xlu0 %2067  ;;  %v2058_v30 = vpop.permute.xlu1 %2057 }
 0x406   : > { %1793 = vrot.lane.b32.xlu1 %v1705_v23, %s3876_s8  ;;  %v4948_v23 = vpop.permute.xlu0 %2071  ;;  %v2062_v25 = vpop.permute.xlu1 %2061 }
 0x407   : > { %2133 = vadd.xlane.f32.xlu0 %v2132_v14  ;;  %v1693_v14 = vmul.f32 %v1661_v43, %v1661_v43  ;;  %v1993_v43 = vmul.f32 %v4851_v61, %v6279_v8 }
 0x40a   : > { %1773 = vrot.lane.b32.xlu1 %v1695_v47, %s3876_s8  ;;  %v1677_v47 = vsub.f32 %v4821_v19, %v3771_v24  ;;  %v2159_v19 = vsel %vm831_vm0, %v2054_v12, 0.0  ;;  %v2171_v12 = vsel %vm831_vm0, %v2062_v25, 0.0 }
 0x40b   : > { %2136 = vadd.xlane.f32.xlu0 %v2135_v53  ;;  %v4956_v53 = vpop.permute.xlu0 %2075 }
 0x40c   : > { %v1709_v0 = vmul.f32 %v1677_v47, %v1677_v47 }
 0x40e   : > { %1805 = vrot.lane.b32.xlu1 %v1711_v58, %s3876_s8  ;;  %v2153_v58 = vsel %vm831_vm0, %v2050_v20, 0.0  ;;  %v2165_v20 = vsel %vm831_vm0, %v2058_v30, 0.0 }
 0x40f   : > { %2142 = vadd.xlane.f32.xlu0 %v2141_v27  ;;  %v4962_v27 = vpop.permute.xlu0 %1745 }
 0x410   : > { %6280 = vst [vmem:[#allocation50_spill] sm:$0xff] %v4962_v27 }
 0x412   : > { %1769 = vrot.lane.b32.xlu1 %v1693_v14, %s3876_s8  ;;  %v6281_v14 = vld [vmem:[#allocation46_spill] sm:$0xff] }
 0x413   : > { %2148 = vadd.xlane.f32.xlu0 %v2147_v41  ;;  %v1995_v24 = vmul.f32 %v6281_v14, %v4862_v31  ;;  %v4968_v47 = vpop.permute.xlu0 %1751  ;;  %v6283_v41 = vld [vmem:[#allocation52_spill] sm:$0xff] }
 0x414   : > { %6282 = vst [vmem:[#allocation47_spill] sm:$0xff] %v4968_v47  ;;  %v1997_v61 = vmul.f32 %v4880_v49, %v6283_v41 }
 0x416   : > { %1801 = vrot.lane.b32.xlu1 %v1709_v0, %s3876_s8  ;;  %v2066_v0 = vpop.permute.xlu1 %2065  ;;  %s3808_s8 = sshll.u32 %s6060_s2, 4  ;;  %s3809_s8 = int_to_ptr.vmem [resolvable:$false] %s3808_s8 }
 0x417   : > { %2154 = vadd.xlane.f32.xlu0 %v2153_v58  ;;  %v6284_v58 = vld [vmem:[#allocation51_spill] sm:$0xff]  ;;  %v4978_v31 = vpop.permute.xlu0 %1783 }
 0x418   : > { %6285 = vst [vmem:[#allocation46_spill] sm:$0xff] %v4978_v31  ;;  %v6324_v31 = vld [vmem:[#allocation17_spill] sm:$0xff] }
 0x41a   : > { %2081 = vrot.lane.b32.xlu1 %v1993_v43, %s3875_s7  ;;  %v1999_v43 = vmul.f32 %v6284_v58, %v4890_v39  ;;  %v2070_v30 = vpop.permute.xlu1 %2069  ;;  %v6290_v39 = vld [vmem:[#allocation6_spill] sm:$0xff] }
 0x41b   : > { %2160 = vadd.xlane.f32.xlu0 %v2159_v19  ;;  %v2177_v19 = vsel %vm831_vm0, %v2066_v0, 0.0  ;;  %v2183_v49 = vsel %vm831_vm0, %v2070_v30, 0.0  ;;  %v6292_v0 = vld [vmem:[#allocation10_spill] sm:$0xff]  ;;  %v2129_v30 = vsel %vm831_vm0, %v4902_v63, 0.0 }
 0x41c   : > { %v6299_v63 = vld [vmem:[#allocation18_spill] sm:$0xff] }
 0x41e   : > { %2085 = vrot.lane.b32.xlu1 %v1995_v24, %s3875_s7  ;;  %v4982_v24 = vpop.permute.xlu0 %1779 }
 0x41f   : > { %2166 = vadd.xlane.f32.xlu0 %v2165_v20  ;;  %6286 = vst [vmem:[#allocation52_spill] sm:$0xff] %v4982_v24  ;;  %v6326_v24 = vld [vmem:[#allocation19_spill] sm:$0xff] }
 0x422   : > { %2089 = vrot.lane.b32.xlu1 %v1997_v61, %s3875_s7  ;;  %v4985_v20 = vpop.permute.xlu0 %1759 }
 0x423   : > { %2172 = vadd.xlane.f32.xlu0 %v2171_v12  ;;  %6287 = vst [vmem:[#allocation51_spill] sm:$0xff] %v4985_v20 }
 0x426   : > { %2093 = vrot.lane.b32.xlu1 %v1999_v43, %s3875_s7  ;;  %v4987_v25 = vpop.permute.xlu0 %1791 }
 0x427   : > { %2178 = vadd.xlane.f32.xlu0 %v2177_v19  ;;  %6288 = vst [vmem:[#allocation77_spill] sm:$0xff] %v4987_v25  ;;  %v6294_v19 = vld [vmem:[#allocation12_spill] sm:$0xff] }
 0x42a   : > { %v4989_v61 = vpop.permute.xlu0 %1755 }
 0x42b   : > { %2184 = vadd.xlane.f32.xlu0 %v2183_v49  ;;  %6289 = vst [vmem:[#allocation78_spill] sm:$0xff] %v4989_v61  ;;  %v6295_v49 = vld [vmem:[#allocation14_spill] sm:$0xff] }
 0x42e   : > { %v4993_v12 = vpop.permute.xlu0 %1787 }
 0x42f   : > { %6291 = vst [vmem:[#allocation6_spill] sm:$0xff] %v4993_v12  ;;  %v2144_v12 = vsel %vm831_vm0, %v4877_v50, 0.0 }
 0x432   : > { %v4997_v43 = vpop.permute.xlu0 %1767 }
 0x433   : > { %6293 = vst [vmem:[#allocation10_spill] sm:$0xff] %v4997_v43 }
 0x436   : > { %v5007_v25 = vpop.permute.xlu0 %1799 }
 0x437   : > { %6296 = vst [vmem:[#allocation12_spill] sm:$0xff] %v5007_v25 }
 0x441   : > { %2451 = vrot.lane.b32.xlu0 %v6290_v39, %s3877_s15  ;;  %v2138_v39 = vsel %vm831_vm0, %v4859_v48, 0.0  ;;  %v5019_v48 = vpop.permute.xlu1 %2073 }
 0x445   : > { %2457 = vrot.lane.b32.xlu0 %v6292_v0, %s3877_s15  ;;  %v6297_v0 = vld [vmem:[#allocation16_spill] sm:$0xff] }
 0x448   : > { %v5027_v50 = vpop.permute.xlu1 %2077 }
 0x449   : > { %2461 = vrot.lane.b32.xlu0 %v6294_v19, %s3877_s15  ;;  %v5013_v19 = vpop.permute.xlu0 %1763 }
 0x44a   : > { %2130 = vadd.xlane.f32.xlu1 %v2129_v30  ;;  %6298 = vst [vmem:[#allocation14_spill] sm:$0xff] %v5013_v19  ;;  %v2150_v30 = vsel %vm831_vm0, %v4887_v21, 0.0  ;;  %v2162_v21 = vsel %vm831_vm0, %v4910_v3, 0.0 }
 0x44d   : > { %2465 = vrot.lane.b32.xlu0 %v6295_v49, %s3877_s15  ;;  %v6300_v49 = vld [vmem:[#allocation20_spill] sm:$0xff] }
 0x44e   : > { %2139 = vadd.xlane.f32.xlu1 %v2138_v39  ;;  %v2156_v39 = vsel %vm831_vm0, %v4900_v17, 0.0  ;;  %v2168_v17 = vsel %vm831_vm0, %v4921_v26, 0.0 }
 0x451   : > { %2469 = vrot.lane.b32.xlu0 %v6297_v0, %s3877_s15  ;;  %v5025_v0 = vpop.permute.xlu0 %1795 }
 0x452   : > { %2145 = vadd.xlane.f32.xlu1 %v2144_v12  ;;  %6301 = vst [vmem:[#allocation16_spill] sm:$0xff] %v5025_v0  ;;  %v6302_v12 = vld [vmem:[#allocation22_spill] sm:$0xff]  ;;  %v6321_v0 = vld [vmem:[#allocation13_spill] sm:$0xff] }
 0x455   : > { %2473 = vrot.lane.b32.xlu0 %v6299_v63, %s3877_s15  ;;  %v5033_v63 = vpop.permute.xlu0 %1775 }
 0x456   : > { %2151 = vadd.xlane.f32.xlu1 %v2150_v30  ;;  %6303 = vst [vmem:[#allocation18_spill] sm:$0xff] %v5033_v63  ;;  %v5035_v30 = vpop.permute.xlu1 %1749  ;;  %v6329_v63 = vld [vmem:[#allocation23_spill] sm:$0xff] }
 0x457   : > { %6304 = vst [vmem:[#allocation20_spill] sm:$0xff] %v5035_v30 }
 0x459   : > { %2477 = vrot.lane.b32.xlu0 %v6300_v49, %s3877_s15  ;;  %v6305_v49 = vld [vmem:[#allocation24_spill] sm:$0xff]  ;;  %v5045_v25 = vpop.permute.xlu0 %1807 }
 0x45a   : > { %2157 = vadd.xlane.f32.xlu1 %v2156_v39  ;;  %v6306_v39 = vld [vmem:[#allocation26_spill] sm:$0xff]  ;;  %6307 = vst [vmem:[#allocation22_spill] sm:$0xff] %v5045_v25  ;;  %v5047_v3 = vpop.permute.xlu1 %1781 }
 0x45b   : > { %6308 = vst [vmem:[#allocation24_spill] sm:$0xff] %v5047_v3 }
 0x45d   : > { %2481 = vrot.lane.b32.xlu0 %v6302_v12, %s3877_s15  ;;  %v2174_v12 = vsel %vm831_vm0, %v4926_v37, 0.0  ;;  %v5053_v26 = vpop.permute.xlu0 %1771 }
 0x45e   : > { %2163 = vadd.xlane.f32.xlu1 %v2162_v21  ;;  %v2180_v21 = vsel %vm831_vm0, %v4939_v15, 0.0  ;;  %6309 = vst [vmem:[#allocation26_spill] sm:$0xff] %v5053_v26 }
 0x461   : > { %2485 = vrot.lane.b32.xlu0 %v6305_v49, %s3877_s15  ;;  %v5055_v49 = vpop.permute.xlu1 %1777  ;;  %v5061_v37 = vpop.permute.xlu0 %1803 }
 0x462   : > { %2169 = vadd.xlane.f32.xlu1 %v2168_v17  ;;  %6310 = vst [vmem:[#allocation79_spill] sm:$0xff] %v5055_v49  ;;  %6311 = vst [vmem:[#allocation80_spill] sm:$0xff] %v5061_v37  ;;  %v6319_v37 = vld [vmem:[#allocation11_spill] sm:$0xff] }
 0x465   : > { %2489 = vrot.lane.b32.xlu0 %v6306_v39, %s3877_s15  ;;  %v5063_v17 = vpop.permute.xlu1 %1747  ;;  %v6314_v39 = vld [vmem:[#allocation7_spill] sm:$0xff] }
 0x466   : > { %2175 = vadd.xlane.f32.xlu1 %v2174_v12  ;;  %6312 = vst [vmem:[#allocation81_spill] sm:$0xff] %v5063_v17  ;;  %v6316_v12 = vld [vmem:[#allocation8_spill] sm:$0xff] }
 0x469   : > { %2493 = vrot.lane.b32.xlu0 %v4195_v32, %s3877_s15  ;;  %v5067_v32 = vpop.permute.xlu0 %2079  ;;  %v5069_v15 = vpop.permute.xlu1 %1757 }
 0x46a   : > { %2181 = vadd.xlane.f32.xlu1 %v2180_v21  ;;  %6313 = vst [vmem:[#allocation82_spill] sm:$0xff] %v5069_v15  ;;  %v6317_v21 = vld [vmem:[#allocation9_spill] sm:$0xff] }
 0x46d   : > { %2497 = vrot.lane.b32.xlu0 %v4205_v51, %s3877_s15  ;;  %v5075_v51 = vpop.permute.xlu0 %2083 }
 0x471   : > { %2501 = vrot.lane.b32.xlu0 %v4215_v1, %s3877_s15  ;;  %v5077_v1 = vpop.permute.xlu1 %1789 }
 0x472   : > { %6315 = vst [vmem:[#allocation7_spill] sm:$0xff] %v5077_v1  ;;  %v6322_v1 = vld [vmem:[#allocation15_spill] sm:$0xff] }
 0x475   : > { %2505 = vrot.lane.b32.xlu0 %v6216_v36, %s3877_s15  ;;  %v5083_v36 = vpop.permute.xlu0 %2087  ;;  %v5085_v25 = vpop.permute.xlu1 %1753 }
 0x476   : > { %6318 = vst [vmem:[#allocation8_spill] sm:$0xff] %v5085_v25 }
 0x479   : > { %2509 = vrot.lane.b32.xlu0 %v6211_v28, %s3877_s15  ;;  %v5089_v28 = vpop.permute.xlu0 %2091 }
 0x47b   : > { %2449 = vrot.lane.b32.xlu1 %v6314_v39, %s3877_s15  ;;  %v5091_v39 = vpop.permute.xlu1 %1785 }
 0x47c   : > { %6320 = vst [vmem:[#allocation9_spill] sm:$0xff] %v5091_v39 }
 0x47f   : > { %2453 = vrot.lane.b32.xlu1 %v6316_v12, %s3877_s15  ;;  %v5097_v12 = vpop.permute.xlu0 %2095 }
 0x483   : > { %2455 = vrot.lane.b32.xlu1 %v6317_v21, %s3877_s15  ;;  %v5099_v21 = vpop.permute.xlu1 %1765 }
 0x484   : > { %6323 = vst [vmem:[#allocation11_spill] sm:$0xff] %v5099_v21  ;;  %v6332_v21 = vld [vmem:[#allocation27_spill] sm:$0xff] }
 0x487   : > { %2459 = vrot.lane.b32.xlu1 %v6319_v37, %s3877_s15  ;;  %v5105_v37 = vpop.permute.xlu1 %1797 }
 0x488   : > { %6325 = vst [vmem:[#allocation13_spill] sm:$0xff] %v5105_v37  ;;  %v6331_v37 = vld [vmem:[#allocation25_spill] sm:$0xff] }
 0x48b   : > { %2463 = vrot.lane.b32.xlu1 %v6321_v0, %s3877_s15  ;;  %v6327_v0 = vld [vmem:[#allocation21_spill] sm:$0xff]  ;;  %v5115_v49 = vpop.permute.xlu1 %1761 }
 0x48c   : > { %6328 = vst [vmem:[#allocation15_spill] sm:$0xff] %v5115_v49 }
 0x48f   : > { %2467 = vrot.lane.b32.xlu1 %v6322_v1, %s3877_s15  ;;  %v5121_v26 = vpop.permute.xlu1 %1793 }
 0x490   : > { %6330 = vst [vmem:[#allocation17_spill] sm:$0xff] %v5121_v26 }
 0x493   : > { %2471 = vrot.lane.b32.xlu1 %v6324_v31, %s3877_s15  ;;  %v5131_v43 = vpop.permute.xlu1 %1773 }
 0x494   : > { %v5103_v3 = vpop.xlane.xlu0 %2133  ;;  %6334 = vst [vmem:[#allocation21_spill] sm:$0xff] %v5131_v43 }
 0x497   : > { %2475 = vrot.lane.b32.xlu1 %v6326_v24, %s3877_s15  ;;  %v5137_v49 = vpop.permute.xlu1 %1805 }
 0x498   : > { %v5109_v39 = vpop.xlane.xlu0 %2136  ;;  %6336 = vst [vmem:[#allocation25_spill] sm:$0xff] %v5137_v49 }
 0x49b   : > { %2479 = vrot.lane.b32.xlu1 %v6327_v0, %s3877_s15  ;;  %v5147_v26 = vpop.permute.xlu1 %1769 }
 0x49c   : > { %v5113_v1 = vpop.xlane.xlu0 %2142  ;;  %6339 = vst [vmem:[#allocation84_spill] sm:$0xff] %v5147_v26 }
 0x49f   : > { %2483 = vrot.lane.b32.xlu1 %v6329_v63, %s3877_s15  ;;  %v5153_v43 = vpop.permute.xlu1 %1801 }
 0x4a0   : > { %v5119_v31 = vpop.xlane.xlu0 %2148  ;;  %6341 = vst [vmem:[#allocation86_spill] sm:$0xff] %v5153_v43 }
 0x4a3   : > { %2487 = vrot.lane.b32.xlu1 %v6331_v37, %s3877_s15 }
 0x4a4   : > { %v5125_v24 = vpop.xlane.xlu0 %2154 }
 0x4a7   : > { %2491 = vrot.lane.b32.xlu1 %v6332_v21, %s3877_s15 }
 0x4a8   : > { %v5129_v0 = vpop.xlane.xlu0 %2160 }
 0x4a9   : > { %6333 = vst [vmem:[#allocation19_spill] sm:$0xff] %v5129_v0 }
 0x4ab   : > { %2495 = vrot.lane.b32.xlu1 %v4197_v35, %s3877_s15 }
 0x4ac   : > { %v5135_v63 = vpop.xlane.xlu0 %2166 }
 0x4ad   : > { %6335 = vst [vmem:[#allocation23_spill] sm:$0xff] %v5135_v63 }
 0x4af   : > { %2499 = vrot.lane.b32.xlu1 %v4207_v52, %s3877_s15 }
 0x4b0   : > { %v5141_v37 = vpop.xlane.xlu0 %2172 }
 0x4b1   : > { %6337 = vst [vmem:[#allocation27_spill] sm:$0xff] %v5141_v37 }
 0x4b3   : > { %2503 = vrot.lane.b32.xlu1 %v4217_v2, %s3877_s15  ;;  %v5159_v2 = vpop.permute.xlu1 %2081 }
 0x4b4   : > { %v5145_v21 = vpop.xlane.xlu0 %2178 }
 0x4b5   : > { %6338 = vst [vmem:[#allocation83_spill] sm:$0xff] %v5145_v21 }
 0x4b7   : > { %2507 = vrot.lane.b32.xlu1 %v6234_v4, %s3877_s15  ;;  %v5161_v19 = vpop.permute.xlu1 %2085 }
 0x4b8   : > { %v5151_v35 = vpop.xlane.xlu0 %2184 }
 0x4b9   : > { %6340 = vst [vmem:[#allocation85_spill] sm:$0xff] %v5151_v35 }
 0x4bb   : > { %2511 = vrot.lane.b32.xlu1 %v6231_v10, %s3877_s15  ;;  %v5163_v26 = vpop.permute.xlu1 %2089  ;;  %s3810_s15 = scalar_lea.vmem %s3809_s8, 64 }
 0x4bc   : > { %v2452_v52 = vpop.permute.xlu0 %2451 }
 0x4bd   : > { %v2546_v49 = vmul.f32 %v2452_v52, %v4280_v45 }
 0x4bf   : > { %2611 = vrot.lane.b32.xlu1 %v2546_v49, %s3878_s16  ;;  %v5165_v4 = vpop.permute.xlu1 %2093 }
 0x4c0   : > { %v2458_v45 = vpop.permute.xlu0 %2457 }
 0x4c4   : > { %v2462_v25 = vpop.permute.xlu0 %2461 }
 0x4c8   : > { %v2466_v30 = vpop.permute.xlu0 %2465 }
 0x4cc   : > { %v2470_v17 = vpop.permute.xlu0 %2469 }
 0x4d0   : > { %v2474_v37 = vpop.permute.xlu0 %2473 }
 0x4d7   : > { %v5167_v15 = vpop.xlane.xlu1 %2130 }
 0x4db   : > { %v5169_v43 = vpop.xlane.xlu1 %2139 }
 0x4df   : > { %v5171_v20 = vpop.xlane.xlu1 %2145 }
 0x4e3   : > { %v5173_v10 = vpop.xlane.xlu1 %2151 }
 0x4e7   : > { %v5175_v52 = vpop.xlane.xlu1 %2157 }
 0x4eb   : > { %v5177_v49 = vpop.xlane.xlu1 %2163 }
 0x4ec   : > { %6342 = vst [vmem:[#allocation87_spill] sm:$0xff] %v5177_v49 }
 0x4ef   : > { %v5179_v61 = vpop.xlane.xlu1 %2169 }
 0x4f0   : > { %6343 = vst [vmem:[#allocation88_spill] sm:$0xff] %v5179_v61  ;;  %v2549_v61 = vmul.f32 %v2458_v45, %v4288_v56  ;;  %v2553_v56 = vmul.f32 %v2466_v30, %v4298_v6  ;;  %v6346_v45 = vld [vmem:[#allocation40_spill] sm:$0xff] }
 0x4f3   : > { %v5181_v47 = vpop.xlane.xlu1 %2175 }
 0x4f4   : > { %6344 = vst [vmem:[#allocation89_spill] sm:$0xff] %v5181_v47  ;;  %v2478_v47 = vpop.permute.xlu0 %2477 }
 0x4f7   : > { %v5183_v27 = vpop.xlane.xlu1 %2181 }
 0x4f8   : > { %6345 = vst [vmem:[#allocation90_spill] sm:$0xff] %v5183_v27 }
 0x4fb   : > { %v2450_v35 = vpop.permute.xlu1 %2449 }
 0x4fc   : > { %v2545_v21 = vmul.f32 %v2450_v35, %v4274_v42  ;;  %v2551_v42 = vmul.f32 %v4286_v55, %v2462_v25  ;;  %v2557_v25 = vmul.f32 %v2474_v37, %v6261_v22 }
 0x4fe   : > { %2609 = vrot.lane.b32.xlu0 %v2545_v21, %s3878_s16 }
 0x4ff   : > { %v2454_v63 = vpop.permute.xlu1 %2453 }
 0x500   : > { %v2547_v29 = vmul.f32 %v6259_v40, %v2454_v63  ;;  %v2482_v40 = vpop.permute.xlu0 %2481 }
 0x501   : > { %v2561_v63 = vmul.f32 %v2482_v40, %v6263_v9 }
 0x502   : > { %2613 = vrot.lane.b32.xlu0 %v2547_v29, %s3878_s16 }
 0x503   : > { %v2456_v49 = vpop.permute.xlu1 %2455 }
 0x504   : > { %v2548_v0 = vmul.f32 %v4278_v44, %v2456_v49 }
 0x506   : > { %2615 = vrot.lane.b32.xlu1 %v2548_v0, %s3878_s16  ;;  %2617 = vrot.lane.b32.xlu0 %v2549_v61, %s3878_s16  ;;  %v2555_v0 = vmul.f32 %v4296_v5, %v2470_v17  ;;  %v2559_v5 = vmul.f32 %v6262_v54, %v2478_v47 }
 0x507   : > { %v2460_v27 = vpop.permute.xlu1 %2459 }
 0x508   : > { %v2550_v21 = vmul.f32 %v2460_v27, %v4292_v62  ;;  %v2486_v62 = vpop.permute.xlu0 %2485 }
 0x509   : > { %v2563_v35 = vmul.f32 %v6264_v33, %v2486_v62  ;;  %v6347_v33 = vld [vmem:[#allocation44_spill] sm:$0xff] }
 0x50a   : > { %2619 = vrot.lane.b32.xlu1 %v2550_v21, %s3878_s16  ;;  %2621 = vrot.lane.b32.xlu0 %v2551_v42, %s3878_s16 }
 0x50b   : > { %v2464_v29 = vpop.permute.xlu1 %2463 }
 0x50c   : > { %v2552_v44 = vmul.f32 %v4290_v59, %v2464_v29  ;;  %v2490_v59 = vpop.permute.xlu0 %2489 }
 0x50d   : > { %v2565_v9 = vmul.f32 %v2490_v59, %v6265_v46 }
 0x50e   : > { %2623 = vrot.lane.b32.xlu1 %v2552_v44, %s3878_s16  ;;  %2625 = vrot.lane.b32.xlu0 %v2553_v56, %s3878_s16 }
 0x50f   : > { %v2468_v61 = vpop.permute.xlu1 %2467 }
 0x510   : > { %v2554_v55 = vmul.f32 %v2468_v61, %v4304_v11 }
 0x512   : > { %2627 = vrot.lane.b32.xlu1 %v2554_v55, %s3878_s16  ;;  %2629 = vrot.lane.b32.xlu0 %v2555_v0, %s3878_s16 }
 0x513   : > { %v2472_v27 = vpop.permute.xlu1 %2471 }
 0x514   : > { %v2556_v6 = vmul.f32 %v4300_v7, %v2472_v27  ;;  %v2494_v7 = vpop.permute.xlu0 %2493 }
 0x515   : > { %v2567_v42 = vmul.f32 %v6267_v60, %v2494_v7 }
 0x516   : > { %2631 = vrot.lane.b32.xlu1 %v2556_v6, %s3878_s16  ;;  %2633 = vrot.lane.b32.xlu0 %v2557_v25, %s3878_s16 }
 0x517   : > { %v2476_v30 = vpop.permute.xlu1 %2475 }
 0x518   : > { %v2558_v11 = vmul.f32 %v2476_v30, %v6225_v57  ;;  %v2498_v57 = vpop.permute.xlu0 %2497  ;;  %v6350_v30 = vld [vmem:[#allocation53_spill] sm:$0xff] }
 0x519   : > { %v2569_v29 = vmul.f32 %v2498_v57, %v6279_v8  ;;  %v6348_v8 = vld [vmem:[#allocation48_spill] sm:$0xff] }
 0x51a   : > { %2635 = vrot.lane.b32.xlu1 %v2558_v11, %s3878_s16  ;;  %2637 = vrot.lane.b32.xlu0 %v2559_v5, %s3878_s16 }
 0x51b   : > { %v2480_v17 = vpop.permute.xlu1 %2479 }
 0x51c   : > { %v2560_v22 = vmul.f32 %v6223_v16, %v2480_v17 }
 0x51e   : > { %2639 = vrot.lane.b32.xlu1 %v2560_v22, %s3878_s16  ;;  %2641 = vrot.lane.b32.xlu0 %v2561_v63, %s3878_s16 }
 0x51f   : > { %v2484_v37 = vpop.permute.xlu1 %2483 }
 0x520   : > { %v2562_v54 = vmul.f32 %v2484_v37, %v4329_v34  ;;  %v2502_v34 = vpop.permute.xlu0 %2501 }
 0x521   : > { %v2571_v60 = vmul.f32 %v6281_v14, %v2502_v34  ;;  %v6349_v14 = vld [vmem:[#allocation54_spill] sm:$0xff] }
 0x522   : > { %2643 = vrot.lane.b32.xlu1 %v2562_v54, %s3878_s16  ;;  %2645 = vrot.lane.b32.xlu0 %v2563_v35, %s3878_s16 }
 0x523   : > { %v2488_v47 = vpop.permute.xlu1 %2487 }
 0x524   : > { %v2564_v16 = vmul.f32 %v6346_v45, %v2488_v47  ;;  %v2506_v56 = vpop.permute.xlu0 %2505 }
 0x525   : > { %v2573_v55 = vmul.f32 %v2506_v56, %v6283_v41 }
 0x526   : > { %2647 = vrot.lane.b32.xlu1 %v2564_v16, %s3878_s16  ;;  %2649 = vrot.lane.b32.xlu0 %v2565_v9, %s3878_s16 }
 0x527   : > { %v2492_v49 = vpop.permute.xlu1 %2491 }
 0x528   : > { %v2566_v21 = vmul.f32 %v2492_v49, %v6347_v33 }
 0x52a   : > { %2651 = vrot.lane.b32.xlu1 %v2566_v21, %s3878_s16  ;;  %2653 = vrot.lane.b32.xlu0 %v2567_v42, %s3878_s16 }
 0x52b   : > { %v2496_v40 = vpop.permute.xlu1 %2495 }
 0x52c   : > { %v2568_v46 = vmul.f32 %v6268_v38, %v2496_v40  ;;  %v2510_v38 = vpop.permute.xlu0 %2509 }
 0x52d   : > { %v2575_v25 = vmul.f32 %v6284_v58, %v2510_v38 }
 0x52e   : > { %2655 = vrot.lane.b32.xlu1 %v2568_v46, %s3878_s16  ;;  %2657 = vrot.lane.b32.xlu0 %v2569_v29, %s3878_s16 }
 0x52f   : > { %v2500_v44 = vpop.permute.xlu1 %2499 }
 0x530   : > { %v2570_v61 = vmul.f32 %v2500_v44, %v6269_v13 }
 0x532   : > { %2659 = vrot.lane.b32.xlu1 %v2570_v61, %s3878_s16  ;;  %2661 = vrot.lane.b32.xlu0 %v2571_v60, %s3878_s16 }
 0x533   : > { %v2504_v0 = vpop.permute.xlu1 %2503 }
 0x534   : > { %v2572_v62 = vmul.f32 %v6348_v8, %v2504_v0  ;;  %v2186_v0 = vsel %vm831_vm0, %v4948_v23, 0.0  ;;  %v2189_v8 = vsel %vm831_vm0, %v5019_v48, 0.0 }
 0x536   : > { %2663 = vrot.lane.b32.xlu1 %v2572_v62, %s3878_s16  ;;  %2665 = vrot.lane.b32.xlu0 %v2573_v55, %s3878_s16 }
 0x537   : > { %v2508_v27 = vpop.permute.xlu1 %2507 }
 0x538   : > { %v2574_v6 = vmul.f32 %v2508_v27, %v6349_v14  ;;  %v2192_v27 = vsel %vm831_vm0, %v4956_v53, 0.0  ;;  %v2195_v14 = vsel %vm831_vm0, %v5027_v50, 0.0  ;;  %v2204_v50 = vsel %vm831_vm0, %v5075_v51, 0.0 }
 0x539   : > { %v2213_v51 = vsel %vm831_vm0, %v5163_v26, 0.0  ;;  %v2222_v26 = vsel %vm831_vm0, %v5097_v12, 0.0 }
 0x53a   : > { %2667 = vrot.lane.b32.xlu1 %v2574_v6, %s3878_s16  ;;  %2669 = vrot.lane.b32.xlu0 %v2575_v25, %s3878_s16  ;;  %v2198_v6 = vsel %vm831_vm0, %v5067_v32, 0.0  ;;  %v2207_v32 = vsel %vm831_vm0, %v5161_v19, 0.0  ;;  %v2216_v19 = vsel %vm831_vm0, %v5089_v28, 0.0 }
 0x53b   : > { %v2512_v13 = vpop.permute.xlu1 %2511 }
 0x53c   : > { %v2576_v5 = vmul.f32 %v6350_v30, %v2512_v13 }
 0x53f   : > { %v2612_v59 = vpop.permute.xlu1 %2611 }
 0x540   : > { %v2708_v41 = vsel %vm831_vm0, %v2612_v59, 0.0  ;;  %v2201_v59 = vsel %vm831_vm0, %v5159_v2, 0.0  ;;  %v2210_v2 = vsel %vm831_vm0, %v5083_v36, 0.0  ;;  %v2219_v36 = vsel %vm831_vm0, %v5165_v4, 0.0 }
 0x559   : > { %2709 = vadd.xlane.f32.xlu0 %v2708_v41 }
 0x56f   : > { %2671 = vrot.lane.b32.xlu0 %v2576_v5, %s3878_s16 }
 0x570   : > { %v2610_v11 = vpop.permute.xlu0 %2609 }
 0x571   : > { %v2705_v17 = vsel %vm831_vm0, %v2610_v11, 0.0 }
 0x572   : > { %2706 = vadd.xlane.f32.xlu1 %v2705_v17 }
 0x574   : > { %v2614_v58 = vpop.permute.xlu0 %2613 }
 0x575   : > { %v2711_v63 = vsel %vm831_vm0, %v2614_v58, 0.0 }
 0x576   : > { %2712 = vadd.xlane.f32.xlu1 %v2711_v63 }
 0x578   : > { %v2616_v22 = vpop.permute.xlu1 %2615  ;;  %v2618_v7 = vpop.permute.xlu0 %2617 }
 0x579   : > { %v2714_v37 = vsel %vm831_vm0, %v2616_v22, 0.0  ;;  %v2717_v54 = vsel %vm831_vm0, %v2618_v7, 0.0 }
 0x57a   : > { %2715 = vadd.xlane.f32.xlu1 %v2714_v37 }
 0x57c   : > { %v2622_v35 = vpop.permute.xlu0 %2621  ;;  %v2620_v57 = vpop.permute.xlu1 %2619 }
 0x57d   : > { %v2720_v9 = vsel %vm831_vm0, %v2620_v57, 0.0  ;;  %v2723_v49 = vsel %vm831_vm0, %v2622_v35, 0.0 }
 0x57e   : > { %2718 = vadd.xlane.f32.xlu1 %v2717_v54 }
 0x580   : > { %v2626_v47 = vpop.permute.xlu0 %2625  ;;  %v2624_v45 = vpop.permute.xlu1 %2623 }
 0x581   : > { %v2726_v33 = vsel %vm831_vm0, %v2624_v45, 0.0  ;;  %v2729_v29 = vsel %vm831_vm0, %v2626_v47, 0.0 }
 0x582   : > { %2721 = vadd.xlane.f32.xlu1 %v2720_v9 }
 0x584   : > { %v2630_v16 = vpop.permute.xlu0 %2629  ;;  %v2628_v21 = vpop.permute.xlu1 %2627 }
 0x585   : > { %v2732_v40 = vsel %vm831_vm0, %v2628_v21, 0.0  ;;  %v2735_v56 = vsel %vm831_vm0, %v2630_v16, 0.0 }
 0x586   : > { %2724 = vadd.xlane.f32.xlu1 %v2723_v49 }
 0x588   : > { %v2634_v42 = vpop.permute.xlu0 %2633  ;;  %v2632_v60 = vpop.permute.xlu1 %2631 }
 0x589   : > { %v2738_v61 = vsel %vm831_vm0, %v2632_v60, 0.0  ;;  %v2741_v55 = vsel %vm831_vm0, %v2634_v42, 0.0 }
 0x58a   : > { %2727 = vadd.xlane.f32.xlu1 %v2726_v33 }
 0x58c   : > { %v2638_v34 = vpop.permute.xlu0 %2637  ;;  %v2636_v62 = vpop.permute.xlu1 %2635 }
 0x58d   : > { %v2744_v38 = vsel %vm831_vm0, %v2636_v62, 0.0  ;;  %v2747_v23 = vsel %vm831_vm0, %v2638_v34, 0.0  ;;  %v6352_v62 = vld [vmem:[#allocation34_spill] sm:$0xff] }
 0x58e   : > { %2733 = vadd.xlane.f32.xlu1 %v2732_v40  ;;  %2730 = vadd.xlane.f32.xlu0 %v2729_v29 }
 0x590   : > { %v2642_v46 = vpop.permute.xlu0 %2641  ;;  %v2640_v25 = vpop.permute.xlu1 %2639 }
 0x591   : > { %v2753_v44 = vsel %vm831_vm0, %v2642_v46, 0.0  ;;  %v2750_v48 = vsel %vm831_vm0, %v2640_v25, 0.0  ;;  %v5305_v46 = vld [vmem:[%s3958_s27] sm:$0xff] }
 0x592   : > { %2736 = vadd.xlane.f32.xlu1 %v2735_v56  ;;  %2754 = vadd.xlane.f32.xlu0 %v2753_v44  ;;  %v2225_v56 = vsub.f32 %v5167_v15, %v5305_v46  ;;  %v5317_v15 = vld [vmem:[%s3958_s27 + $0x18] sm:$0xff] }
 0x594   : > { %v2644_v13 = vpop.permute.xlu1 %2643  ;;  %v2646_v41 = vpop.permute.xlu0 %2645 }
 0x595   : > { %v2756_v53 = vsel %vm831_vm0, %v2644_v13, 0.0  ;;  %v2759_v30 = vsel %vm831_vm0, %v2646_v41, 0.0 }
 0x596   : > { %2739 = vadd.xlane.f32.xlu1 %v2738_v61  ;;  %2187 = vadd.xlane.f32.xlu0 %v2186_v0  ;;  %v6351_v61 = vld [vmem:[#allocation35_spill] sm:$0xff] }
 0x597   : > { %v2227_v0 = vsub.f32 %v5109_v39, %v6351_v61 }
 0x598   : > { %v2648_v5 = vpop.permute.xlu1 %2647  ;;  %v2650_v17 = vpop.permute.xlu0 %2649 }
 0x599   : > { %v2762_v11 = vsel %vm831_vm0, %v2648_v5, 0.0  ;;  %v2765_v58 = vsel %vm831_vm0, %v2650_v17, 0.0 }
 0x59a   : > { %2742 = vadd.xlane.f32.xlu1 %v2741_v55  ;;  %2190 = vadd.xlane.f32.xlu0 %v2189_v8  ;;  %v2257_v55 = vmul.f32 %v2225_v56, %v2225_v56  ;;  %v2259_v8 = vmul.f32 %v2227_v0, %v2227_v0  ;;  %v6356_v56 = vld [vmem:[#allocation19_spill] sm:$0xff] }
 0x59c   : > { %v2652_v63 = vpop.permute.xlu1 %2651  ;;  %v2654_v7 = vpop.permute.xlu0 %2653 }
 0x59d   : > { %v2768_v22 = vsel %vm831_vm0, %v2652_v63, 0.0  ;;  %v2771_v37 = vsel %vm831_vm0, %v2654_v7, 0.0 }
 0x59e   : > { %2745 = vadd.xlane.f32.xlu1 %v2744_v38  ;;  %2193 = vadd.xlane.f32.xlu0 %v2192_v27  ;;  %v2226_v38 = vsub.f32 %v5103_v3, %v6352_v62 }
 0x5a0   : > { %v2656_v35 = vpop.permute.xlu1 %2655  ;;  %v2658_v57 = vpop.permute.xlu0 %2657  ;;  %v2258_v25 = vmul.f32 %v2226_v38, %v2226_v38 }
 0x5a1   : > { %v2774_v54 = vsel %vm831_vm0, %v2656_v35, 0.0  ;;  %v2777_v47 = vsel %vm831_vm0, %v2658_v57, 0.0 }
 0x5a2   : > { %2748 = vadd.xlane.f32.xlu1 %v2747_v23  ;;  %2196 = vadd.xlane.f32.xlu0 %v2195_v14  ;;  %v2228_v23 = vsub.f32 %v5169_v43, %v5317_v15  ;;  %v6353_v43 = vld [vmem:[#allocation38_spill] sm:$0xff] }
 0x5a3   : > { %v2229_v41 = vsub.f32 %v5113_v1, %v6353_v43  ;;  %v5339_v1 = vld [vmem:[%s3958_s27 + $0x28] sm:$0xff] }
 0x5a4   : > { %v2660_v9 = vpop.permute.xlu1 %2659  ;;  %v2662_v45 = vpop.permute.xlu0 %2661  ;;  %v2260_v13 = vmul.f32 %v2228_v23, %v2228_v23  ;;  %v6357_v23 = vld [vmem:[#allocation87_spill] sm:$0xff] }
 0x5a5   : > { %v2780_v28 = vsel %vm831_vm0, %v2660_v9, 0.0  ;;  %v2783_v4 = vsel %vm831_vm0, %v2662_v45, 0.0  ;;  %v2261_v5 = vmul.f32 %v2229_v41, %v2229_v41  ;;  %v2233_v9 = vsub.f32 %v5125_v24, %v4917_v18 }
 0x5a6   : > { %2751 = vadd.xlane.f32.xlu1 %v2750_v48  ;;  %2199 = vadd.xlane.f32.xlu0 %v2198_v6 }
 0x5a8   : > { %v2664_v16 = vpop.permute.xlu1 %2663  ;;  %v2666_v42 = vpop.permute.xlu0 %2665 }
 0x5a9   : > { %v2786_v49 = vsel %vm831_vm0, %v2664_v16, 0.0  ;;  %v2789_v12 = vsel %vm831_vm0, %v2666_v42, 0.0 }
 0x5aa   : > { %2757 = vadd.xlane.f32.xlu1 %v2756_v53  ;;  %2202 = vadd.xlane.f32.xlu0 %v2201_v59 }
 0x5ac   : > { %v2668_v33 = vpop.permute.xlu1 %2667  ;;  %v2670_v34 = vpop.permute.xlu0 %2669 }
 0x5ad   : > { %v2792_v21 = vsel %vm831_vm0, %v2668_v33, 0.0  ;;  %v2795_v40 = vsel %vm831_vm0, %v2670_v34, 0.0  ;;  %v5375_v33 = vld [vmem:[%s3958_s27 + $0x48] sm:$0xff] }
 0x5ae   : > { %2205 = vadd.xlane.f32.xlu0 %v2204_v50  ;;  %2760 = vadd.xlane.f32.xlu1 %v2759_v30 }
 0x5b2   : > { %2208 = vadd.xlane.f32.xlu0 %v2207_v32  ;;  %2763 = vadd.xlane.f32.xlu1 %v2762_v11 }
 0x5b6   : > { %2211 = vadd.xlane.f32.xlu0 %v2210_v2  ;;  %2766 = vadd.xlane.f32.xlu1 %v2765_v58  ;;  %v2230_v2 = vsub.f32 %v5171_v20, %v5339_v1 }
 0x5ba   : > { %2214 = vadd.xlane.f32.xlu0 %v2213_v51  ;;  %2769 = vadd.xlane.f32.xlu1 %v2768_v22  ;;  %v6354_v51 = vld [vmem:[#allocation39_spill] sm:$0xff] }
 0x5bb   : > { %v2231_v22 = vsub.f32 %v5119_v31, %v6354_v51  ;;  %v5356_v31 = vld [vmem:[%s3958_s27 + $0x38] sm:$0xff] }
 0x5bc   : > { %v2232_v57 = vsub.f32 %v5173_v10, %v5356_v31 }
 0x5bd   : > { %v2263_v35 = vmul.f32 %v2231_v22, %v2231_v22  ;;  %v6361_v22 = vld [vmem:[#allocation41_spill] sm:$0xff] }
 0x5be   : > { %2217 = vadd.xlane.f32.xlu0 %v2216_v19  ;;  %2772 = vadd.xlane.f32.xlu1 %v2771_v37  ;;  %v2262_v19 = vmul.f32 %v2230_v2, %v2230_v2 }
 0x5c2   : > { %2220 = vadd.xlane.f32.xlu0 %v2219_v36  ;;  %2775 = vadd.xlane.f32.xlu1 %v2774_v54 }
 0x5c6   : > { %2223 = vadd.xlane.f32.xlu0 %v2222_v26  ;;  %2778 = vadd.xlane.f32.xlu1 %v2777_v47 }
 0x5ca   : > { %2781 = vadd.xlane.f32.xlu1 %v2780_v28 }
 0x5ce   : > { %2784 = vadd.xlane.f32.xlu1 %v2783_v4  ;;  %v2264_v4 = vmul.f32 %v2232_v57, %v2232_v57 }
 0x5d2   : > { %2787 = vadd.xlane.f32.xlu1 %v2786_v49  ;;  %v2265_v49 = vmul.f32 %v2233_v9, %v2233_v9 }
 0x5d6   : > { %2790 = vadd.xlane.f32.xlu1 %v2789_v12 }
 0x5da   : > { %2793 = vadd.xlane.f32.xlu1 %v2792_v21  ;;  %v2234_v21 = vsub.f32 %v5175_v52, %v5375_v33 }
 0x5dc   : > { %v2266_v0 = vmul.f32 %v2234_v21, %v2234_v21 }
 0x5de   : > { %2796 = vadd.xlane.f32.xlu1 %v2795_v40 }
 0x5e6   : > { %v2710_v29 = vpop.xlane.xlu0 %2709 }
 0x5e7   : > { %v2802_v39 = vsub.f32 %v2710_v29, %v6352_v62  ;;  %v6355_v29 = vld [vmem:[#allocation42_spill] sm:$0xff] }
 0x5e9   : > { %v2834_v3 = vmul.f32 %v2802_v39, %v2802_v39 }
 0x5ea   : > { %v2672_v44 = vpop.permute.xlu0 %2671 }
 0x5eb   : > { %v2798_v60 = vsel %vm831_vm0, %v2672_v44, 0.0  ;;  %v2235_v44 = vsub.f32 %v6356_v56, %v6355_v29 }
 0x5ec   : > { %2799 = vadd.xlane.f32.xlu0 %v2798_v60 }
 0x5ef   : > { %2321 = vrot.lane.b32.xlu1 %v2257_v55, %s3879_s18 }
 0x5f3   : > { %2325 = vrot.lane.b32.xlu1 %v2259_v8, %s3879_s18  ;;  %v2267_v8 = vmul.f32 %v2235_v44, %v2235_v44 }
 0x5ff   : > { %v2707_v27 = vpop.xlane.xlu1 %2706 }
 0x600   : > { %v2801_v14 = vsub.f32 %v2707_v27, %v5305_v46 }
 0x602   : > { %v2833_v48 = vmul.f32 %v2801_v14, %v2801_v14  ;;  %2323 = vrot.lane.b32.xlu0 %v2258_v25, %s3879_s18  ;;  %v5396_v25 = vld [vmem:[%s3958_s27 + $0x58] sm:$0xff] }
 0x603   : > { %v2713_v6 = vpop.xlane.xlu1 %2712  ;;  %v2236_v14 = vsub.f32 %v6357_v23, %v5396_v25 }
 0x604   : > { %2897 = vrot.lane.b32.xlu1 %v2833_v48, %s3880_s20  ;;  %v2803_v53 = vsub.f32 %v2713_v6, %v6351_v61  ;;  %v6358_v6 = vld [vmem:[#allocation43_spill] sm:$0xff] }
 0x606   : > { %2327 = vrot.lane.b32.xlu0 %v2260_v13, %s3879_s18  ;;  %v2835_v50 = vmul.f32 %v2803_v53, %v2803_v53  ;;  %v6359_v13 = vld [vmem:[#allocation23_spill] sm:$0xff] }
 0x607   : > { %v2716_v59 = vpop.xlane.xlu1 %2715 }
 0x608   : > { %2899 = vrot.lane.b32.xlu1 %v2834_v3, %s3880_s20  ;;  %v2804_v32 = vsub.f32 %v2716_v59, %v5317_v15  ;;  %v2237_v3 = vsub.f32 %v6359_v13, %v6358_v6 }
 0x60a   : > { %3057 = vrot.lane.b32.xlu0 %v5305_v46, %s3881_s23  ;;  %v2836_v58 = vmul.f32 %v2804_v32, %v2804_v32 }
 0x60b   : > { %v2719_v30 = vpop.xlane.xlu1 %2718 }
 0x60c   : > { %2901 = vrot.lane.b32.xlu1 %v2835_v50, %s3880_s20  ;;  %v2805_v17 = vsub.f32 %v2719_v30, %v6353_v43  ;;  %v2269_v50 = vmul.f32 %v2237_v3, %v2237_v3 }
 0x60e   : > { %2329 = vrot.lane.b32.xlu0 %v2261_v5, %s3879_s18  ;;  %v2837_v7 = vmul.f32 %v2805_v17, %v2805_v17  ;;  %v6360_v17 = vld [vmem:[#allocation88_spill] sm:$0xff] }
 0x60f   : > { %v2722_v11 = vpop.xlane.xlu1 %2721 }
 0x610   : > { %3059 = vrot.lane.b32.xlu1 %v6352_v62, %s3881_s23  ;;  %v2806_v20 = vsub.f32 %v2722_v11, %v5339_v1  ;;  %v5423_v11 = vld [vmem:[%s3958_s27 + $0x68] sm:$0xff] }
 0x611   : > { %v2238_v2 = vsub.f32 %v6360_v17, %v5423_v11 }
 0x612   : > { %3061 = vrot.lane.b32.xlu0 %v6351_v61, %s3881_s23  ;;  %v2838_v26 = vmul.f32 %v2806_v20, %v2806_v20 }
 0x613   : > { %v2725_v63 = vpop.xlane.xlu1 %2724  ;;  %v2270_v20 = vmul.f32 %v2238_v2, %v2238_v2 }
 0x614   : > { %2903 = vrot.lane.b32.xlu1 %v2836_v58, %s3880_s20  ;;  %v2807_v54 = vsub.f32 %v2725_v63, %v6354_v51  ;;  %v5428_v63 = vld [vmem:[%s3958_s27 + $0x50] sm:$0xff] }
 0x616   : > { %2905 = vrot.lane.b32.xlu0 %v2837_v7, %s3880_s20  ;;  %v2839_v28 = vmul.f32 %v2807_v54, %v2807_v54  ;;  %v6362_v7 = vld [vmem:[#allocation27_spill] sm:$0xff] }
 0x617   : > { %v2728_v37 = vpop.xlane.xlu1 %2727 }
 0x618   : > { %2331 = vrot.lane.b32.xlu1 %v2262_v19, %s3879_s18  ;;  %v2808_v10 = vsub.f32 %v2728_v37, %v5356_v31  ;;  %v2239_v19 = vsub.f32 %v6362_v7, %v6361_v22 }
 0x61a   : > { %2333 = vrot.lane.b32.xlu0 %v2263_v35, %s3879_s18  ;;  %v2840_v34 = vmul.f32 %v2808_v10, %v2808_v10  ;;  %v2271_v54 = vmul.f32 %v2239_v19, %v2239_v19  ;;  %v5462_v10 = vld [vmem:[%s3958_s27 + $0x80] sm:$0xff] }
 0x61b   : > { %v2734_v36 = vpop.xlane.xlu1 %2733  ;;  %v2731_v45 = vpop.xlane.xlu0 %2730  ;;  %v5528_v19 = vld [vmem:[%s3958_s27 + $0xa0] sm:$0xff] }
 0x61c   : > { %3063 = vrot.lane.b32.xlu1 %v5317_v15, %s3881_s23  ;;  %v2809_v24 = vsub.f32 %v2731_v45, %v4917_v18  ;;  %v2810_v52 = vsub.f32 %v2734_v36, %v5375_v33  ;;  %v6363_v45 = vld [vmem:[#allocation89_spill] sm:$0xff]  ;;  %6369 = vst [vmem:[#allocation48_spill] sm:$0xff] %v5528_v19 }
 0x61e   : > { %3065 = vrot.lane.b32.xlu0 %v6353_v43, %s3881_s23  ;;  %v2841_v60 = vmul.f32 %v2809_v24, %v2809_v24  ;;  %v2842_v39 = vmul.f32 %v2810_v52, %v2810_v52  ;;  %v2268_v43 = vmul.f32 %v2236_v14, %v2236_v14  ;;  %v6365_v52 = vld [vmem:[#allocation90_spill] sm:$0xff]  ;;  %v5489_v14 = vld [vmem:[%s3958_s27 + $0x70] sm:$0xff] }
 0x61f   : > { %v2737_v47 = vpop.xlane.xlu1 %2736  ;;  %v5369_v42 = vpop.xlane.xlu0 %2754 }
 0x620   : > { %2907 = vrot.lane.b32.xlu1 %v2838_v26, %s3880_s20  ;;  %v2811_v27 = vsub.f32 %v2737_v47, %v6355_v29 }
 0x622   : > { %2909 = vrot.lane.b32.xlu0 %v2839_v28, %s3880_s20  ;;  %v2843_v53 = vmul.f32 %v2811_v27, %v2811_v27  ;;  %v5453_v28 = vld [vmem:[%s3958_s27 + $0x78] sm:$0xff] }
 0x623   : > { %v2740_v16 = vpop.xlane.xlu1 %2739  ;;  %v5384_v61 = vpop.xlane.xlu0 %2187 }
 0x624   : > { %2335 = vrot.lane.b32.xlu1 %v2264_v4, %s3879_s18  ;;  %v2240_v4 = vsub.f32 %v6363_v45, %v5453_v28 }
 0x626   : > { %2337 = vrot.lane.b32.xlu0 %v2265_v49, %s3879_s18 }
 0x627   : > { %v2743_v12 = vpop.xlane.xlu1 %2742  ;;  %v5390_v62 = vpop.xlane.xlu0 %2190 }
 0x628   : > { %3067 = vrot.lane.b32.xlu1 %v5339_v1, %s3881_s23  ;;  %v2813_v32 = vsub.f32 %v2743_v12, %v6358_v6  ;;  %v6364_v12 = vld [vmem:[#allocation83_spill] sm:$0xff] }
 0x629   : > { %v2241_v24 = vsub.f32 %v6364_v12, %v5462_v10 }
 0x62a   : > { %3069 = vrot.lane.b32.xlu0 %v6354_v51, %s3881_s23  ;;  %v2845_v37 = vmul.f32 %v2813_v32, %v2813_v32 }
 0x62b   : > { %v2746_v40 = vpop.xlane.xlu1 %2745  ;;  %v5407_v59 = vpop.xlane.xlu0 %2193  ;;  %v2273_v56 = vmul.f32 %v2241_v24, %v2241_v24 }
 0x62c   : > { %2911 = vrot.lane.b32.xlu1 %v2840_v34, %s3880_s20  ;;  %v2814_v57 = vsub.f32 %v2746_v40, %v5423_v11  ;;  %v2272_v40 = vmul.f32 %v2240_v4, %v2240_v4 }
 0x62e   : > { %2913 = vrot.lane.b32.xlu0 %v2841_v60, %s3880_s20 }
 0x62f   : > { %v2749_v55 = vpop.xlane.xlu1 %2748  ;;  %v5415_v30 = vpop.xlane.xlu0 %2196 }
 0x630   : > { %2339 = vrot.lane.b32.xlu1 %v2266_v0, %s3879_s18  ;;  %v2815_v9 = vsub.f32 %v2749_v55, %v6361_v22  ;;  %v2817_v55 = vsub.f32 %v5369_v42, %v5462_v10  ;;  %v6367_v42 = vld [vmem:[#allocation85_spill] sm:$0xff] }
 0x632   : > { %2341 = vrot.lane.b32.xlu0 %v2267_v8, %s3879_s18  ;;  %v2847_v21 = vmul.f32 %v2815_v9, %v2815_v9  ;;  %v5484_v8 = vld [vmem:[%s3958_s27 + $0x88] sm:$0xff]  ;;  %v2849_v13 = vmul.f32 %v2817_v55, %v2817_v55 }
 0x633   : > { %v2752_v38 = vpop.xlane.xlu1 %2751  ;;  %v5437_v35 = vpop.xlane.xlu0 %2199  ;;  %v2242_v27 = vsub.f32 %v6365_v52, %v5484_v8 }
 0x634   : > { %3071 = vrot.lane.b32.xlu1 %v5356_v31, %s3881_s23  ;;  %v2816_v44 = vsub.f32 %v2752_v38, %v5453_v28 }
 0x636   : > { %3073 = vrot.lane.b32.xlu0 %v4917_v18, %s3881_s23  ;;  %v2812_v18 = vsub.f32 %v2740_v16, %v5396_v25  ;;  %v2846_v16 = vmul.f32 %v2814_v57, %v2814_v57  ;;  %v2848_v23 = vmul.f32 %v2816_v44, %v2816_v44 }
 0x637   : > { %v5402_v48 = vpop.xlane.xlu1 %2757  ;;  %v5445_v26 = vpop.xlane.xlu0 %2202 }
 0x638   : > { %2915 = vrot.lane.b32.xlu1 %v2842_v39, %s3880_s20  ;;  %v2844_v58 = vmul.f32 %v2812_v18, %v2812_v18  ;;  %v5496_v39 = vld [vmem:[%s3958_s27 + $0x90] sm:$0xff]  ;;  %v2818_v18 = vsub.f32 %v5402_v48, %v5484_v8 }
 0x639   : > { %6366 = vst [vmem:[#allocation40_spill] sm:$0xff] %v5496_v39 }
 0x63a   : > { %2917 = vrot.lane.b32.xlu0 %v2843_v53, %s3880_s20  ;;  %v2274_v53 = vmul.f32 %v2242_v27, %v2242_v27  ;;  %v2850_v7 = vmul.f32 %v2818_v18, %v2818_v18 }
 0x63b   : > { %v5410_v41 = vpop.xlane.xlu1 %2760  ;;  %v5467_v34 = vpop.xlane.xlu0 %2205 }
 0x63c   : > { %2343 = vrot.lane.b32.xlu1 %v2268_v43, %s3879_s18  ;;  %v2819_v2 = vsub.f32 %v5410_v41, %v5496_v39  ;;  %v2245_v41 = vsub.f32 %v5390_v62, %v5528_v19 }
 0x63e   : > { %2345 = vrot.lane.b32.xlu0 %v2269_v50, %s3879_s18  ;;  %v2277_v57 = vmul.f32 %v2245_v41, %v2245_v41 }
 0x63f   : > { %v5417_v5 = vpop.xlane.xlu1 %2763  ;;  %v5475_v60 = vpop.xlane.xlu0 %2208 }
 0x640   : > { %3075 = vrot.lane.b32.xlu1 %v5375_v33, %s3881_s23 }
 0x642   : > { %3077 = vrot.lane.b32.xlu0 %v5428_v63, %s3881_s23 }
 0x643   : > { %v5432_v51 = vpop.xlane.xlu1 %2766  ;;  %v5501_v3 = vpop.xlane.xlu0 %2211 }
 0x644   : > { %2919 = vrot.lane.b32.xlu1 %v2844_v58, %s3880_s20  ;;  %v5519_v58 = vld [vmem:[%s3958_s27 + $0x98] sm:$0xff]  ;;  %v2821_v4 = vsub.f32 %v5432_v51, %v5528_v19 }
 0x645   : > { %6368 = vst [vmem:[#allocation44_spill] sm:$0xff] %v5519_v58  ;;  %v2244_v22 = vsub.f32 %v5384_v61, %v5519_v58  ;;  %v2820_v9 = vsub.f32 %v5417_v5, %v5519_v58 }
 0x646   : > { %2921 = vrot.lane.b32.xlu0 %v2845_v37, %s3880_s20  ;;  %v2851_v37 = vmul.f32 %v2819_v2, %v2819_v2  ;;  %v2853_v51 = vmul.f32 %v2821_v4, %v2821_v4 }
 0x647   : > { %v5440_v36 = vpop.xlane.xlu1 %2769  ;;  %v5510_v32 = vpop.xlane.xlu0 %2214  ;;  %v2852_v24 = vmul.f32 %v2820_v9, %v2820_v9  ;;  %v5619_v9 = vld [vmem:[%s3958_s27 + $0xc8] sm:$0xff] }
 0x648   : > { %2347 = vrot.lane.b32.xlu1 %v2270_v20, %s3879_s18  ;;  %6374 = vst [vmem:[#allocation38_spill] sm:$0xff] %v5619_v9  ;;  %v2250_v4 = vsub.f32 %v5467_v34, %v5619_v9 }
 0x64a   : > { %2349 = vrot.lane.b32.xlu0 %v2271_v54, %s3879_s18  ;;  %v2276_v54 = vmul.f32 %v2244_v22, %v2244_v22 }
 0x64b   : > { %v5447_v47 = vpop.xlane.xlu1 %2772  ;;  %v5533_v20 = vpop.xlane.xlu0 %2217 }
 0x64c   : > { %3079 = vrot.lane.b32.xlu1 %v5396_v25, %s3881_s23 }
 0x64e   : > { %3081 = vrot.lane.b32.xlu0 %v6358_v6, %s3881_s23  ;;  %v2243_v6 = vsub.f32 %v6367_v42, %v5496_v39 }
 0x64f   : > { %v5459_v49 = vpop.xlane.xlu1 %2775  ;;  %v5542_v62 = vpop.xlane.xlu0 %2220 }
 0x650   : > { %2923 = vrot.lane.b32.xlu1 %v2846_v16, %s3880_s20  ;;  %v2275_v50 = vmul.f32 %v2243_v6, %v2243_v6  ;;  %v5551_v16 = vld [vmem:[%s3958_s27 + $0xa8] sm:$0xff]  ;;  %v5585_v6 = vld [vmem:[%s3958_s27 + $0xb8] sm:$0xff] }
 0x651   : > { %6370 = vst [vmem:[#allocation54_spill] sm:$0xff] %v5551_v16  ;;  %v2246_v12 = vsub.f32 %v5407_v59, %v5551_v16  ;;  %6372 = vst [vmem:[#allocation35_spill] sm:$0xff] %v5585_v6 }
 0x652   : > { %2925 = vrot.lane.b32.xlu0 %v2847_v21, %s3880_s20  ;;  %v5560_v21 = vld [vmem:[%s3958_s27 + $0xb0] sm:$0xff] }
 0x653   : > { %v5470_v29 = vpop.xlane.xlu1 %2778  ;;  %6371 = vst [vmem:[#allocation53_spill] sm:$0xff] %v5560_v21  ;;  %v2278_v44 = vmul.f32 %v2246_v12, %v2246_v12 }
 0x654   : > { %2351 = vrot.lane.b32.xlu1 %v2272_v40, %s3879_s18  ;;  %v2247_v40 = vsub.f32 %v5415_v30, %v5560_v21  ;;  %v2822_v30 = vsub.f32 %v5440_v36, %v5551_v16 }
 0x656   : > { %2353 = vrot.lane.b32.xlu0 %v2273_v56, %s3879_s18  ;;  %v5565_v56 = vpop.xlane.xlu0 %2223  ;;  %v2279_v55 = vmul.f32 %v2247_v40, %v2247_v40 }
 0x657   : > { %v5477_v0 = vpop.xlane.xlu1 %2781 }
 0x658   : > { %3083 = vrot.lane.b32.xlu1 %v5423_v11, %s3881_s23 }
 0x65a   : > { %3085 = vrot.lane.b32.xlu0 %v5489_v14, %s3881_s23 }
 0x65b   : > { %v5493_v38 = vpop.xlane.xlu1 %2784 }
 0x65c   : > { %2927 = vrot.lane.b32.xlu1 %v2848_v23, %s3880_s20  ;;  %v2823_v23 = vsub.f32 %v5447_v47, %v5560_v21 }
 0x65e   : > { %2929 = vrot.lane.b32.xlu0 %v2849_v13, %s3880_s20  ;;  %v2248_v13 = vsub.f32 %v5437_v35, %v5585_v6  ;;  %v2855_v18 = vmul.f32 %v2823_v23, %v2823_v23 }
 0x65f   : > { %v5504_v43 = vpop.xlane.xlu1 %2787 }
 0x660   : > { %2355 = vrot.lane.b32.xlu1 %v2274_v53, %s3879_s18  ;;  %v2854_v53 = vmul.f32 %v2822_v30, %v2822_v30  ;;  %v2280_v22 = vmul.f32 %v2248_v13, %v2248_v13 }
 0x662   : > { %2357 = vrot.lane.b32.xlu0 %v2275_v50, %s3879_s18  ;;  %v5594_v50 = vld [vmem:[%s3958_s27 + $0xc0] sm:$0xff] }
 0x663   : > { %v5512_v17 = vpop.xlane.xlu1 %2790  ;;  %6373 = vst [vmem:[#allocation34_spill] sm:$0xff] %v5594_v50  ;;  %v2249_v47 = vsub.f32 %v5445_v26, %v5594_v50  ;;  %v2824_v26 = vsub.f32 %v5459_v49, %v5585_v6 }
 0x664   : > { %3087 = vrot.lane.b32.xlu1 %v5453_v28, %s3881_s23 }
 0x665   : > { %v2856_v12 = vmul.f32 %v2824_v26, %v2824_v26 }
 0x666   : > { %3089 = vrot.lane.b32.xlu0 %v5462_v10, %s3881_s23 }
 0x667   : > { %v5525_v48 = vpop.xlane.xlu1 %2793 }
 0x668   : > { %2931 = vrot.lane.b32.xlu1 %v2850_v7, %s3880_s20  ;;  %v2281_v7 = vmul.f32 %v2249_v47, %v2249_v47  ;;  %v5653_v47 = vld [vmem:[%s3958_s27 + $0xd8] sm:$0xff] }
 0x669   : > { %6376 = vst [vmem:[#allocation42_spill] sm:$0xff] %v5653_v47 }
 0x66a   : > { %2933 = vrot.lane.b32.xlu0 %v2851_v37, %s3880_s20 }
 0x66b   : > { %v5536_v61 = vpop.xlane.xlu1 %2796 }
 0x66c   : > { %2359 = vrot.lane.b32.xlu1 %v2276_v54, %s3879_s18  ;;  %v2825_v54 = vsub.f32 %v5470_v29, %v5594_v50 }
 0x66e   : > { %2361 = vrot.lane.b32.xlu0 %v2277_v57, %s3879_s18  ;;  %v2857_v40 = vmul.f32 %v2825_v54, %v2825_v54 }
 0x66f   : > { %v5544_v45 = vpop.permute.xlu1 %2321 }
 0x670   : > { %3091 = vrot.lane.b32.xlu1 %v5484_v8, %s3881_s23 }
 0x672   : > { %3093 = vrot.lane.b32.xlu0 %v5496_v39, %s3881_s23 }
 0x673   : > { %v5557_v5 = vpop.permute.xlu1 %2325 }
 0x674   : > { %2935 = vrot.lane.b32.xlu1 %v2852_v24, %s3880_s20  ;;  %v5628_v24 = vld [vmem:[%s3958_s27 + $0xd0] sm:$0xff] }
 0x675   : > { %6375 = vst [vmem:[#allocation39_spill] sm:$0xff] %v5628_v24  ;;  %v2251_v29 = vsub.f32 %v5475_v60, %v5628_v24  ;;  %v2826_v60 = vsub.f32 %v5477_v0, %v5619_v9  ;;  %v2827_v13 = vsub.f32 %v5493_v38, %v5628_v24 }
 0x676   : > { %2937 = vrot.lane.b32.xlu0 %v2853_v51, %s3880_s20 }
 0x677   : > { %v5568_v59 = vpop.permute.xlu1 %2897  ;;  %v2859_v26 = vmul.f32 %v2827_v13, %v2827_v13 }
 0x678   : > { %2363 = vrot.lane.b32.xlu1 %v2278_v44, %s3879_s18  ;;  %v2282_v44 = vmul.f32 %v2250_v4, %v2250_v4 }
 0x679   : > { %v5571_v52 = vpop.xlane.xlu0 %2799 }
 0x67a   : > { %2365 = vrot.lane.b32.xlu0 %v2279_v55, %s3879_s18  ;;  %v2283_v55 = vmul.f32 %v2251_v29, %v2251_v29 }
 0x67b   : > { %v5576_v27 = vpop.permute.xlu1 %2899 }
 0x67c   : > { %3095 = vrot.lane.b32.xlu1 %v5519_v58, %s3881_s23  ;;  %v6382_v58 = vld [vmem:[#allocation30_spill] sm:$0xff] }
 0x67d   : > { %v5582_v42 = vpop.permute.xlu0 %2323 }
 0x67e   : > { %3097 = vrot.lane.b32.xlu0 %v5528_v19, %s3881_s23  ;;  %v3799_v19 = vld [vmem:[%s3958_s27 + $0x10] sm:$0xff] }
 0x67f   : > { %v5591_v36 = vpop.permute.xlu1 %2901 }
 0x680   : > { %2939 = vrot.lane.b32.xlu1 %v2854_v53, %s3880_s20 }
 0x681   : > { %v5599_v2 = vpop.permute.xlu0 %2327 }
 0x682   : > { %2941 = vrot.lane.b32.xlu0 %v2855_v18, %s3880_s20  ;;  %v2252_v18 = vsub.f32 %v5501_v3, %v5653_v47 }
 0x683   : > { %v5602_v35 = vpop.permute.xlu1 %3059 }
 0x684   : > { %2367 = vrot.lane.b32.xlu1 %v2280_v22, %s3879_s18  ;;  %v2858_v22 = vmul.f32 %v2826_v60, %v2826_v60  ;;  %v2284_v4 = vmul.f32 %v2252_v18, %v2252_v18  ;;  %v5687_v60 = vld [vmem:[%s3958_s27 + $0xe8] sm:$0xff] }
 0x685   : > { %v5605_v41 = vpop.permute.xlu0 %3057  ;;  %v2254_v13 = vsub.f32 %v5533_v20, %v5687_v60 }
 0x686   : > { %2369 = vrot.lane.b32.xlu0 %v2281_v7, %s3879_s18  ;;  %v5662_v7 = vld [vmem:[%s3958_s27 + $0xe0] sm:$0xff] }
 0x687   : > { %v5610_v37 = vpop.permute.xlu1 %2903  ;;  %6377 = vst [vmem:[#allocation19_spill] sm:$0xff] %v5662_v7  ;;  %v2253_v38 = vsub.f32 %v5510_v32, %v5662_v7  ;;  %v2828_v32 = vsub.f32 %v5504_v43, %v5653_v47 }
 0x688   : > { %3099 = vrot.lane.b32.xlu1 %v5551_v16, %s3881_s23 }
 0x689   : > { %v5616_v57 = vpop.permute.xlu0 %2329  ;;  %v2860_v18 = vmul.f32 %v2828_v32, %v2828_v32 }
 0x68a   : > { %3101 = vrot.lane.b32.xlu0 %v5560_v21, %s3881_s23  ;;  %v6381_v21 = vld [vmem:[#allocation81_spill] sm:$0xff] }
 0x68b   : > { %v5625_v49 = vpop.permute.xlu1 %2331 }
 0x68c   : > { %2943 = vrot.lane.b32.xlu1 %v2856_v12, %s3880_s20  ;;  %v2285_v12 = vmul.f32 %v2253_v38, %v2253_v38 }
 0x68d   : > { %v5633_v51 = vpop.permute.xlu0 %3061 }
 0x68e   : > { %2945 = vrot.lane.b32.xlu0 %v2857_v40, %s3880_s20 }
 0x68f   : > { %v5636_v34 = vpop.permute.xlu1 %3063 }
 0x690   : > { %2371 = vrot.lane.b32.xlu1 %v2282_v44, %s3879_s18  ;;  %v2829_v44 = vsub.f32 %v5512_v17, %v5662_v7 }
 0x691   : > { %v5639_v30 = vpop.permute.xlu0 %2905 }
 0x692   : > { %2373 = vrot.lane.b32.xlu0 %v2283_v55, %s3879_s18  ;;  %v2861_v38 = vmul.f32 %v2829_v44, %v2829_v44 }
 0x693   : > { %v5644_v23 = vpop.permute.xlu1 %2907 }
 0x694   : > { %3103 = vrot.lane.b32.xlu1 %v5585_v6, %s3881_s23 }
 0x695   : > { %v5650_v53 = vpop.permute.xlu0 %2333 }
 0x696   : > { %3105 = vrot.lane.b32.xlu0 %v5594_v50, %s3881_s23 }
 0x697   : > { %v5659_v0 = vpop.permute.xlu1 %2335 }
 0x698   : > { %2947 = vrot.lane.b32.xlu1 %v2858_v22, %s3880_s20  ;;  %v5696_v22 = vld [vmem:[%s3958_s27 + $0xf0] sm:$0xff] }
 0x699   : > { %v5667_v54 = vpop.permute.xlu0 %3065  ;;  %v2255_v17 = vsub.f32 %v5542_v62, %v5696_v22  ;;  %v2831_v44 = vsub.f32 %v5536_v61, %v5696_v22  ;;  %v3797_v61 = vld [vmem:[%s3958_s27 + $0x8] sm:$0xff] }
 0x69a   : > { %2949 = vrot.lane.b32.xlu0 %v2859_v26, %s3880_s20 }
 0x69b   : > { %v5670_v3 = vpop.permute.xlu1 %3067 }
 0x69c   : > { %2375 = vrot.lane.b32.xlu1 %v2284_v4, %s3879_s18  ;;  %v2286_v4 = vmul.f32 %v2254_v13, %v2254_v13  ;;  %v3882_v13 = vmov 0.0  }
 0x69d   : > { %v5673_v29 = vpop.permute.xlu0 %2909  ;;  %196 = vst.msk [vmem:[#allocation2] sm:$0xff] %vm195_vm1, %v3882_v13  ;;  %197 = vst.msk [vmem:[#allocation2 + $0x8] sm:$0xff] %vm195_vm1, %v3882_v13 }
 0x69e   : > { %2377 = vrot.lane.b32.xlu0 %v2285_v12, %s3879_s18  ;;  %v2287_v12 = vmul.f32 %v2255_v17, %v2255_v17  ;;  %198 = vst.msk [vmem:[#allocation2 + $0x10] sm:$0xff] %vm195_vm1, %v3882_v13  ;;  %199 = vst.msk [vmem:[#allocation2 + $0x18] sm:$0xff] %vm195_vm1, %v3882_v13 }
 0x69f   : > { %v5678_v40 = vpop.permute.xlu1 %2911  ;;  %200 = vst.msk [vmem:[#allocation2 + $0x20] sm:$0xff] %vm195_vm1, %v3882_v13  ;;  %201 = vst.msk [vmem:[#allocation2 + $0x28] sm:$0xff] %vm195_vm1, %v3882_v13 }
 0x6a0   : > { %3107 = vrot.lane.b32.xlu1 %v5619_v9, %s3881_s23  ;;  %202 = vst.msk [vmem:[#allocation2 + $0x30] sm:$0xff] %vm195_vm1, %v3882_v13  ;;  %203 = vst.msk [vmem:[#allocation2 + $0x38] sm:$0xff] %vm195_vm1, %v3882_v13  ;;  %v2863_v9 = vmul.f32 %v2831_v44, %v2831_v44 }
 0x6a1   : > { %v5684_v55 = vpop.permute.xlu0 %2337  ;;  %204 = vst.msk [vmem:[#allocation2 + $0x40] sm:$0xff] %vm195_vm1, %v3882_v13  ;;  %205 = vst.msk [vmem:[#allocation2 + $0x48] sm:$0xff] %vm195_vm1, %v3882_v13 }
 0x6a2   : > { %3109 = vrot.lane.b32.xlu0 %v5628_v24, %s3881_s23  ;;  %v2830_v24 = vsub.f32 %v5525_v48, %v5687_v60  ;;  %206 = vst.msk [vmem:[#allocation2 + $0x50] sm:$0xff] %vm195_vm1, %v3882_v13  ;;  %207 = vst.msk [vmem:[#allocation2 + $0x58] sm:$0xff] %vm195_vm1, %v3882_v13 }
 0x6a3   : > { %v5693_v43 = vpop.permute.xlu1 %2339  ;;  %208 = vst.msk [vmem:[#allocation2 + $0x60] sm:$0xff] %vm195_vm1, %v3882_v13  ;;  %209 = vst.msk [vmem:[#allocation2 + $0x68] sm:$0xff] %vm195_vm1, %v3882_v13 }
 0x6a4   : > { %2951 = vrot.lane.b32.xlu1 %v2860_v18, %s3880_s20  ;;  %210 = vst.msk [vmem:[#allocation2 + $0x70] sm:$0xff] %vm195_vm1, %v3882_v13  ;;  %211 = vst.msk [vmem:[#allocation2 + $0x78] sm:$0xff] %vm195_vm1, %v3882_v13  ;;  %v6378_v18 = vld [vmem:[#allocation37_spill] sm:$0xff] }
 0x6a5   : > { %v5701_v26 = vpop.permute.xlu0 %3069  ;;  %212 = vst.msk [vmem:[#allocation2 + $0x80] sm:$0xff] %vm195_vm1, %v3882_v13  ;;  %213 = vst.msk [vmem:[#allocation2 + $0x88] sm:$0xff] %vm195_vm1, %v3882_v13  ;;  %v1170_v17 = vsub.f32 %v6378_v18, %v3797_v61  ;;  %v6379_v61 = vld [vmem:[#allocation55_spill] sm:$0xff] }
 0x6a6   : > { %2953 = vrot.lane.b32.xlu0 %v2861_v38, %s3880_s20  ;;  %214 = vst.msk [vmem:[#allocation2 + $0x90] sm:$0xff] %vm195_vm1, %v3882_v13  ;;  %215 = vst.msk [vmem:[#allocation2 + $0x98] sm:$0xff] %vm195_vm1, %v3882_v13  ;;  %v5755_v38 = vld [vmem:[%s3958_s27 + $0xf8] sm:$0xff]  ;;  %v1169_v18 = vsub.f32 %v6379_v61, %v5305_v46  ;;  %v1171_v46 = vsub.f32 %v6382_v58, %v3799_v19 }
 0x6a7   : > { %v5704_v20 = vpop.permute.xlu1 %3071  ;;  %216 = vst.msk [vmem:[#allocation2 + $0xa0] sm:$0xff] %vm195_vm1, %v3882_v13  ;;  %217 = vst.msk [vmem:[#allocation2 + $0xa8] sm:$0xff] %vm195_vm1, %v3882_v13  ;;  %v1202_v6 = vmul.f32 %v1170_v17, %v1170_v17 }
 0x6a8   : > { %2379 = vrot.lane.b32.xlu1 %v2286_v4, %s3879_s18  ;;  %218 = vst.msk [vmem:[#allocation2 + $0xb0] sm:$0xff] %vm195_vm1, %v3882_v13  ;;  %219 = vst.msk [vmem:[#allocation2 + $0xb8] sm:$0xff] %vm195_vm1, %v3882_v13  ;;  %v2256_v4 = vsub.f32 %v5565_v56, %v5755_v38  ;;  %v1201_v17 = vmul.f32 %v1169_v18, %v1169_v18 }
 0x6a9   : > { %v5707_v32 = vpop.permute.xlu0 %2913  ;;  %220 = vst.msk [vmem:[#allocation2 + $0xc0] sm:$0xff] %vm195_vm1, %v3882_v13  ;;  %221 = vst.msk [vmem:[#allocation2 + $0xc8] sm:$0xff] %vm195_vm1, %v3882_v13  ;;  %v1842_v16 = vadd.f32 %v6381_v21, %v1202_v6  ;;  %v6384_v21 = vld [vmem:[#allocation50_spill] sm:$0xff] }
 0x6aa   : > { %2381 = vrot.lane.b32.xlu0 %v2287_v12, %s3879_s18  ;;  %222 = vst.msk [vmem:[#allocation2 + $0xd0] sm:$0xff] %vm195_vm1, %v3882_v13  ;;  %223 = vst.msk [vmem:[#allocation2 + $0xd8] sm:$0xff] %vm195_vm1, %v3882_v13  ;;  %v2862_v12 = vmul.f32 %v2830_v24, %v2830_v24  ;;  %v2288_v56 = vmul.f32 %v2256_v4, %v2256_v4  ;;  %v1841_v6 = vadd.f32 %v6384_v21, %v1201_v17  ;;  %v6388_v21 = vld [vmem:[#allocation20_spill] sm:$0xff] }
 0x6ab   : > { %v5712_v62 = vpop.permute.xlu1 %2915  ;;  %224 = vst.msk [vmem:[#allocation2 + $0xe0] sm:$0xff] %vm195_vm1, %v3882_v13  ;;  %225 = vst.msk [vmem:[#allocation2 + $0xe8] sm:$0xff] %vm195_vm1, %v3882_v13  ;;  %v2418_v4 = vadd.f32 %v5582_v42, %v1842_v16  ;;  %v1203_v16 = vmul.f32 %v1171_v46, %v1171_v46  ;;  %v6386_v42 = vld [vmem:[#allocation47_spill] sm:$0xff] }
 0x6ac   : > { %3111 = vrot.lane.b32.xlu1 %v5653_v47, %s3881_s23  ;;  %226 = vst.msk [vmem:[#allocation2 + $0xf0] sm:$0xff] %vm195_vm1, %v3882_v13  ;;  %227 = vst.msk [vmem:[#allocation2 + $0xf8] sm:$0xff] %vm195_vm1, %v3882_v13  ;;  %v2832_v13 = vsub.f32 %v5571_v52, %v5755_v38 }
 0x6ad   : > { %v5750_v48 = vpop.permute.xlu0 %2341 }
 0x6ae   : > { %3113 = vrot.lane.b32.xlu0 %v5662_v7, %s3881_s23  ;;  %v6380_v7 = vld [vmem:[#allocation56_spill] sm:$0xff]  ;;  %v2864_v52 = vmul.f32 %v2832_v13, %v2832_v13  ;;  %v6385_v13 = vld [vmem:[#allocation29_spill] sm:$0xff] }
 0x6af   : > { %v5761_v47 = vpop.permute.xlu1 %2343  ;;  %v1172_v44 = vsub.f32 %v6380_v7, %v5317_v15  ;;  %v3800_v7 = vld [vmem:[%s3958_s27 + $0x20] sm:$0xff] }
 0x6b0   : > { %2955 = vrot.lane.b32.xlu1 %v2862_v12, %s3880_s20  ;;  %v1173_v58 = vsub.f32 %v6385_v13, %v3800_v7  ;;  %v1843_v7 = vadd.f32 %v6388_v21, %v1203_v16 }
 0x6b1   : > { %v5766_v50 = vpop.permute.xlu0 %3073  ;;  %v1204_v15 = vmul.f32 %v1172_v44, %v1172_v44  ;;  %v6387_v44 = vld [vmem:[#allocation58_spill] sm:$0xff] }
 0x6b2   : > { %2957 = vrot.lane.b32.xlu0 %v2863_v9, %s3880_s20  ;;  %v6383_v9 = vld [vmem:[#allocation60_spill] sm:$0xff]  ;;  %v2419_v16 = vadd.f32 %v5557_v5, %v1843_v7 }
 0x6b3   : > { %v5771_v24 = vpop.permute.xlu1 %3075  ;;  %v1174_v61 = vsub.f32 %v6383_v9, %v5339_v1  ;;  %v1844_v18 = vadd.f32 %v6386_v42, %v1204_v15  ;;  %v2994_v1 = vadd.f32 %v5576_v27, %v2418_v4  ;;  %v6389_v27 = vld [vmem:[#allocation45_spill] sm:$0xff]  ;;  %v6393_v7 = vld [vmem:[#allocation64_spill] sm:$0xff] }
 0x6b4   : > { %2383 = vrot.lane.b32.xlu1 %v2288_v56, %s3879_s18  ;;  %v2417_v56 = vadd.f32 %v5544_v45, %v1841_v6  ;;  %v3801_v45 = vld [vmem:[%s3958_s27 + $0x30] sm:$0xff]  ;;  %v1205_v6 = vmul.f32 %v1173_v58, %v1173_v58  ;;  %v2995_v21 = vadd.f32 %v5591_v36, %v2419_v16 }
 0x6b5   : > { %v5777_v12 = vpop.permute.xlu0 %2917  ;;  %v1206_v17 = vmul.f32 %v1174_v61, %v1174_v61  ;;  %v2420_v46 = vadd.f32 %v5599_v2, %v1844_v18  ;;  %v3154_v15 = vmul.f32 %v5602_v35, %v2994_v1  ;;  %v1175_v4 = vsub.f32 %v6389_v27, %v3801_v45  ;;  %v6390_v61 = vld [vmem:[#allocation78_spill] sm:$0xff]  ;;  %v6391_v18 = vld [vmem:[#allocation68_spill] sm:$0xff] }
 0x6b6   : > { %2959 = vrot.lane.b32.xlu0 %v2864_v52, %s3880_s20  ;;  %v1176_v52 = vsub.f32 %v6387_v44, %v5356_v31  ;;  %v2993_v13 = vadd.f32 %v5568_v59, %v2417_v56  ;;  %v1178_v56 = vsub.f32 %v6391_v18, %v5375_v33  ;;  %v6392_v58 = vld [vmem:[#allocation8_spill] sm:$0xff]  ;;  %v3155_v45 = vmul.f32 %v5633_v51, %v2995_v21  ;;  %v6400_v21 = vld [vmem:[#allocation15_spill] sm:$0xff] }
 0x6b7   : > { %v5785_v39 = vpop.permute.xlu1 %2919  ;;  %v1846_v42 = vadd.f32 %v6390_v61, %v1206_v17  ;;  %v2996_v2 = vadd.f32 %v5610_v37, %v2420_v46  ;;  %v1845_v44 = vadd.f32 %v6392_v58, %v1205_v6  ;;  %v3802_v37 = vld [vmem:[%s3958_s27 + $0x40] sm:$0xff]  ;;  %v6394_v46 = vld [vmem:[#allocation51_spill] sm:$0xff] }
 0x6b8   : > { %3115 = vrot.lane.b32.xlu1 %v5687_v60, %s3881_s23  ;;  %v3153_v59 = vmul.f32 %v5605_v41, %v2993_v13  ;;  %v1208_v35 = vmul.f32 %v1176_v52, %v1176_v52  ;;  %v1207_v41 = vmul.f32 %v1175_v4, %v1175_v4  ;;  %v1177_v13 = vsub.f32 %v6393_v7, %v3802_v37  ;;  %v6396_v6 = vld [vmem:[#allocation82_spill] sm:$0xff] }
 0x6b9   : > { %v5792_v19 = vpop.permute.xlu0 %2345  ;;  %v2422_v17 = vadd.f32 %v5625_v49, %v1846_v42  ;;  %v3156_v5 = vmul.f32 %v5636_v34, %v2996_v2  ;;  %v6395_v49 = vld [vmem:[#allocation66_spill] sm:$0xff]  ;;  %v1210_v27 = vmul.f32 %v1178_v56, %v1178_v56 }
 0x6ba   : > { %3119 = vrot.lane.b32.xlu0 %v5755_v38, %s3881_s23  ;;  %v1848_v33 = vadd.f32 %v6394_v46, %v1208_v35  ;;  %v1180_v34 = vsub.f32 %v6395_v49, %v5396_v25  ;;  %v1847_v61 = vadd.f32 %v6396_v6, %v1207_v41  ;;  %v6398_v35 = vld [vmem:[#allocation14_spill] sm:$0xff] }
 0x6bb   : > { %v5801_v9 = vpop.permute.xlu1 %2347  ;;  %v2998_v36 = vadd.f32 %v5644_v23, %v2422_v17  ;;  %v1209_v23 = vmul.f32 %v1177_v13, %v1177_v13  ;;  %v1850_v25 = vadd.f32 %v6398_v35, %v1210_v27  ;;  %v6402_v13 = vld [vmem:[#allocation10_spill] sm:$0xff] }
 0x6bc   : > { %3117 = vrot.lane.b32.xlu1 %v5696_v22, %s3881_s23  ;;  %v2424_v16 = vadd.f32 %v5659_v0, %v1848_v33  ;;  %v2423_v18 = vadd.f32 %v5650_v53, %v1847_v61  ;;  %v1212_v0 = vmul.f32 %v1180_v34, %v1180_v34 }
 0x6bd   : > { %v5811_v31 = vpop.permute.xlu0 %3077 }
 0x6be   : > { %3219 = vrot.lane.b32.xlu0 %v3154_v15, %s3880_s20  ;;  %v2421_v15 = vadd.f32 %v5616_v57, %v1845_v44  ;;  %v6397_v57 = vld [vmem:[#allocation62_spill] sm:$0xff]  ;;  %v2999_v17 = vadd.f32 %v5673_v29, %v2423_v18  ;;  %v1852_v46 = vadd.f32 %v6402_v13, %v1212_v0 }
 0x6bf   : > { %v5820_v1 = vpop.permute.xlu1 %3079  ;;  %v1179_v51 = vsub.f32 %v6397_v57, %v5428_v63  ;;  %v1849_v63 = vadd.f32 %v6400_v21, %v1209_v23  ;;  %v6403_v29 = vld [vmem:[#allocation74_spill] sm:$0xff] }
 0x6c0   : > { %3217 = vrot.lane.b32.xlu1 %v3153_v59, %s3880_s20  ;;  %v2997_v42 = vadd.f32 %v5639_v30, %v2421_v15  ;;  %v3158_v59 = vmul.f32 %v5670_v3, %v2998_v36  ;;  %v3000_v30 = vadd.f32 %v5678_v40, %v2424_v16  ;;  %v6399_v3 = vld [vmem:[#allocation76_spill] sm:$0xff]  ;;  %v3159_v33 = vmul.f32 %v5701_v26, %v2999_v17  ;;  %v6404_v36 = vld [vmem:[#allocation11_spill] sm:$0xff]  ;;  %v6408_v18 = vld [vmem:[#allocation18_spill] sm:$0xff] }
 0x6c1   : > { %v5829_v52 = vpop.permute.xlu0 %2921  ;;  %v1182_v58 = vsub.f32 %v6399_v3, %v5423_v11  ;;  %v1211_v53 = vmul.f32 %v1179_v51, %v1179_v51  ;;  %v6401_v40 = vld [vmem:[#allocation72_spill] sm:$0xff]  ;;  %v2425_v11 = vadd.f32 %v5684_v55, %v1849_v63  ;;  %v2428_v27 = vadd.f32 %v5761_v47, %v1852_v46  ;;  %v6405_v55 = vld [vmem:[#allocation70_spill] sm:$0xff]  ;;  %v6409_v3 = vld [vmem:[#allocation21_spill] sm:$0xff] }
 0x6c2   : > { %3223 = vrot.lane.b32.xlu0 %v3156_v5, %s3880_s20  ;;  %v3157_v56 = vmul.f32 %v5667_v54, %v2997_v42  ;;  %v2426_v5 = vadd.f32 %v5693_v43, %v1850_v25  ;;  %v3160_v41 = vmul.f32 %v5704_v20, %v3000_v30  ;;  %v3803_v54 = vld [vmem:[%s3958_s27 + $0x60] sm:$0xff]  ;;  %v1184_v43 = vsub.f32 %v6403_v29, %v5453_v28  ;;  %v6410_v63 = vld [vmem:[#allocation28_spill] sm:$0xff]  ;;  %s3498_s27 = scalar_lea.vmem %s6060_s2, %s3860_s12 }
 0x6c3   : > { %v2924_v4 = vpop.permute.xlu1 %2923  ;;  %v1181_v37 = vsub.f32 %v6401_v40, %v3803_v54  ;;  %v1214_v20 = vmul.f32 %v1182_v58, %v1182_v58  ;;  %v1851_v49 = vadd.f32 %v6404_v36, %v1211_v53  ;;  %v3001_v34 = vadd.f32 %v5707_v32, %v2425_v11  ;;  %v6406_v42 = vld [vmem:[#allocation26_spill] sm:$0xff]  ;;  %v6413_v11 = vld [vmem:[#allocation52_spill] sm:$0xff]  ;;  %v6415_v36 = vld [vmem:[#allocation33_spill] sm:$0xff]  ;;  %s3500_s29 = sshll.u32 %s3498_s27, 4  ;;  %s3501_s29 = int_to_ptr.vmem [resolvable:$true] %s3500_s29 }
 0x6c4   : > { %3221 = vrot.lane.b32.xlu1 %v3155_v45, %s3880_s20  ;;  %v3002_v15 = vadd.f32 %v5712_v62, %v2426_v5  ;;  %v1183_v26 = vsub.f32 %v6405_v55, %v5489_v14  ;;  %v3004_v57 = vadd.f32 %v5785_v39, %v2428_v27  ;;  %v1216_v47 = vmul.f32 %v1184_v43, %v1184_v43  ;;  %v6416_v55 = vld [vmem:[#allocation44_spill] sm:$0xff]  ;;  %s3804_s5 = scalar_lea.vmem %s3501_s29, 16  ;;  %p3811_p1 = scmp.lt.s32.totalorder %s3501_s29, %s3809_s8 }
 0x6c5   : > { %v2350_v2 = vpop.permute.xlu0 %2349  ;;  %v1213_v62 = vmul.f32 %v1181_v37, %v1181_v37  ;;  %v1854_v16 = vadd.f32 %v6406_v42, %v1214_v20  ;;  %v2427_v28 = vadd.f32 %v5750_v48, %v1851_v49  ;;  %v1185_v17 = vsub.f32 %v6410_v63, %v5462_v10  ;;  %p3805_p12 = scmp.ne.s32.totalorder %s3501_s29, %s3804_s5  ;;  %p3812_p2 = scmp.lt.s32.totalorder %s3810_s15, %s3804_s5 }
 0x6c6   : > { %3227 = vrot.lane.b32.xlu0 %v3158_v59, %s3880_s20  ;;  %v3162_v6 = vmul.f32 %v5771_v24, %v3002_v15  ;;  %v3161_v59 = vmul.f32 %v5766_v50, %v3001_v34  ;;  %v6407_v24 = vld [vmem:[#allocation84_spill] sm:$0xff]  ;;  %v3164_v35 = vmul.f32 %v5820_v1, %v3004_v57  ;;  %v1215_v25 = vmul.f32 %v1183_v26, %v1183_v26  ;;  %v6417_v26 = vld [vmem:[#allocation49_spill] sm:$0xff] }
 0x6c7   : > { %v2352_v44 = vpop.permute.xlu1 %2351  ;;  %v1853_v51 = vadd.f32 %v6407_v24, %v1213_v62  ;;  %v3003_v23 = vadd.f32 %v5777_v12, %v2427_v28  ;;  %v2430_v14 = vadd.f32 %v5801_v9, %v1854_v16  ;;  %v1856_v50 = vadd.f32 %v6408_v18, %v1216_v47  ;;  %v6418_v57 = vld [vmem:[#allocation24_spill] sm:$0xff]  ;;  %v6419_v24 = vld [vmem:[#allocation46_spill] sm:$0xff]  ;;  %p3806_p13 = pnand %p3805_p12, %p3938_p4  ;;  %p3813_p3 = por %p3812_p2, %p3811_p1 }
 0x6c8   : > { %3225 = vrot.lane.b32.xlu1 %v3157_v56, %s3880_s20  ;;  %v1855_v12 = vadd.f32 %v6409_v3, %v1215_v25  ;;  %v1188_v62 = vsub.f32 %v6417_v26, %v6416_v55  ;;  %v6420_v18 = vld [vmem:[#allocation48_spill] sm:$0xff]  ;;  %v6422_v3 = vld [vmem:[#allocation54_spill] sm:$0xff] }
 0x6c9   : > { %v3082_v7 = vpop.permute.xlu0 %3081  ;;  %v2429_v39 = vadd.f32 %v5792_v19, %v1853_v51  ;;  %v3163_v56 = vmul.f32 %v5811_v31, %v3003_v23  ;;  %v3006_v30 = vadd.f32 %v2924_v4, %v2430_v14  ;;  %v2432_v58 = vadd.f32 %v2352_v44, %v1856_v50  ;;  %v6411_v4 = vld [vmem:[#allocation36_spill] sm:$0xff]  ;;  %v6421_v50 = vld [vmem:[#allocation57_spill] sm:$0xff]  ;;  %p3807_p0 = pneg %p3806_p13 }
 0x6ca   : > { %3231 = vrot.lane.b32.xlu0 %v3160_v41, %s3880_s20  ;;  %v2431_v5 = vadd.f32 %v2350_v2, %v1855_v12  ;;  %v1186_v53 = vsub.f32 %v6411_v4, %v5484_v8  ;;  %v1217_v44 = vmul.f32 %v1185_v17, %v1185_v17  ;;  %v6412_v2 = vld [vmem:[#allocation79_spill] sm:$0xff]  ;;  %v6423_v12 = vld [vmem:[#allocation61_spill] sm:$0xff] }
 0x6cb   : > { %v3084_v45 = vpop.permute.xlu1 %3083  ;;  %v3005_v9 = vadd.f32 %v5829_v52, %v2429_v39  ;;  %v1189_v39 = vsub.f32 %v6421_v50, %v6420_v18  ;;  %v6436_v50 = vld [vmem:[#allocation17_spill] sm:$0xff]  ;;  %p3814_p5 = pnand %p3813_p3, %p3807_p0 }
 0x6cc   : > { %3229 = vrot.lane.b32.xlu1 %v3159_v33, %s3880_s20  ;;  %v3166_v1 = vmul.f32 %v3084_v45, %v3006_v30  ;;  %v1218_v10 = vmul.f32 %v1186_v53, %v1186_v53  ;;  %v6414_v45 = vld [vmem:[#allocation40_spill] sm:$0xff] }
 0x6cd   : > { %v2926_v61 = vpop.permute.xlu0 %2925  ;;  %v3165_v19 = vmul.f32 %v3082_v7, %v3005_v9  ;;  %v1857_v7 = vadd.f32 %v6412_v2, %v1217_v44  ;;  %v1187_v49 = vsub.f32 %v6415_v36, %v6414_v45  ;;  %v1190_v9 = vsub.f32 %v6423_v12, %v6422_v3  ;;  %v6430_v36 = vld [vmem:[#allocation7_spill] sm:$0xff] }
 0x6ce   : > { %3235 = vrot.lane.b32.xlu0 %v3162_v6, %s3880_s20  ;;  %v3007_v54 = vadd.f32 %v2926_v61, %v2431_v5  ;;  %v1858_v33 = vadd.f32 %v6413_v11, %v1218_v10  ;;  %v6424_v5 = vld [vmem:[#allocation9_spill] sm:$0xff]  ;;  %v6428_v11 = vld [vmem:[#allocation35_spill] sm:$0xff] }
 0x6cf   : > { %v2928_v32 = vpop.permute.xlu1 %2927  ;;  %v1219_v16 = vmul.f32 %v1187_v49, %v1187_v49  ;;  %v1222_v17 = vmul.f32 %v1190_v9, %v1190_v9 }
 0x6d0   : > { %3233 = vrot.lane.b32.xlu1 %v3161_v59, %s3880_s20  ;;  %v3008_v41 = vadd.f32 %v2928_v32, %v2432_v58  ;;  %v1220_v59 = vmul.f32 %v1188_v62, %v1188_v62 }
 0x6d1   : > { %v2354_v48 = vpop.permute.xlu0 %2353  ;;  %v1859_v47 = vadd.f32 %v6418_v57, %v1219_v16  ;;  %v6432_v16 = vld [vmem:[#allocation34_spill] sm:$0xff] }
 0x6d2   : > { %3239 = vrot.lane.b32.xlu0 %v3164_v35, %s3880_s20  ;;  %v2433_v15 = vadd.f32 %v2354_v48, %v1857_v7  ;;  %v1860_v51 = vadd.f32 %v6419_v24, %v1220_v59  ;;  %v6434_v24 = vld [vmem:[#allocation38_spill] sm:$0xff] }
 0x6d3   : > { %v2356_v0 = vpop.permute.xlu1 %2355 }
 0x6d4   : > { %3237 = vrot.lane.b32.xlu1 %v3163_v56, %s3880_s20  ;;  %v2434_v29 = vadd.f32 %v2356_v0, %v1858_v33  ;;  %v6429_v33 = vld [vmem:[#allocation59_spill] sm:$0xff] }
 0x6d5   : > { %v3086_v21 = vpop.permute.xlu0 %3085 }
 0x6d6   : > { %3243 = vrot.lane.b32.xlu0 %v3166_v1, %s3880_s20  ;;  %v3167_v37 = vmul.f32 %v3086_v21, %v3007_v54  ;;  %v1221_v21 = vmul.f32 %v1189_v39, %v1189_v39 }
 0x6d7   : > { %v3088_v31 = vpop.permute.xlu1 %3087 }
 0x6d8   : > { %v3168_v40 = vmul.f32 %v3088_v31, %v3008_v41  ;;  %3241 = vrot.lane.b32.xlu1 %v3165_v19, %s3880_s20  ;;  %v1861_v19 = vadd.f32 %v6424_v5, %v1221_v21  ;;  %v6425_v31 = vld [vmem:[#allocation6_spill] sm:$0xff]  ;;  %v6438_v21 = vld [vmem:[#allocation39_spill] sm:$0xff] }
 0x6d9   : > { %v2930_v52 = vpop.permute.xlu0 %2929  ;;  %v1862_v4 = vadd.f32 %v6425_v31, %v1222_v17  ;;  %v6440_v31 = vld [vmem:[#allocation42_spill] sm:$0xff] }
 0x6da   : > { %3247 = vrot.lane.b32.xlu0 %v3168_v40, %s3880_s20  ;;  %v3009_v43 = vadd.f32 %v2930_v52, %v2433_v15  ;;  %v1192_v15 = vsub.f32 %v6429_v33, %v6428_v11 }
 0x6db   : > { %v2932_v13 = vpop.permute.xlu1 %2931 }
 0x6dc   : > { %3245 = vrot.lane.b32.xlu1 %v3167_v37, %s3880_s20  ;;  %v3010_v34 = vadd.f32 %v2932_v13, %v2434_v29  ;;  %v6426_v37 = vld [vmem:[#allocation53_spill] sm:$0xff]  ;;  %v6427_v13 = vld [vmem:[#allocation31_spill] sm:$0xff]  ;;  %v1224_v45 = vmul.f32 %v1192_v15, %v1192_v15 }
 0x6dd   : > { %v2358_v46 = vpop.permute.xlu0 %2357  ;;  %v1191_v10 = vsub.f32 %v6427_v13, %v6426_v37  ;;  %v6442_v13 = vld [vmem:[#allocation13_spill] sm:$0xff] }
 0x6de   : > { %v2435_v23 = vadd.f32 %v2358_v46, %v1859_v47 }
 0x6df   : > { %v2360_v8 = vpop.permute.xlu1 %2359 }
 0x6e0   : > { %v2436_v35 = vadd.f32 %v2360_v8, %v1860_v51  ;;  %v6435_v51 = vld [vmem:[#allocation69_spill] sm:$0xff] }
 0x6e1   : > { %v3090_v20 = vpop.permute.xlu0 %3089 }
 0x6e2   : > { %v3169_v27 = vmul.f32 %v3090_v20, %v3009_v43  ;;  %v1223_v43 = vmul.f32 %v1191_v10, %v1191_v10 }
 0x6e3   : > { %v3092_v6 = vpop.permute.xlu1 %3091 }
 0x6e4   : > { %v3170_v61 = vmul.f32 %v3092_v6, %v3010_v34  ;;  %3249 = vrot.lane.b32.xlu1 %v3169_v27, %s3880_s20  ;;  %v1863_v49 = vadd.f32 %v6430_v36, %v1223_v43  ;;  %v6431_v27 = vld [vmem:[#allocation77_spill] sm:$0xff]  ;;  %v6444_v43 = vld [vmem:[#allocation19_spill] sm:$0xff] }
 0x6e5   : > { %v2934_v42 = vpop.permute.xlu0 %2933  ;;  %v1864_v6 = vadd.f32 %v6431_v27, %v1224_v45  ;;  %v6446_v27 = vld [vmem:[#allocation32_spill] sm:$0xff] }
 0x6e6   : > { %3251 = vrot.lane.b32.xlu0 %v3170_v61, %s3880_s20  ;;  %v3011_v25 = vadd.f32 %v2934_v42, %v2435_v23  ;;  %v1194_v23 = vsub.f32 %v6435_v51, %v6434_v24 }
 0x6e7   : > { %v2936_v28 = vpop.permute.xlu1 %2935 }
 0x6e8   : > { %v3012_v56 = vadd.f32 %v2936_v28, %v2436_v35  ;;  %v6433_v28 = vld [vmem:[#allocation65_spill] sm:$0xff]  ;;  %v1226_v18 = vmul.f32 %v1194_v23, %v1194_v23 }
 0x6e9   : > { %v2362_v32 = vpop.permute.xlu0 %2361  ;;  %v1193_v59 = vsub.f32 %v6433_v28, %v6432_v16 }
 0x6ea   : > { %v2437_v53 = vadd.f32 %v2362_v32, %v1861_v19 }
 0x6eb   : > { %v2364_v14 = vpop.permute.xlu1 %2363 }
 0x6ec   : > { %v2438_v40 = vadd.f32 %v2364_v14, %v1862_v4  ;;  %v6441_v4 = vld [vmem:[#allocation67_spill] sm:$0xff] }
 0x6ed   : > { %v3094_v48 = vpop.permute.xlu0 %3093 }
 0x6ee   : > { %v3171_v30 = vmul.f32 %v3094_v48, %v3011_v25  ;;  %v1225_v25 = vmul.f32 %v1193_v59, %v1193_v59  ;;  %v6448_v59 = vld [vmem:[#allocation86_spill] sm:$0xff] }
 0x6ef   : > { %v3096_v0 = vpop.permute.xlu1 %3095 }
 0x6f0   : > { %v3172_v58 = vmul.f32 %v3096_v0, %v3012_v56  ;;  %3253 = vrot.lane.b32.xlu1 %v3171_v30, %s3880_s20  ;;  %v1865_v39 = vadd.f32 %v6436_v50, %v1225_v25  ;;  %v6437_v30 = vld [vmem:[#allocation16_spill] sm:$0xff]  ;;  %v6451_v50 = vld [vmem:[#allocation25_spill] sm:$0xff] }
 0x6f1   : > { %v2938_v1 = vpop.permute.xlu0 %2937  ;;  %v1866_v0 = vadd.f32 %v6437_v30, %v1226_v18 }
 0x6f2   : > { %3255 = vrot.lane.b32.xlu0 %v3172_v58, %s3880_s20  ;;  %v3013_v52 = vadd.f32 %v2938_v1, %v2437_v53  ;;  %v1196_v53 = vsub.f32 %v6441_v4, %v6440_v31 }
 0x6f3   : > { %v2940_v63 = vpop.permute.xlu1 %2939 }
 0x6f4   : > { %v3014_v2 = vadd.f32 %v2940_v63, %v2438_v40  ;;  %v6439_v63 = vld [vmem:[#allocation63_spill] sm:$0xff]  ;;  %v1228_v37 = vmul.f32 %v1196_v53, %v1196_v53 }
 0x6f5   : > { %v2366_v41 = vpop.permute.xlu0 %2365  ;;  %v1195_v17 = vsub.f32 %v6439_v63, %v6438_v21  ;;  %v6452_v21 = vld [vmem:[#allocation22_spill] sm:$0xff] }
 0x6f6   : > { %v2439_v55 = vadd.f32 %v2366_v41, %v1863_v49 }
 0x6f7   : > { %v2368_v54 = vpop.permute.xlu1 %2367 }
 0x6f8   : > { %v2440_v62 = vadd.f32 %v2368_v54, %v1864_v6  ;;  %v1198_v6 = vsub.f32 %v6446_v27, %v5687_v60  ;;  %v3032_v27 = vld [vmem:[#allocation2 + $0x38] sm:$0xff] }
 0x6f9   : > { %v3098_v44 = vpop.permute.xlu0 %3097 }
 0x6fa   : > { %v3173_v7 = vmul.f32 %v3098_v44, %v3013_v52  ;;  %v1227_v52 = vmul.f32 %v1195_v17, %v1195_v17  ;;  %v1230_v28 = vmul.f32 %v1198_v6, %v1198_v6 }
 0x6fb   : > { %v3100_v46 = vpop.permute.xlu1 %3099 }
 0x6fc   : > { %v3174_v8 = vmul.f32 %v3100_v46, %v3014_v2  ;;  %3257 = vrot.lane.b32.xlu1 %v3173_v7, %s3880_s20  ;;  %v1867_v10 = vadd.f32 %v6442_v13, %v1227_v52  ;;  %v6443_v7 = vld [vmem:[#allocation12_spill] sm:$0xff] }
 0x6fd   : > { %v2942_v29 = vpop.permute.xlu0 %2941  ;;  %v1868_v46 = vadd.f32 %v6443_v7, %v1228_v37 }
 0x6fe   : > { %3259 = vrot.lane.b32.xlu0 %v3174_v8, %s3880_s20  ;;  %v3015_v61 = vadd.f32 %v2942_v29, %v2439_v55 }
 0x6ff   : > { %v2944_v20 = vpop.permute.xlu1 %2943 }
 0x700   : > { %v3016_v57 = vadd.f32 %v2944_v20, %v2440_v62  ;;  %v6445_v20 = vld [vmem:[#allocation73_spill] sm:$0xff] }
 0x701   : > { %v2370_v34 = vpop.permute.xlu0 %2369  ;;  %v1197_v45 = vsub.f32 %v6445_v20, %v6444_v43  ;;  %v3030_v43 = vld [vmem:[#allocation2 + $0x28] sm:$0xff] }
 0x702   : > { %v2441_v3 = vadd.f32 %v2370_v34, %v1865_v39 }
 0x703   : > { %v2372_v26 = vpop.permute.xlu1 %2371  ;;  %v1229_v62 = vmul.f32 %v1197_v45, %v1197_v45 }
 0x704   : > { %v2442_v9 = vadd.f32 %v2372_v26, %v1866_v0 }
 0x705   : > { %v3102_v42 = vpop.permute.xlu0 %3101 }
 0x706   : > { %v3175_v47 = vmul.f32 %v3102_v42, %v3015_v61  ;;  %v6447_v42 = vld [vmem:[#allocation71_spill] sm:$0xff] }
 0x707   : > { %v3104_v32 = vpop.permute.xlu1 %3103  ;;  %v1199_v16 = vsub.f32 %v6447_v42, %v5696_v22  ;;  %v3034_v42 = vld [vmem:[#allocation2 + $0x48] sm:$0xff] }
 0x708   : > { %v3176_v14 = vmul.f32 %v3104_v32, %v3016_v57  ;;  %3261 = vrot.lane.b32.xlu1 %v3175_v47, %s3880_s20  ;;  %v1869_v57 = vadd.f32 %v6448_v59, %v1229_v62  ;;  %v6449_v32 = vld [vmem:[#allocation80_spill] sm:$0xff] }
 0x709   : > { %v2946_v35 = vpop.permute.xlu0 %2945  ;;  %v1870_v24 = vadd.f32 %v6449_v32, %v1230_v28  ;;  %v1231_v60 = vmul.f32 %v1199_v16, %v1199_v16 }
 0x70a   : > { %3263 = vrot.lane.b32.xlu0 %v3176_v14, %s3880_s20  ;;  %v3017_v58 = vadd.f32 %v2946_v35, %v2441_v3 }
 0x70b   : > { %v2948_v48 = vpop.permute.xlu1 %2947  ;;  %v1871_v39 = vadd.f32 %v6451_v50, %v1231_v60 }
 0x70c   : > { %v3018_v5 = vadd.f32 %v2948_v48, %v2442_v9  ;;  %v6450_v48 = vld [vmem:[#allocation75_spill] sm:$0xff] }
 0x70d   : > { %v2374_v56 = vpop.permute.xlu0 %2373  ;;  %v1200_v18 = vsub.f32 %v6450_v48, %v5755_v38  ;;  %v3025_v38 = vld [vmem:[#allocation2] sm:$0xff] }
 0x70e   : > { %v2443_v11 = vadd.f32 %v2374_v56, %v1867_v10  ;;  %v3029_v10 = vld [vmem:[#allocation2 + $0x20] sm:$0xff] }
 0x70f   : > { %v2376_v12 = vpop.permute.xlu1 %2375  ;;  %v1232_v9 = vmul.f32 %v1200_v18, %v1200_v18 }
 0x710   : > { %v2444_v15 = vadd.f32 %v2376_v12, %v1868_v46  ;;  %v3028_v46 = vld [vmem:[#allocation2 + $0x18] sm:$0xff] }
 0x711   : > { %v3106_v1 = vpop.permute.xlu0 %3105  ;;  %v1872_v63 = vadd.f32 %v6452_v21, %v1232_v9  ;;  %v3041_v21 = vld [vmem:[#allocation2 + $0x80] sm:$0xff] }
 0x712   : > { %v3177_v19 = vmul.f32 %v3106_v1, %v3017_v58 }
 0x713   : > { %v3108_v41 = vpop.permute.xlu1 %3107 }
 0x714   : > { %v3178_v54 = vmul.f32 %v3108_v41, %v3018_v5  ;;  %3265 = vrot.lane.b32.xlu1 %v3177_v19, %s3880_s20 }
 0x715   : > { %v2950_v40 = vpop.permute.xlu0 %2949 }
 0x716   : > { %3267 = vrot.lane.b32.xlu0 %v3178_v54, %s3880_s20  ;;  %v3019_v8 = vadd.f32 %v2950_v40, %v2443_v11  ;;  %v3027_v54 = vld [vmem:[#allocation2 + $0x10] sm:$0xff] }
 0x717   : > { %v2952_v44 = vpop.permute.xlu1 %2951 }
 0x718   : > { %v3020_v36 = vadd.f32 %v2952_v44, %v2444_v15  ;;  %v3026_v44 = vld [vmem:[#allocation2 + $0x8] sm:$0xff]  ;;  %v3031_v15 = vld [vmem:[#allocation2 + $0x30] sm:$0xff] }
 0x719   : > { %v2378_v2 = vpop.permute.xlu0 %2377 }
 0x71a   : > { %v2445_v51 = vadd.f32 %v2378_v2, %v1869_v57  ;;  %v3037_v57 = vld [vmem:[#allocation2 + $0x60] sm:$0xff] }
 0x71b   : > { %v2380_v33 = vpop.permute.xlu1 %2379 }
 0x71c   : > { %v2446_v14 = vadd.f32 %v2380_v33, %v1870_v24 }
 0x71d   : > { %v3110_v29 = vpop.permute.xlu0 %3109 }
 0x71e   : > { %v3179_v49 = vmul.f32 %v3110_v29, %v3019_v8 }
 0x71f   : > { %v3112_v34 = vpop.permute.xlu1 %3111 }
 0x720   : > { %v3180_v55 = vmul.f32 %v3112_v34, %v3020_v36  ;;  %3269 = vrot.lane.b32.xlu1 %v3179_v49, %s3880_s20  ;;  %v3033_v36 = vld [vmem:[#allocation2 + $0x40] sm:$0xff] }
 0x721   : > { %v2954_v26 = vpop.permute.xlu0 %2953 }
 0x722   : > { %3271 = vrot.lane.b32.xlu0 %v3180_v55, %s3880_s20  ;;  %v3021_v35 = vadd.f32 %v2954_v26, %v2445_v51  ;;  %v3035_v26 = vld [vmem:[#allocation2 + $0x50] sm:$0xff] }
 0x723   : > { %v2956_v61 = vpop.permute.xlu1 %2955 }
 0x724   : > { %v3022_v56 = vadd.f32 %v2956_v61, %v2446_v14 }
 0x725   : > { %v2382_v47 = vpop.permute.xlu0 %2381 }
 0x726   : > { %v2447_v0 = vadd.f32 %v2382_v47, %v1871_v39 }
 0x727   : > { %v2384_v23 = vpop.permute.xlu1 %2383 }
 0x728   : > { %v2448_v19 = vadd.f32 %v2384_v23, %v1872_v63  ;;  %v3036_v23 = vld [vmem:[#allocation2 + $0x58] sm:$0xff] }
 0x729   : > { %v3114_v25 = vpop.permute.xlu0 %3113 }
 0x72a   : > { %v3181_v30 = vmul.f32 %v3114_v25, %v3021_v35  ;;  %v3039_v25 = vld [vmem:[#allocation2 + $0x70] sm:$0xff] }
 0x72b   : > { %v3116_v22 = vpop.permute.xlu1 %3115 }
 0x72c   : > { %v3182_v3 = vmul.f32 %v3116_v22, %v3022_v56  ;;  %3273 = vrot.lane.b32.xlu1 %v3181_v30, %s3880_s20  ;;  %v3038_v56 = vld [vmem:[#allocation2 + $0x68] sm:$0xff] }
 0x72d   : > { %v2958_v12 = vpop.permute.xlu0 %2957 }
 0x72e   : > { %v3023_v58 = vadd.f32 %v2958_v12, %v2447_v0  ;;  %3275 = vrot.lane.b32.xlu0 %v3182_v3, %s3880_s20 }
 0x72f   : > { %v3118_v1 = vpop.permute.xlu1 %3117 }
 0x730   : > { %v3183_v17 = vmul.f32 %v3118_v1, %v3023_v58  ;;  %v3040_v1 = vld [vmem:[#allocation2 + $0x78] sm:$0xff] }
 0x731   : > { %v2960_v5 = vpop.permute.xlu0 %2959 }
 0x732   : > { %3277 = vrot.lane.b32.xlu1 %v3183_v17, %s3880_s20  ;;  %v3024_v31 = vadd.f32 %v2960_v5, %v2448_v19 }
 0x733   : > { %v3218_v41 = vpop.permute.xlu1 %3217 }
 0x734   : > { %v3313_v4 = vadd.f32 %v3218_v41, %v3025_v38 }
 0x735   : > { %v3120_v53 = vpop.permute.xlu0 %3119 }
 0x736   : > { %3346 = vst.msk [vmem:[#allocation2] sm:$0xff] %vm195_vm1, %v3313_v4  ;;  %v3184_v40 = vmul.f32 %v3120_v53, %v3024_v31  ;;  %v3042_v31 = vld [vmem:[#allocation2 + $0x88] sm:$0xff] }
 0x737   : > { %v3222_v52 = vpop.permute.xlu1 %3221 }
 0x738   : > { %v3315_v37 = vadd.f32 %v3222_v52, %v3027_v54  ;;  %3279 = vrot.lane.b32.xlu0 %v3184_v40, %s3880_s20 }
 0x739   : > { %v3220_v13 = vpop.permute.xlu0 %3219 }
 0x73a   : > { %3348 = vst.msk [vmem:[#allocation2 + $0x10] sm:$0xff] %vm195_vm1, %v3315_v37  ;;  %v3314_v2 = vadd.f32 %v3220_v13, %v3026_v44 }
 0x73b   : > { %v3226_v7 = vpop.permute.xlu1 %3225 }
 0x73c   : > { %3347 = vst.msk [vmem:[#allocation2 + $0x8] sm:$0xff] %vm195_vm1, %v3314_v2  ;;  %v3317_v11 = vadd.f32 %v3226_v7, %v3029_v10  ;;  %v3043_v2 = vld [vmem:[#allocation2 + $0x90] sm:$0xff] }
 0x73d   : > { %v3224_v33 = vpop.permute.xlu0 %3223  ;;  %v3381_v47 = vld [vmem:[#allocation2] sm:$0xff] }
 0x73e   : > { %3350 = vst.msk [vmem:[#allocation2 + $0x20] sm:$0xff] %vm195_vm1, %v3317_v11  ;;  %v3316_v8 = vadd.f32 %v3224_v33, %v3028_v46  ;;  %v3413_v14 = vsel %vm195_vm1, %v3381_v47, 0.0  ;;  %v3044_v33 = vld [vmem:[#allocation2 + $0x98] sm:$0xff] }
 0x73f   : > { %v3230_v29 = vpop.permute.xlu1 %3229 }
 0x740   : > { %3349 = vst.msk [vmem:[#allocation2 + $0x18] sm:$0xff] %vm195_vm1, %v3316_v8  ;;  %v3319_v20 = vadd.f32 %v3230_v29, %v3031_v15 }
 0x741   : > { %v3228_v45 = vpop.permute.xlu0 %3227  ;;  %v3383_v48 = vld [vmem:[#allocation2 + $0x10] sm:$0xff] }
 0x742   : > { %3352 = vst.msk [vmem:[#allocation2 + $0x30] sm:$0xff] %vm195_vm1, %v3319_v20  ;;  %v3318_v49 = vadd.f32 %v3228_v45, %v3030_v43  ;;  %v3416_v0 = vsel %vm195_vm1, %v3383_v48, 0.0  ;;  %v3048_v48 = vld [vmem:[#allocation2 + $0xb8] sm:$0xff] }
 0x743   : > { %v3234_v34 = vpop.permute.xlu1 %3233  ;;  %v3382_v16 = vld [vmem:[#allocation2 + $0x8] sm:$0xff] }
 0x744   : > { %3351 = vst.msk [vmem:[#allocation2 + $0x28] sm:$0xff] %vm195_vm1, %v3318_v49  ;;  %v3321_v6 = vadd.f32 %v3234_v34, %v3033_v36  ;;  %v3414_v24 = vsel %vm195_vm1, %v3382_v16, 0.0 }
 0x745   : > { %v3232_v55 = vpop.permute.xlu0 %3231  ;;  %v3415_v18 = vadd.f32 %v3414_v24, %v3413_v14  ;;  %v3385_v17 = vld [vmem:[#allocation2 + $0x20] sm:$0xff] }
 0x746   : > { %3354 = vst.msk [vmem:[#allocation2 + $0x40] sm:$0xff] %vm195_vm1, %v3321_v6  ;;  %v3320_v62 = vadd.f32 %v3232_v55, %v3032_v27  ;;  %v3420_v53 = vsel %vm195_vm1, %v3385_v17, 0.0  ;;  %v3045_v6 = vld [vmem:[#allocation2 + $0xa0] sm:$0xff] }
 0x747   : > { %v3238_v61 = vpop.permute.xlu1 %3237  ;;  %v3384_v30 = vld [vmem:[#allocation2 + $0x18] sm:$0xff]  ;;  %v3417_v12 = vadd.f32 %v3416_v0, %v3415_v18 }
 0x748   : > { %3353 = vst.msk [vmem:[#allocation2 + $0x38] sm:$0xff] %vm195_vm1, %v3320_v62  ;;  %v3323_v28 = vadd.f32 %v3238_v61, %v3035_v26  ;;  %v3418_v58 = vsel %vm195_vm1, %v3384_v30, 0.0  ;;  %v3046_v61 = vld [vmem:[#allocation2 + $0xa8] sm:$0xff] }
 0x749   : > { %v3236_v59 = vpop.permute.xlu0 %3235  ;;  %v3419_v5 = vadd.f32 %v3418_v58, %v3417_v12  ;;  %v3387_v37 = vld [vmem:[#allocation2 + $0x30] sm:$0xff]  ;;  %v3049_v58 = vld [vmem:[#allocation2 + $0xc0] sm:$0xff] }
 0x74a   : > { %3356 = vst.msk [vmem:[#allocation2 + $0x50] sm:$0xff] %vm195_vm1, %v3323_v28  ;;  %v3322_v32 = vadd.f32 %v3236_v59, %v3034_v42  ;;  %v3424_v7 = vsel %vm195_vm1, %v3387_v37, 0.0  ;;  %v3051_v37 = vld [vmem:[#allocation2 + $0xd0] sm:$0xff] }
 0x74b   : > { %v3242_v51 = vpop.permute.xlu1 %3241  ;;  %v3386_v4 = vld [vmem:[#allocation2 + $0x28] sm:$0xff]  ;;  %v3421_v40 = vadd.f32 %v3420_v53, %v3419_v5 }
 0x74c   : > { %3355 = vst.msk [vmem:[#allocation2 + $0x48] sm:$0xff] %vm195_vm1, %v3322_v32  ;;  %v3325_v60 = vadd.f32 %v3242_v51, %v3037_v57  ;;  %v3422_v44 = vsel %vm195_vm1, %v3386_v4, 0.0 }
 0x74d   : > { %v3240_v35 = vpop.permute.xlu0 %3239  ;;  %v3423_v13 = vadd.f32 %v3422_v44, %v3421_v40  ;;  %v3389_v20 = vld [vmem:[#allocation2 + $0x40] sm:$0xff] }
 0x74e   : > { %3358 = vst.msk [vmem:[#allocation2 + $0x60] sm:$0xff] %vm195_vm1, %v3325_v60  ;;  %v3324_v50 = vadd.f32 %v3240_v35, %v3036_v23  ;;  %v3428_v49 = vsel %vm195_vm1, %v3389_v20, 0.0  ;;  %v3047_v60 = vld [vmem:[#allocation2 + $0xb0] sm:$0xff] }
 0x74f   : > { %v3246_v39 = vpop.permute.xlu1 %3245  ;;  %v3388_v10 = vld [vmem:[#allocation2 + $0x38] sm:$0xff]  ;;  %v3425_v46 = vadd.f32 %v3424_v7, %v3423_v13 }
 0x750   : > { %3357 = vst.msk [vmem:[#allocation2 + $0x58] sm:$0xff] %vm195_vm1, %v3324_v50  ;;  %v3327_v22 = vadd.f32 %v3246_v39, %v3039_v25  ;;  %v3426_v15 = vsel %vm195_vm1, %v3388_v10, 0.0 }
 0x751   : > { %v3244_v3 = vpop.permute.xlu0 %3243  ;;  %v3427_v45 = vadd.f32 %v3426_v15, %v3425_v46  ;;  %v3391_v55 = vld [vmem:[#allocation2 + $0x50] sm:$0xff]  ;;  %v3052_v46 = vld [vmem:[#allocation2 + $0xd8] sm:$0xff] }
 0x752   : > { %3360 = vst.msk [vmem:[#allocation2 + $0x70] sm:$0xff] %vm195_vm1, %v3327_v22  ;;  %v3326_v9 = vadd.f32 %v3244_v3, %v3038_v56  ;;  %v3432_v59 = vsel %vm195_vm1, %v3391_v55, 0.0 }
 0x753   : > { %v3390_v36 = vld [vmem:[#allocation2 + $0x48] sm:$0xff]  ;;  %v3429_v34 = vadd.f32 %v3428_v49, %v3427_v45 }
 0x754   : > { %3359 = vst.msk [vmem:[#allocation2 + $0x68] sm:$0xff] %vm195_vm1, %v3326_v9  ;;  %v3430_v27 = vsel %vm195_vm1, %v3390_v36, 0.0 }
 0x755   : > { %v3248_v63 = vpop.permute.xlu0 %3247  ;;  %v3431_v26 = vadd.f32 %v3430_v27, %v3429_v34  ;;  %v3393_v24 = vld [vmem:[#allocation2 + $0x60] sm:$0xff] }
 0x756   : > { %v3328_v38 = vadd.f32 %v3248_v63, %v3040_v1  ;;  %v3250_v19 = vpop.permute.xlu1 %3249  ;;  %v3436_v14 = vsel %vm195_vm1, %v3393_v24, 0.0  ;;  %v3050_v63 = vld [vmem:[#allocation2 + $0xc8] sm:$0xff]  ;;  %v3055_v24 = vld [vmem:[#allocation2 + $0xf0] sm:$0xff] }
 0x757   : > { %v3329_v41 = vadd.f32 %v3250_v19, %v3041_v21  ;;  %v3392_v16 = vld [vmem:[#allocation2 + $0x58] sm:$0xff]  ;;  %v3433_v47 = vadd.f32 %v3432_v59, %v3431_v26 }
 0x758   : > { %3361 = vst.msk [vmem:[#allocation2 + $0x78] sm:$0xff] %vm195_vm1, %v3328_v38  ;;  %v3434_v32 = vsel %vm195_vm1, %v3392_v16, 0.0 }
 0x759   : > { %3362 = vst.msk [vmem:[#allocation2 + $0x80] sm:$0xff] %vm195_vm1, %v3329_v41  ;;  %v3252_v54 = vpop.permute.xlu0 %3251  ;;  %v3435_v51 = vadd.f32 %v3434_v32, %v3433_v47  ;;  %v3395_v30 = vld [vmem:[#allocation2 + $0x70] sm:$0xff] }
 0x75a   : > { %v3330_v52 = vadd.f32 %v3252_v54, %v3042_v31  ;;  %v3440_v3 = vsel %vm195_vm1, %v3395_v30, 0.0 }
 0x75b   : > { %v3394_v23 = vld [vmem:[#allocation2 + $0x68] sm:$0xff]  ;;  %v3437_v35 = vadd.f32 %v3436_v14, %v3435_v51 }
 0x75c   : > { %3363 = vst.msk [vmem:[#allocation2 + $0x88] sm:$0xff] %vm195_vm1, %v3330_v52  ;;  %v3438_v18 = vsel %vm195_vm1, %v3394_v23, 0.0 }
 0x75d   : > { %v3439_v22 = vadd.f32 %v3438_v18, %v3437_v35 }
 0x75f   : > { %v3396_v0 = vld [vmem:[#allocation2 + $0x78] sm:$0xff]  ;;  %v3441_v12 = vadd.f32 %v3440_v3, %v3439_v22 }
 0x760   : > { %v3442_v9 = vsel %vm195_vm1, %v3396_v0, 0.0  ;;  %v3397_v1 = vld [vmem:[#allocation2 + $0x80] sm:$0xff] }
 0x761   : > { %v3443_v17 = vadd.f32 %v3442_v9, %v3441_v12  ;;  %v3444_v38 = vsel %vm195_vm1, %v3397_v1, 0.0 }
 0x762   : > { %v3254_v11 = vpop.permute.xlu1 %3253 }
 0x763   : > { %v3331_v8 = vadd.f32 %v3254_v11, %v3043_v2  ;;  %v3398_v41 = vld [vmem:[#allocation2 + $0x88] sm:$0xff]  ;;  %v3445_v53 = vadd.f32 %v3444_v38, %v3443_v17 }
 0x764   : > { %v3256_v29 = vpop.permute.xlu0 %3255  ;;  %v3446_v54 = vsel %vm195_vm1, %v3398_v41, 0.0 }
 0x765   : > { %3364 = vst.msk [vmem:[#allocation2 + $0x90] sm:$0xff] %vm195_vm1, %v3331_v8  ;;  %v3332_v43 = vadd.f32 %v3256_v29, %v3044_v33  ;;  %v3447_v44 = vadd.f32 %v3446_v54, %v3445_v53 }
 0x767   : > { %3365 = vst.msk [vmem:[#allocation2 + $0x98] sm:$0xff] %vm195_vm1, %v3332_v43 }
 0x76c   : > { %v3399_v4 = vld [vmem:[#allocation2 + $0x90] sm:$0xff] }
 0x76d   : > { %v3448_v40 = vsel %vm195_vm1, %v3399_v4, 0.0 }
 0x76e   : > { %v3258_v62 = vpop.permute.xlu1 %3257  ;;  %v3400_v52 = vld [vmem:[#allocation2 + $0x98] sm:$0xff]  ;;  %v3449_v10 = vadd.f32 %v3448_v40, %v3447_v44 }
 0x76f   : > { %v3333_v42 = vadd.f32 %v3258_v62, %v3045_v6  ;;  %v3450_v2 = vsel %vm195_vm1, %v3400_v52, 0.0  ;;  %v3053_v6 = vld [vmem:[#allocation2 + $0xe0] sm:$0xff] }
 0x770   : > { %v3260_v28 = vpop.permute.xlu0 %3259  ;;  %v3451_v29 = vadd.f32 %v3450_v2, %v3449_v10 }
 0x771   : > { %3366 = vst.msk [vmem:[#allocation2 + $0xa0] sm:$0xff] %vm195_vm1, %v3333_v42  ;;  %v3334_v57 = vadd.f32 %v3260_v28, %v3046_v61  ;;  %v3054_v42 = vld [vmem:[#allocation2 + $0xe8] sm:$0xff] }
 0x773   : > { %3367 = vst.msk [vmem:[#allocation2 + $0xa8] sm:$0xff] %vm195_vm1, %v3334_v57 }
 0x778   : > { %v3401_v13 = vld [vmem:[#allocation2 + $0xa0] sm:$0xff] }
 0x779   : > { %v3452_v33 = vsel %vm195_vm1, %v3401_v13, 0.0 }
 0x77a   : > { %v3262_v25 = vpop.permute.xlu1 %3261  ;;  %v3402_v8 = vld [vmem:[#allocation2 + $0xa8] sm:$0xff]  ;;  %v3453_v45 = vadd.f32 %v3452_v33, %v3451_v29 }
 0x77b   : > { %v3335_v50 = vadd.f32 %v3262_v25, %v3047_v60  ;;  %v3454_v36 = vsel %vm195_vm1, %v3402_v8, 0.0 }
 0x77c   : > { %v3264_v39 = vpop.permute.xlu0 %3263  ;;  %v3455_v27 = vadd.f32 %v3454_v36, %v3453_v45 }
 0x77d   : > { %3368 = vst.msk [vmem:[#allocation2 + $0xb0] sm:$0xff] %vm195_vm1, %v3335_v50  ;;  %v3336_v56 = vadd.f32 %v3264_v39, %v3048_v48  ;;  %v3056_v50 = vld [vmem:[#allocation2 + $0xf8] sm:$0xff] }
 0x77f   : > { %3369 = vst.msk [vmem:[#allocation2 + $0xb8] sm:$0xff] %vm195_vm1, %v3336_v56 }
 0x784   : > { %v3403_v20 = vld [vmem:[#allocation2 + $0xb0] sm:$0xff] }
 0x785   : > { %v3456_v49 = vsel %vm195_vm1, %v3403_v20, 0.0 }
 0x786   : > { %v3266_v21 = vpop.permute.xlu1 %3265  ;;  %v3404_v34 = vld [vmem:[#allocation2 + $0xb8] sm:$0xff]  ;;  %v3457_v26 = vadd.f32 %v3456_v49, %v3455_v27 }
 0x787   : > { %v3337_v5 = vadd.f32 %v3266_v21, %v3049_v58  ;;  %v3458_v62 = vsel %vm195_vm1, %v3404_v34, 0.0 }
 0x788   : > { %v3268_v19 = vpop.permute.xlu0 %3267  ;;  %v3459_v47 = vadd.f32 %v3458_v62, %v3457_v26 }
 0x789   : > { %3370 = vst.msk [vmem:[#allocation2 + $0xc0] sm:$0xff] %vm195_vm1, %v3337_v5  ;;  %v3338_v31 = vadd.f32 %v3268_v19, %v3050_v63 }
 0x78b   : > { %3371 = vst.msk [vmem:[#allocation2 + $0xc8] sm:$0xff] %vm195_vm1, %v3338_v31 }
 0x790   : > { %v3405_v55 = vld [vmem:[#allocation2 + $0xc0] sm:$0xff] }
 0x791   : > { %v3460_v28 = vsel %vm195_vm1, %v3405_v55, 0.0 }
 0x792   : > { %v3270_v7 = vpop.permute.xlu1 %3269  ;;  %v3406_v57 = vld [vmem:[#allocation2 + $0xc8] sm:$0xff]  ;;  %v3461_v23 = vadd.f32 %v3460_v28, %v3459_v47 }
 0x793   : > { %v3339_v11 = vadd.f32 %v3270_v7, %v3051_v37  ;;  %v3462_v60 = vsel %vm195_vm1, %v3406_v57, 0.0 }
 0x794   : > { %v3272_v15 = vpop.permute.xlu0 %3271  ;;  %v3463_v18 = vadd.f32 %v3462_v60, %v3461_v23 }
 0x795   : > { %3372 = vst.msk [vmem:[#allocation2 + $0xd0] sm:$0xff] %vm195_vm1, %v3339_v11  ;;  %v3340_v43 = vadd.f32 %v3272_v15, %v3052_v46 }
 0x797   : > { %3373 = vst.msk [vmem:[#allocation2 + $0xd8] sm:$0xff] %vm195_vm1, %v3340_v43 }
 0x79c   : > { %v3407_v51 = vld [vmem:[#allocation2 + $0xd0] sm:$0xff] }
 0x79d   : > { %v3464_v25 = vsel %vm195_vm1, %v3407_v51, 0.0 }
 0x79e   : > { %v3274_v61 = vpop.permute.xlu1 %3273  ;;  %v3408_v48 = vld [vmem:[#allocation2 + $0xd8] sm:$0xff]  ;;  %v3465_v56 = vadd.f32 %v3464_v25, %v3463_v18 }
 0x79f   : > { %v3341_v16 = vadd.f32 %v3274_v61, %v3053_v6  ;;  %v3466_v30 = vsel %vm195_vm1, %v3408_v48, 0.0 }
 0x7a0   : > { %v3276_v59 = vpop.permute.xlu0 %3275  ;;  %v3467_v9 = vadd.f32 %v3466_v30, %v3465_v56 }
 0x7a1   : > { %3374 = vst.msk [vmem:[#allocation2 + $0xe0] sm:$0xff] %vm195_vm1, %v3341_v16  ;;  %v3342_v32 = vadd.f32 %v3276_v59, %v3054_v42 }
 0x7a3   : > { %3375 = vst.msk [vmem:[#allocation2 + $0xe8] sm:$0xff] %vm195_vm1, %v3342_v32 }
 0x7a4   : > { %v3278_v14 = vpop.permute.xlu1 %3277 }
 0x7a5   : > { %v3343_v35 = vadd.f32 %v3278_v14, %v3055_v24 }
 0x7a7   : > { %3376 = vst.msk [vmem:[#allocation2 + $0xf0] sm:$0xff] %vm195_vm1, %v3343_v35 }
 0x7a8   : > { %v3409_v39 = vld [vmem:[#allocation2 + $0xe0] sm:$0xff] }
 0x7a9   : > { %v3468_v3 = vsel %vm195_vm1, %v3409_v39, 0.0 }
 0x7aa   : > { %v3280_v22 = vpop.permute.xlu0 %3279  ;;  %v3410_v12 = vld [vmem:[#allocation2 + $0xe8] sm:$0xff]  ;;  %v3469_v1 = vadd.f32 %v3468_v3, %v3467_v9 }
 0x7ab   : > { %v3344_v0 = vadd.f32 %v3280_v22, %v3056_v50  ;;  %v3470_v21 = vsel %vm195_vm1, %v3410_v12, 0.0 }
 0x7ac   : > { %v3471_v17 = vadd.f32 %v3470_v21, %v3469_v1 }
 0x7ad   : > { %3377 = vst.msk [vmem:[#allocation2 + $0xf8] sm:$0xff] %vm195_vm1, %v3344_v0 }
 0x7ae   : > { %v3411_v58 = vld [vmem:[#allocation2 + $0xf0] sm:$0xff] }
 0x7af   : > { %v3472_v63 = vsel %vm195_vm1, %v3411_v58, 0.0 }
 0x7b0   : > { %v3473_v38 = vadd.f32 %v3472_v63, %v3471_v17 }
 0x7b4   : > { %v3412_v5 = vld [vmem:[#allocation2 + $0xf8] sm:$0xff] }
 0x7b5   : > { %v3474_v19 = vsel %vm195_vm1, %v3412_v5, 0.0 }
 0x7b6   : > { %v3475_v41 = vadd.f32 %v3474_v19, %v3473_v38 }
 0x7b8   : > { %3476 = vadd.xlane.f32.xlu1 %v3475_v41 }
 0x845   : > { %v3477_v31 = vpop.xlane.xlu1 %3476 }
 0x846   : > { %v3478_v4 = vrot.slane %v3477_v31, 4 }
 0x848   : > { %v3479_v53 = vadd.f32 %v3478_v4, %v3477_v31 }
 0x84a   : > { %v3480_v54 = vrot.slane %v3479_v53, 2 }
 0x84c   : > { %v3481_v40 = vadd.f32 %v3480_v54, %v3479_v53 }
 0x84e   : > { %v3482_v52 = vrot.slane %v3481_v40, 1 }
 0x850   : > { %v3483_v44 = vadd.f32 %v3482_v52, %v3481_v40 }
 0x852   : > { %3670 = vpush %v3483_v44 }
 0x883   : > { %s3671_s30 = spop %3670 }
 0x884   : > { %3486 = sst [smem:[%s174_s3]] %s3671_s30 }
 0x885   : > { %3817 = shalt.err (!%p3814_p5)
}
 0x886   : > { %3672 = dma.smem_to_vmem (%p3938_p4), %s174_s3, 16, %s3501_s29, %s3488_s4  }
 0x887 PF: > { %p3614_p6 = scmp.lt.s32.totalorder %s3868_s14, 2 }
 0x888   : > { %s3512_s12 = sand.u32 (!%p3614_p6), 1, %s3848_s9  }
 0x889   : > { %3507 = sbr.rel (%p3614_p6) target bundleno = 2195 (0x893), region = 44  ;;  %s3513_s16 = scalar_lea.sflag (!%p3614_p6), [#allocation4], %s3512_s12 }
 0x890   : > { %3843 = dma.done.wait (%p3945_p8), %s3513_s16, 16  }
 0x891   : > { %3845 = vsyncadd (%p3945_p8), %s3513_s16, 4294967280 }
 0x892   : > { %3518 = sfence }
 0x893 PF: > { %s15_s14 = sadd.s32 1, %s3868_s14   ;;  %s6453_s9 = smov %s3852_s10 }
 0x894   : > { %p12_p7 = scmp.ge.s32.totalorder %s15_s14, 6   ;;  %s6454_s10 = smov %s3856_s11 }
 0x895   : > { %s6455_s11 = smov %s3951_s22  ;;  %s6456_s12 = smov %s3864_s13 }
 0x896   : > { %s6457_s13 = smov %s6459_s17  ;;  %14 = sbr.rel (!%p12_p7) target bundleno = 4 (0x4), region = 75 }
 0x89d   :  { %3519 = vsyncpa [#allocation4], 1 }
 0x89e   :  { %3521 = vsyncpa [#allocation4 + $0x1], 1 }

</bundles_post_ra>
